<compile_context>
chip_gen: v7x
topology: tpu7x:2x2x1
jax: 0.10.0
libtpu: 0.0.40
codegen_flags: <defaults>
</compile_context>

<pallas_src>
import functools
import math

import jax
import jax.numpy as jnp
from jax.experimental import pallas as pl
from jax.experimental.pallas import tpu as pltpu

# softplus(_RHO_UNIT_SIGMA) == 1.0, so padded parameters (mu = eps = 0,
# p = _RHO_UNIT_SIGMA) reparameterize to exactly 0 and contribute 0 to the KL.
_RHO_UNIT_SIGMA = math.log(math.e - 1.0)


def _round_up(x, m):
    return (x + m - 1) // m * m


def _softplus(p):
    # Numerically stable softplus: log(1 + exp(p)).
    return jnp.maximum(p, 0.0) + jnp.log1p(jnp.exp(-jnp.abs(p)))


# ---------------------------------------------------------------------------
# Kernel A: reparameterize all 6 parameter tensors once + accumulate KL.
# Runs as a single grid point; everything in f32; weights stored in
# compute_dtype for the MXU path of kernel B.
# ---------------------------------------------------------------------------
def _reparam_kl_kernel(*refs, inv_n_batches):
    (wmu1, wp1, we1, bmu1, bp1, be1,
     wmu2, wp2, we2, bmu2, bp2, be2,
     wmu3, wp3, we3, bmu3, bp3, be3,
     w1o, b1o, w2o, b2o, w3o, b3o, kl_ref) = refs

    def one(mu_ref, p_ref, eps_ref, out_ref):
        mu = mu_ref[...]
        p = p_ref[...]
        e = eps_ref[...]
        sigma = _softplus(p)                       # computed once, reused
        w = mu + e * sigma                         # f32 reparameterization
        out_ref[...] = w.astype(out_ref.dtype)
        # log q(w;mu,sigma) - log N(w;0,1) with (w-mu)/sigma == eps:
        #   0.5*(w^2 - eps^2) - log(sigma)   (0.5*log(2*pi) cancels)
        # Padded elements contribute exactly 0 (mu=eps=0, sigma=1) -> no mask.
        return jnp.sum(0.5 * (w * w - e * e) - jnp.log(sigma))

    kl = one(wmu1, wp1, we1, w1o)
    kl += one(bmu1, bp1, be1, b1o)
    kl += one(wmu2, wp2, we2, w2o)
    kl += one(bmu2, bp2, be2, b2o)
    kl += one(wmu3, wp3, we3, w3o)
    kl += one(bmu3, bp3, be3, b3o)
    kl_ref[0, 0] = kl * inv_n_batches


# ---------------------------------------------------------------------------
# Kernel B: 3-layer MLP on the sampled weights, tiled over the batch.
# Weight/bias inputs use constant index maps -> DMA'd once per core, then the
# revolving buffer is reused every step; the batch axis is "parallel".
# ---------------------------------------------------------------------------
def _mlp_kernel(x_ref, w1_ref, b1_ref, w2_ref, b2_ref, w3_ref, b3_ref, z_ref):
    cdt = w1_ref.dtype
    x = x_ref[...].astype(cdt)
    h1 = jnp.dot(x, w1_ref[...], preferred_element_type=jnp.float32) + b1_ref[...]
    h1 = jnp.maximum(h1, 0.0).astype(cdt)
    h2 = jnp.dot(h1, w2_ref[...], preferred_element_type=jnp.float32) + b2_ref[...]
    h2 = jnp.maximum(h2, 0.0).astype(cdt)
    z = jnp.dot(h2, w3_ref[...], preferred_element_type=jnp.float32) + b3_ref[...]
    z_ref[...] = z.astype(z_ref.dtype)


# ---------------------------------------------------------------------------
# Host wrapper.
# ---------------------------------------------------------------------------
def bayes_mlp_forward(x, params, eps, n_batches, compute_dtype=jnp.bfloat16):
    """x: (B, in). params/eps: dicts of per-layer tensors. Returns (z, kl).

    compute_dtype controls the matmul path (bf16 default -> f32 accumulation);
    reparameterization and KL are always f32.
    """
    B, in_f = x.shape
    hid_f = params["w_mu1"].shape[1]
    out_f = params["w_mu3"].shape[1]

    f32 = jnp.float32
    f32b = 4
    cbytes = jnp.dtype(compute_dtype).itemsize

    # Lane-dense padding: feature dims -> multiples of 128, batch -> mult of 8.
    in_p = _round_up(in_f, 128)
    hid_p = _round_up(hid_f, 128)
    out_p = _round_up(out_f, 128)
    B8 = _round_up(B, 8)

    n_w = in_p * hid_p + hid_p * hid_p + hid_p * out_p
    n_b = 2 * hid_p + out_p

    # ---- VMEM budget (per generation) ----------------------------------
    try:
        phys_vmem = int(pltpu.get_tpu_info().vmem_capacity_bytes)
    except Exception:
        phys_vmem = 64 * 1024 * 1024            # conservative fallback
    budget = max(32 * 1024 * 1024, phys_vmem - 8 * 1024 * 1024)

    # Kernel A footprint: 18 padded f32 inputs + 6 outputs (single shot).
    need_a = 3 * f32b * (n_w + n_b) + cbytes * n_w + f32b * n_b
    # Kernel B steady state: weights/biases counted at 2x (default buffering).
    need_b_w = 2 * cbytes * n_w + 2 * 8 * f32b * n_b

    def tile_bytes(tb):
        # double-buffered x/z tiles + f32 intermediates (with slack)
        return 2 * f32b * tb * (in_p + out_p) + 4 * f32b * tb * hid_p

    # ---- batch tile: as large as the budget allows (multiple of 8) ------
    TB = min(B8, 512)
    while TB > 8 and need_b_w + tile_bytes(TB) > budget:
        TB = max(8, _round_up(TB // 2, 8))
    B_p = _round_up(B8, TB)

    vmem_limit = int(max(need_a, need_b_w + tile_bytes(TB)) * 2 + (8 << 20))
    vmem_limit = int(min(max(vmem_limit, 16 << 20), budget))

    # ---- host-side padding (no packing/stacking -> one copy, not two) ---
    def pad_w(a, kp, np_, cval=0.0):
        return jnp.pad(a.astype(f32),
                       ((0, kp - a.shape[0]), (0, np_ - a.shape[1])),
                       constant_values=cval)

    def pad_b(a, np_, cval=0.0):
        return jnp.pad(a.astype(f32), (0, np_ - a.shape[0]),
                       constant_values=cval).reshape(1, np_)

    layer_dims = [(in_p, hid_p), (hid_p, hid_p), (hid_p, out_p)]
    a_inputs = []
    for i, (kp, np_) in enumerate(layer_dims, start=1):
        a_inputs += [
            pad_w(params[f"w_mu{i}"], kp, np_),
            pad_w(params[f"w_p{i}"], kp, np_, _RHO_UNIT_SIGMA),
            pad_w(eps[f"w{i}"], kp, np_),
            pad_b(params[f"b_mu{i}"], np_),
            pad_b(params[f"b_p{i}"], np_, _RHO_UNIT_SIGMA),
            pad_b(eps[f"b{i}"], np_),
        ]

    x_p = jnp.pad(x.astype(f32), ((0, B_p - B), (0, in_p - in_f)))

    # ---- Kernel A: reparameterize + KL (single invocation) --------------
    vmem_spec = pl.BlockSpec(memory_space=pltpu.MemorySpace.VMEM)
    a_out_shape = (
        jax.ShapeDtypeStruct((in_p, hid_p), compute_dtype),
        jax.ShapeDtypeStruct((1, hid_p), f32),
        jax.ShapeDtypeStruct((hid_p, hid_p), compute_dtype),
        jax.ShapeDtypeStruct((1, hid_p), f32),
        jax.ShapeDtypeStruct((hid_p, out_p), compute_dtype),
        jax.ShapeDtypeStruct((1, out_p), f32),
        jax.ShapeDtypeStruct((1, 1), f32),
    )
    a_cost = pl.CostEstimate(
        flops=4 * (n_w + n_b),
        transcendentals=3 * (n_w + n_b),
        bytes_accessed=3 * f32b * (n_w + n_b) + cbytes * n_w + f32b * n_b + 4,
    )
    w1p, b1p, w2p, b2p, w3p, b3p, kl = pl.pallas_call(
        functools.partial(_reparam_kl_kernel,
                          inv_n_batches=1.0 / float(n_batches)),
        out_shape=a_out_shape,
        in_specs=[vmem_spec] * 18,
        out_specs=(vmem_spec, vmem_spec, vmem_spec, vmem_spec, vmem_spec,
                   vmem_spec,
                   pl.BlockSpec(memory_space=pltpu.MemorySpace.SMEM)),
        compiler_params=pltpu.CompilerParams(vmem_limit_bytes=vmem_limit),
        cost_estimate=a_cost,
    )(*a_inputs)

    # ---- Kernel B: batch-tiled MLP, batch axis parallel (megacore) ------
    b_cost = pl.CostEstimate(
        flops=2 * B_p * n_w,
        transcendentals=0,
        bytes_accessed=(B_p * in_p * f32b + B_p * out_p * f32b
                        + cbytes * n_w + f32b * n_b),
    )
    grid_spec = pltpu.PrefetchScalarGridSpec(
        num_scalar_prefetch=0,
        grid=(B_p // TB,),
        in_specs=[
            pl.BlockSpec((TB, in_p), lambda i: (i, 0)),        # x tile
            pl.BlockSpec((in_p, hid_p), lambda i: (0, 0)),     # w1 (resident)
            pl.BlockSpec((1, hid_p), lambda i: (0, 0)),        # b1
            pl.BlockSpec((hid_p, hid_p), lambda i: (0, 0)),    # w2
            pl.BlockSpec((1, hid_p), lambda i: (0, 0)),        # b2
            pl.BlockSpec((hid_p, out_p), lambda i: (0, 0)),    # w3
            pl.BlockSpec((1, out_p), lambda i: (0, 0)),        # b3
        ],
        out_specs=pl.BlockSpec((TB, out_p), lambda i: (i, 0)),  # z tile
    )
    # TODO(synk): for very small out_f, fold batch rows into the lane dim
    # before writeback instead of padding out_f->128 (avoids ~16x z bytes).
    z_p = pl.pallas_call(
        _mlp_kernel,
        out_shape=jax.ShapeDtypeStruct((B_p, out_p), f32),
        grid_spec=grid_spec,
        compiler_params=pltpu.CompilerParams(
            dimension_semantics=("parallel",),
            vmem_limit_bytes=vmem_limit,
        ),
        cost_estimate=b_cost,
    )(x_p, w1p, b1p, w2p, b2p, w3p, b3p)

    return z_p[:B, :out_f], kl[0, 0]


# ----------------------------------------------------------------------------
# Host-side parameter / eps construction and a pure-JAX reference.
# ----------------------------------------------------------------------------
def init_params(key, in_size, hidden_size, out_size):
    sizes = [(in_size, hidden_size), (hidden_size, hidden_size),
             (hidden_size, out_size)]
    params, eps = {}, {}
    for i, (fan_in, fan_out) in enumerate(sizes, start=1):
        key, k1, k2, k3, k4 = jax.random.split(key, 5)
        params[f"w_mu{i}"] = 0.001 * jax.random.normal(
            k1, (fan_in, fan_out), jnp.float32)
        params[f"w_p{i}"] = -2.5 + 0.001 * jax.random.normal(
            k2, (fan_in, fan_out), jnp.float32)
        params[f"b_mu{i}"] = jnp.zeros((fan_out,), jnp.float32)
        params[f"b_p{i}"] = jnp.zeros((fan_out,), jnp.float32)
        eps[f"w{i}"] = jax.random.normal(k3, (fan_in, fan_out), jnp.float32)
        eps[f"b{i}"] = jax.random.normal(k4, (fan_out,), jnp.float32)
    return params, eps


def reference_forward(x, params, eps, n_batches):
    """Pure-JAX reference using the *unsimplified* KL formula."""
    def logpdf(z, mu, sigma):
        return (-0.5 * jnp.square((z - mu) / sigma) - jnp.log(sigma)
                - 0.5 * jnp.log(2.0 * jnp.pi))

    kl = 0.0
    h = x
    for i in range(1, 4):
        w_sigma = jnp.log1p(jnp.exp(params[f"w_p{i}"]))
        b_sigma = jnp.log1p(jnp.exp(params[f"b_p{i}"]))
        w = params[f"w_mu{i}"] + eps[f"w{i}"] * w_sigma
        b = params[f"b_mu{i}"] + eps[f"b{i}"] * b_sigma
        h = h @ w + b
        if i < 3:
            h = jnp.maximum(h, 0.0)
        kl = kl + jnp.sum(logpdf(w, params[f"w_mu{i}"], w_sigma)
                          - logpdf(w, 0.0, 1.0)) / n_batches
        kl = kl + jnp.sum(logpdf(b, params[f"b_mu{i}"], b_sigma)
                          - logpdf(b, 0.0, 1.0)) / n_batches
    return h, kl


if __name__ == "__main__":
    in_size, hidden_size, out_size, n_batches = 16, 32, 8, 4
    batch = 8

    key = jax.random.PRNGKey(0)
    key, kx, kp = jax.random.split(key, 3)
    x = jax.random.normal(kx, (batch, in_size), jnp.float32)
    params, eps = init_params(kp, in_size, hidden_size, out_size)

    z_ref, kl_ref = reference_forward(x, params, eps, n_batches)

    # f32 matmul path: tight check.
    z32, kl32 = bayes_mlp_forward(x, params, eps, n_batches,
                                  compute_dtype=jnp.float32)
    jax.block_until_ready((z32, kl32))
    assert z32.shape == z_ref.shape
    assert jnp.allclose(z32, z_ref, atol=1e-4, rtol=1e-4), "z (f32) mismatch"
    assert jnp.allclose(kl32, kl_ref, atol=5e-2, rtol=1e-4), "kl (f32) mismatch"

    # Default bf16 matmul path: looser activation tolerance (KL stays f32).
    zbf, klbf = bayes_mlp_forward(x, params, eps, n_batches)
    jax.block_until_ready((zbf, klbf))
    assert zbf.shape == z_ref.shape
    assert jnp.allclose(zbf, z_ref, atol=3e-2, rtol=3e-2), "z (bf16) mismatch"
    assert jnp.allclose(klbf, kl_ref, atol=5e-2, rtol=1e-4), "kl (bf16) mismatch"

    print("KERNEL_OK")
</pallas_src>

<mosaic_0001>
module attributes {stable_mosaic.version = 11 : i64} {
  func.func @_reparam_kl_kernel(%arg0: memref<128x128xf32, #tpu.memory_space<vmem>>, %arg1: memref<128x128xf32, #tpu.memory_space<vmem>>, %arg2: memref<128x128xf32, #tpu.memory_space<vmem>>, %arg3: memref<1x128xf32, #tpu.memory_space<vmem>>, %arg4: memref<1x128xf32, #tpu.memory_space<vmem>>, %arg5: memref<1x128xf32, #tpu.memory_space<vmem>>, %arg6: memref<128x128xf32, #tpu.memory_space<vmem>>, %arg7: memref<128x128xf32, #tpu.memory_space<vmem>>, %arg8: memref<128x128xf32, #tpu.memory_space<vmem>>, %arg9: memref<1x128xf32, #tpu.memory_space<vmem>>, %arg10: memref<1x128xf32, #tpu.memory_space<vmem>>, %arg11: memref<1x128xf32, #tpu.memory_space<vmem>>, %arg12: memref<128x128xf32, #tpu.memory_space<vmem>>, %arg13: memref<128x128xf32, #tpu.memory_space<vmem>>, %arg14: memref<128x128xf32, #tpu.memory_space<vmem>>, %arg15: memref<1x128xf32, #tpu.memory_space<vmem>>, %arg16: memref<1x128xf32, #tpu.memory_space<vmem>>, %arg17: memref<1x128xf32, #tpu.memory_space<vmem>>, %arg18: memref<128x128xf32, #tpu.memory_space<vmem>>, %arg19: memref<1x128xf32, #tpu.memory_space<vmem>>, %arg20: memref<128x128xf32, #tpu.memory_space<vmem>>, %arg21: memref<1x128xf32, #tpu.memory_space<vmem>>, %arg22: memref<128x128xf32, #tpu.memory_space<vmem>>, %arg23: memref<1x128xf32, #tpu.memory_space<vmem>>, %arg24: memref<1x1xf32, #tpu.memory_space<smem>>) attributes {dimension_semantics = [], scalar_prefetch = 0 : i64, scratch_operands = 0 : i64, tpu.core_type = #tpu.core_type<tc>} {
    %c0 = arith.constant 0 : index
    %c0_0 = arith.constant 0 : index
    %0 = vector.load %arg0[%c0, %c0_0] : memref<128x128xf32, #tpu.memory_space<vmem>>, vector<128x128xf32>
    %c0_1 = arith.constant 0 : index
    %c0_2 = arith.constant 0 : index
    %1 = vector.load %arg1[%c0_1, %c0_2] : memref<128x128xf32, #tpu.memory_space<vmem>>, vector<128x128xf32>
    %c0_3 = arith.constant 0 : index
    %c0_4 = arith.constant 0 : index
    %2 = vector.load %arg2[%c0_3, %c0_4] : memref<128x128xf32, #tpu.memory_space<vmem>>, vector<128x128xf32>
    %cst = arith.constant 0.000000e+00 : f32
    %3 = vector.broadcast %cst : f32 to vector<128x128xf32>
    %4 = arith.maximumf %1, %3 : vector<128x128xf32>
    %5 = math.absf %1 : vector<128x128xf32>
    %cst_5 = arith.constant 0.000000e+00 : f32
    %6 = vector.broadcast %cst_5 : f32 to vector<128x128xf32>
    %7 = arith.subf %6, %5 : vector<128x128xf32>
    %8 = math.exp %7 : vector<128x128xf32>
    %9 = math.log1p %8 : vector<128x128xf32>
    %10 = arith.addf %4, %9 : vector<128x128xf32>
    %11 = arith.mulf %2, %10 : vector<128x128xf32>
    %12 = arith.addf %0, %11 : vector<128x128xf32>
    %c0_6 = arith.constant 0 : index
    %c0_7 = arith.constant 0 : index
    %13 = vector.load %arg18[%c0_6, %c0_7] : memref<128x128xf32, #tpu.memory_space<vmem>>, vector<128x128xf32>
    tpu.vector_store %arg18[%c0_6, %c0_7], %12 {strides = array<i32>} : memref<128x128xf32, #tpu.memory_space<vmem>>, vector<128x128xf32>,
    %14 = arith.mulf %12, %12 : vector<128x128xf32>
    %15 = arith.mulf %2, %2 : vector<128x128xf32>
    %16 = arith.subf %14, %15 : vector<128x128xf32>
    %cst_8 = arith.constant 5.000000e-01 : f32
    %17 = vector.broadcast %cst_8 : f32 to vector<128x128xf32>
    %18 = arith.mulf %17, %16 : vector<128x128xf32>
    %19 = math.log %10 : vector<128x128xf32>
    %20 = arith.subf %18, %19 : vector<128x128xf32>
    %21 = vector.shape_cast %20 : vector<128x128xf32> to vector<1x128x128xf32>
    %cst_9 = arith.constant dense<0.000000e+00> : vector<1xf32>
    %22 = vector.multi_reduction <add>, %21, %cst_9 [1, 2] : vector<1x128x128xf32> to vector<1xf32>
    %23 = vector.shape_cast %22 : vector<1xf32> to vector<1x1x1xf32>
    %24 = vector.extract %23[0, 0, 0] : f32 from vector<1x1x1xf32>
    %c0_10 = arith.constant 0 : index
    %c0_11 = arith.constant 0 : index
    %25 = vector.load %arg3[%c0_10, %c0_11] : memref<1x128xf32, #tpu.memory_space<vmem>>, vector<1x128xf32>
    %c0_12 = arith.constant 0 : index
    %c0_13 = arith.constant 0 : index
    %26 = vector.load %arg4[%c0_12, %c0_13] : memref<1x128xf32, #tpu.memory_space<vmem>>, vector<1x128xf32>
    %c0_14 = arith.constant 0 : index
    %c0_15 = arith.constant 0 : index
    %27 = vector.load %arg5[%c0_14, %c0_15] : memref<1x128xf32, #tpu.memory_space<vmem>>, vector<1x128xf32>
    %cst_16 = arith.constant 0.000000e+00 : f32
    %28 = vector.broadcast %cst_16 : f32 to vector<1x128xf32>
    %29 = arith.maximumf %26, %28 : vector<1x128xf32>
    %30 = math.absf %26 : vector<1x128xf32>
    %cst_17 = arith.constant 0.000000e+00 : f32
    %31 = vector.broadcast %cst_17 : f32 to vector<1x128xf32>
    %32 = arith.subf %31, %30 : vector<1x128xf32>
    %33 = math.exp %32 : vector<1x128xf32>
    %34 = math.log1p %33 : vector<1x128xf32>
    %35 = arith.addf %29, %34 : vector<1x128xf32>
    %36 = arith.mulf %27, %35 : vector<1x128xf32>
    %37 = arith.addf %25, %36 : vector<1x128xf32>
    %c0_18 = arith.constant 0 : index
    %c0_19 = arith.constant 0 : index
    %38 = vector.load %arg19[%c0_18, %c0_19] : memref<1x128xf32, #tpu.memory_space<vmem>>, vector<1x128xf32>
    tpu.vector_store %arg19[%c0_18, %c0_19], %37 {strides = array<i32>} : memref<1x128xf32, #tpu.memory_space<vmem>>, vector<1x128xf32>,
    %39 = arith.mulf %37, %37 : vector<1x128xf32>
    %40 = arith.mulf %27, %27 : vector<1x128xf32>
    %41 = arith.subf %39, %40 : vector<1x128xf32>
    %cst_20 = arith.constant 5.000000e-01 : f32
    %42 = vector.broadcast %cst_20 : f32 to vector<1x128xf32>
    %43 = arith.mulf %42, %41 : vector<1x128xf32>
    %44 = math.log %35 : vector<1x128xf32>
    %45 = arith.subf %43, %44 : vector<1x128xf32>
    %46 = vector.shape_cast %45 : vector<1x128xf32> to vector<1x1x128xf32>
    %cst_21 = arith.constant dense<0.000000e+00> : vector<1xf32>
    %47 = vector.multi_reduction <add>, %46, %cst_21 [1, 2] : vector<1x1x128xf32> to vector<1xf32>
    %48 = vector.shape_cast %47 : vector<1xf32> to vector<1x1x1xf32>
    %49 = vector.extract %48[0, 0, 0] : f32 from vector<1x1x1xf32>
    %50 = arith.addf %24, %49 : f32
    %c0_22 = arith.constant 0 : index
    %c0_23 = arith.constant 0 : index
    %51 = vector.load %arg6[%c0_22, %c0_23] : memref<128x128xf32, #tpu.memory_space<vmem>>, vector<128x128xf32>
    %c0_24 = arith.constant 0 : index
    %c0_25 = arith.constant 0 : index
    %52 = vector.load %arg7[%c0_24, %c0_25] : memref<128x128xf32, #tpu.memory_space<vmem>>, vector<128x128xf32>
    %c0_26 = arith.constant 0 : index
    %c0_27 = arith.constant 0 : index
    %53 = vector.load %arg8[%c0_26, %c0_27] : memref<128x128xf32, #tpu.memory_space<vmem>>, vector<128x128xf32>
    %cst_28 = arith.constant 0.000000e+00 : f32
    %54 = vector.broadcast %cst_28 : f32 to vector<128x128xf32>
    %55 = arith.maximumf %52, %54 : vector<128x128xf32>
    %56 = math.absf %52 : vector<128x128xf32>
    %cst_29 = arith.constant 0.000000e+00 : f32
    %57 = vector.broadcast %cst_29 : f32 to vector<128x128xf32>
    %58 = arith.subf %57, %56 : vector<128x128xf32>
    %59 = math.exp %58 : vector<128x128xf32>
    %60 = math.log1p %59 : vector<128x128xf32>
    %61 = arith.addf %55, %60 : vector<128x128xf32>
    %62 = arith.mulf %53, %61 : vector<128x128xf32>
    %63 = arith.addf %51, %62 : vector<128x128xf32>
    %c0_30 = arith.constant 0 : index
    %c0_31 = arith.constant 0 : index
    %64 = vector.load %arg20[%c0_30, %c0_31] : memref<128x128xf32, #tpu.memory_space<vmem>>, vector<128x128xf32>
    tpu.vector_store %arg20[%c0_30, %c0_31], %63 {strides = array<i32>} : memref<128x128xf32, #tpu.memory_space<vmem>>, vector<128x128xf32>,
    %65 = arith.mulf %63, %63 : vector<128x128xf32>
    %66 = arith.mulf %53, %53 : vector<128x128xf32>
    %67 = arith.subf %65, %66 : vector<128x128xf32>
    %cst_32 = arith.constant 5.000000e-01 : f32
    %68 = vector.broadcast %cst_32 : f32 to vector<128x128xf32>
    %69 = arith.mulf %68, %67 : vector<128x128xf32>
    %70 = math.log %61 : vector<128x128xf32>
    %71 = arith.subf %69, %70 : vector<128x128xf32>
    %72 = vector.shape_cast %71 : vector<128x128xf32> to vector<1x128x128xf32>
    %cst_33 = arith.constant dense<0.000000e+00> : vector<1xf32>
    %73 = vector.multi_reduction <add>, %72, %cst_33 [1, 2] : vector<1x128x128xf32> to vector<1xf32>
    %74 = vector.shape_cast %73 : vector<1xf32> to vector<1x1x1xf32>
    %75 = vector.extract %74[0, 0, 0] : f32 from vector<1x1x1xf32>
    %76 = arith.addf %50, %75 : f32
    %c0_34 = arith.constant 0 : index
    %c0_35 = arith.constant 0 : index
    %77 = vector.load %arg9[%c0_34, %c0_35] : memref<1x128xf32, #tpu.memory_space<vmem>>, vector<1x128xf32>
    %c0_36 = arith.constant 0 : index
    %c0_37 = arith.constant 0 : index
    %78 = vector.load %arg10[%c0_36, %c0_37] : memref<1x128xf32, #tpu.memory_space<vmem>>, vector<1x128xf32>
    %c0_38 = arith.constant 0 : index
    %c0_39 = arith.constant 0 : index
    %79 = vector.load %arg11[%c0_38, %c0_39] : memref<1x128xf32, #tpu.memory_space<vmem>>, vector<1x128xf32>
    %cst_40 = arith.constant 0.000000e+00 : f32
    %80 = vector.broadcast %cst_40 : f32 to vector<1x128xf32>
    %81 = arith.maximumf %78, %80 : vector<1x128xf32>
    %82 = math.absf %78 : vector<1x128xf32>
    %cst_41 = arith.constant 0.000000e+00 : f32
    %83 = vector.broadcast %cst_41 : f32 to vector<1x128xf32>
    %84 = arith.subf %83, %82 : vector<1x128xf32>
    %85 = math.exp %84 : vector<1x128xf32>
    %86 = math.log1p %85 : vector<1x128xf32>
    %87 = arith.addf %81, %86 : vector<1x128xf32>
    %88 = arith.mulf %79, %87 : vector<1x128xf32>
    %89 = arith.addf %77, %88 : vector<1x128xf32>
    %c0_42 = arith.constant 0 : index
    %c0_43 = arith.constant 0 : index
    %90 = vector.load %arg21[%c0_42, %c0_43] : memref<1x128xf32, #tpu.memory_space<vmem>>, vector<1x128xf32>
    tpu.vector_store %arg21[%c0_42, %c0_43], %89 {strides = array<i32>} : memref<1x128xf32, #tpu.memory_space<vmem>>, vector<1x128xf32>,
    %91 = arith.mulf %89, %89 : vector<1x128xf32>
    %92 = arith.mulf %79, %79 : vector<1x128xf32>
    %93 = arith.subf %91, %92 : vector<1x128xf32>
    %cst_44 = arith.constant 5.000000e-01 : f32
    %94 = vector.broadcast %cst_44 : f32 to vector<1x128xf32>
    %95 = arith.mulf %94, %93 : vector<1x128xf32>
    %96 = math.log %87 : vector<1x128xf32>
    %97 = arith.subf %95, %96 : vector<1x128xf32>
    %98 = vector.shape_cast %97 : vector<1x128xf32> to vector<1x1x128xf32>
    %cst_45 = arith.constant dense<0.000000e+00> : vector<1xf32>
    %99 = vector.multi_reduction <add>, %98, %cst_45 [1, 2] : vector<1x1x128xf32> to vector<1xf32>
    %100 = vector.shape_cast %99 : vector<1xf32> to vector<1x1x1xf32>
    %101 = vector.extract %100[0, 0, 0] : f32 from vector<1x1x1xf32>
    %102 = arith.addf %76, %101 : f32
    %c0_46 = arith.constant 0 : index
    %c0_47 = arith.constant 0 : index
    %103 = vector.load %arg12[%c0_46, %c0_47] : memref<128x128xf32, #tpu.memory_space<vmem>>, vector<128x128xf32>
    %c0_48 = arith.constant 0 : index
    %c0_49 = arith.constant 0 : index
    %104 = vector.load %arg13[%c0_48, %c0_49] : memref<128x128xf32, #tpu.memory_space<vmem>>, vector<128x128xf32>
    %c0_50 = arith.constant 0 : index
    %c0_51 = arith.constant 0 : index
    %105 = vector.load %arg14[%c0_50, %c0_51] : memref<128x128xf32, #tpu.memory_space<vmem>>, vector<128x128xf32>
    %cst_52 = arith.constant 0.000000e+00 : f32
    %106 = vector.broadcast %cst_52 : f32 to vector<128x128xf32>
    %107 = arith.maximumf %104, %106 : vector<128x128xf32>
    %108 = math.absf %104 : vector<128x128xf32>
    %cst_53 = arith.constant 0.000000e+00 : f32
    %109 = vector.broadcast %cst_53 : f32 to vector<128x128xf32>
    %110 = arith.subf %109, %108 : vector<128x128xf32>
    %111 = math.exp %110 : vector<128x128xf32>
    %112 = math.log1p %111 : vector<128x128xf32>
    %113 = arith.addf %107, %112 : vector<128x128xf32>
    %114 = arith.mulf %105, %113 : vector<128x128xf32>
    %115 = arith.addf %103, %114 : vector<128x128xf32>
    %c0_54 = arith.constant 0 : index
    %c0_55 = arith.constant 0 : index
    %116 = vector.load %arg22[%c0_54, %c0_55] : memref<128x128xf32, #tpu.memory_space<vmem>>, vector<128x128xf32>
    tpu.vector_store %arg22[%c0_54, %c0_55], %115 {strides = array<i32>} : memref<128x128xf32, #tpu.memory_space<vmem>>, vector<128x128xf32>,
    %117 = arith.mulf %115, %115 : vector<128x128xf32>
    %118 = arith.mulf %105, %105 : vector<128x128xf32>
    %119 = arith.subf %117, %118 : vector<128x128xf32>
    %cst_56 = arith.constant 5.000000e-01 : f32
    %120 = vector.broadcast %cst_56 : f32 to vector<128x128xf32>
    %121 = arith.mulf %120, %119 : vector<128x128xf32>
    %122 = math.log %113 : vector<128x128xf32>
    %123 = arith.subf %121, %122 : vector<128x128xf32>
    %124 = vector.shape_cast %123 : vector<128x128xf32> to vector<1x128x128xf32>
    %cst_57 = arith.constant dense<0.000000e+00> : vector<1xf32>
    %125 = vector.multi_reduction <add>, %124, %cst_57 [1, 2] : vector<1x128x128xf32> to vector<1xf32>
    %126 = vector.shape_cast %125 : vector<1xf32> to vector<1x1x1xf32>
    %127 = vector.extract %126[0, 0, 0] : f32 from vector<1x1x1xf32>
    %128 = arith.addf %102, %127 : f32
    %c0_58 = arith.constant 0 : index
    %c0_59 = arith.constant 0 : index
    %129 = vector.load %arg15[%c0_58, %c0_59] : memref<1x128xf32, #tpu.memory_space<vmem>>, vector<1x128xf32>
    %c0_60 = arith.constant 0 : index
    %c0_61 = arith.constant 0 : index
    %130 = vector.load %arg16[%c0_60, %c0_61] : memref<1x128xf32, #tpu.memory_space<vmem>>, vector<1x128xf32>
    %c0_62 = arith.constant 0 : index
    %c0_63 = arith.constant 0 : index
    %131 = vector.load %arg17[%c0_62, %c0_63] : memref<1x128xf32, #tpu.memory_space<vmem>>, vector<1x128xf32>
    %cst_64 = arith.constant 0.000000e+00 : f32
    %132 = vector.broadcast %cst_64 : f32 to vector<1x128xf32>
    %133 = arith.maximumf %130, %132 : vector<1x128xf32>
    %134 = math.absf %130 : vector<1x128xf32>
    %cst_65 = arith.constant 0.000000e+00 : f32
    %135 = vector.broadcast %cst_65 : f32 to vector<1x128xf32>
    %136 = arith.subf %135, %134 : vector<1x128xf32>
    %137 = math.exp %136 : vector<1x128xf32>
    %138 = math.log1p %137 : vector<1x128xf32>
    %139 = arith.addf %133, %138 : vector<1x128xf32>
    %140 = arith.mulf %131, %139 : vector<1x128xf32>
    %141 = arith.addf %129, %140 : vector<1x128xf32>
    %c0_66 = arith.constant 0 : index
    %c0_67 = arith.constant 0 : index
    %142 = vector.load %arg23[%c0_66, %c0_67] : memref<1x128xf32, #tpu.memory_space<vmem>>, vector<1x128xf32>
    tpu.vector_store %arg23[%c0_66, %c0_67], %141 {strides = array<i32>} : memref<1x128xf32, #tpu.memory_space<vmem>>, vector<1x128xf32>,
    %143 = arith.mulf %141, %141 : vector<1x128xf32>
    %144 = arith.mulf %131, %131 : vector<1x128xf32>
    %145 = arith.subf %143, %144 : vector<1x128xf32>
    %cst_68 = arith.constant 5.000000e-01 : f32
    %146 = vector.broadcast %cst_68 : f32 to vector<1x128xf32>
    %147 = arith.mulf %146, %145 : vector<1x128xf32>
    %148 = math.log %139 : vector<1x128xf32>
    %149 = arith.subf %147, %148 : vector<1x128xf32>
    %150 = vector.shape_cast %149 : vector<1x128xf32> to vector<1x1x128xf32>
    %cst_69 = arith.constant dense<0.000000e+00> : vector<1xf32>
    %151 = vector.multi_reduction <add>, %150, %cst_69 [1, 2] : vector<1x1x128xf32> to vector<1xf32>
    %152 = vector.shape_cast %151 : vector<1xf32> to vector<1x1x1xf32>
    %153 = vector.extract %152[0, 0, 0] : f32 from vector<1x1x1xf32>
    %154 = arith.addf %128, %153 : f32
    %cst_70 = arith.constant 2.500000e-01 : f32
    %155 = arith.mulf %154, %cst_70 : f32
    %c0_71 = arith.constant 0 : index
    %c0_72 = arith.constant 0 : index
    %156 = memref.load %arg24[%c0_71, %c0_72] : memref<1x1xf32, #tpu.memory_space<smem>>
    memref.store %155, %arg24[%c0_71, %c0_72] : memref<1x1xf32, #tpu.memory_space<smem>>
    return
  }
}

</mosaic_0001>

<bundles_post_ra>
// kernel: tpu_custom_call.1
= control target key start
LH: loop header
LB: loop body
LE: loop exit
PB: predicated region body
PF: predicated region fallthrough
CT: control target
= control target key end

     0   :  { %s4740_s0 = inlined_call_operand.hbm [shape: f32[128,128], index: 0, kind: input, shape index: {}]   ;;  %s4741_s1 = inlined_call_operand.hbm [shape: f32[128,128], index: 1, kind: input, shape index: {}]   ;;  %s4742_s2 = inlined_call_operand.hbm [shape: f32[128,128], index: 2, kind: input, shape index: {}]   ;;  %s4743_s3 = inlined_call_operand.vmem [shape: f32[1,128], index: 3, kind: input, shape index: {}]   ;;  %s4744_s4 = inlined_call_operand.vmem [shape: f32[1,128], index: 4, kind: input, shape index: {}]   ;;  %s4745_s5 = inlined_call_operand.vmem [shape: f32[1,128], index: 5, kind: input, shape index: {}]   ;;  %s4746_s6 = inlined_call_operand.hbm [shape: f32[128,128], index: 6, kind: input, shape index: {}]   ;;  %s4747_s7 = inlined_call_operand.hbm [shape: f32[128,128], index: 7, kind: input, shape index: {}]   ;;  %s4748_s8 = inlined_call_operand.hbm [shape: f32[128,128], index: 8, kind: input, shape index: {}]   ;;  %s4749_s9 = inlined_call_operand.vmem [shape: f32[1,128], index: 9, kind: input, shape index: {}]   ;;  %s4750_s10 = inlined_call_operand.vmem [shape: f32[1,128], index: 10, kind: input, shape index: {}]   ;;  %s4751_s11 = inlined_call_operand.vmem [shape: f32[1,128], index: 11, kind: input, shape index: {}]   ;;  %s4752_s12 = inlined_call_operand.hbm [shape: f32[128,128], index: 12, kind: input, shape index: {}]   ;;  %s4753_s13 = inlined_call_operand.hbm [shape: f32[128,128], index: 13, kind: input, shape index: {}]   ;;  %s4754_s14 = inlined_call_operand.hbm [shape: f32[128,128], index: 14, kind: input, shape index: {}]   ;;  %s4755_s15 = inlined_call_operand.vmem [shape: f32[1,128], index: 15, kind: input, shape index: {}]   ;;  %s4756_s16 = inlined_call_operand.vmem [shape: f32[1,128], index: 16, kind: input, shape index: {}]   ;;  %s4757_s17 = inlined_call_operand.vmem [shape: f32[1,128], index: 17, kind: input, shape index: {}]   ;;  %s4758_s18 = inlined_call_operand.hbm [shape: f32[128,128], index: 18, kind: output, shape index: {0}]   ;;  %s4759_s19 = inlined_call_operand.hbm [shape: f32[1,128], index: 19, kind: output, shape index: {1}]   ;;  %s4760_s20 = inlined_call_operand.hbm [shape: f32[128,128], index: 20, kind: output, shape index: {2}]   ;;  %s4761_s21 = inlined_call_operand.hbm [shape: f32[1,128], index: 21, kind: output, shape index: {3}]   ;;  %s4762_s22 = inlined_call_operand.hbm [shape: f32[128,128], index: 22, kind: output, shape index: {4}]   ;;  %s4763_s23 = inlined_call_operand.hbm [shape: f32[1,128], index: 23, kind: output, shape index: {5}]   ;;  %s4764_s24 = inlined_call_operand.hbm [shape: f32[1,1], index: 24, kind: output, shape index: {6}]  }
   0x1   :  { %4817 = sst [smem:[#allocation71_spill]] %s4740_s0 }
   0x2   :  { %4818 = sst [smem:[#allocation72_spill]] %s4741_s1 }
   0x3   :  { %4819 = sst [smem:[#allocation73_spill]] %s4742_s2 }
   0x4   :  { %4820 = sst [smem:[#allocation74_spill]] %s4743_s3 }
   0x5   :  { %4821 = sst [smem:[#allocation75_spill]] %s4744_s4 }
   0x6   :  { %4822 = sst [smem:[#allocation76_spill]] %s4745_s5 }
   0x7   :  { %4823 = sst [smem:[#allocation77_spill]] %s4746_s6 }
   0x8   :  { %4824 = sst [smem:[#allocation78_spill]] %s4747_s7 }
   0x9   :  { %4825 = sst [smem:[#allocation79_spill]] %s4748_s8 }
   0xa   :  { %4826 = sst [smem:[#allocation80_spill]] %s4762_s22 }
   0xb   :  { %4827 = sst [smem:[#allocation81_spill]] %s4763_s23 }
   0xc   :  { %4828 = sst [smem:[#allocation82_spill]] %s4764_s24 }
   0xd   :  { %30 = vsyncpa [#allocation3], 0 }
   0xe   :  { %31 = vsyncpa [#allocation7], 0 }
   0xf   :  { %32 = vsyncpa [#allocation10], 0 }
  0x10   :  { %33 = vsyncpa [#allocation13], 0 }
  0x11   :  { %34 = vsyncpa [#allocation16], 0 }
  0x12   :  { %35 = vsyncpa [#allocation4], 0 }
  0x13   :  { %36 = vsyncpa [#allocation20], 0 }
  0x14   :  { %37 = vsyncpa [#allocation23], 0 }
  0x15   :  { %38 = vsyncpa [#allocation26], 0 }
  0x16   :  { %39 = vsyncpa [#allocation5], 0  ;;  %s2534_s5 = smov [#allocation6]   ;;  %s2535_s27 = smov [#allocation9]  }
  0x17   :  { %s57_s26 = sshll.u32 %s2534_s5, 4  ;;  %s87_s28 = sshll.u32 %s2535_s27, 4  ;;  %s58_s26 = int_to_ptr.vmem [resolvable:$true] %s57_s26  ;;  %s2677_s28 = int_to_ptr.vmem [resolvable:$true] %s87_s28 }
  0x18   :  { %s4829_s29 = sld [smem:[#allocation72_spill]] }
  0x1e   :  { %s2174_s0 = scalar_lea.hbm %s4829_s29, 2048 }
  0x1f   :  { %p2175_p0 = scmp.ne.s32.totalorder %s4829_s29, %s2174_s0  ;;  %p2178_p1 = scmp.lt.u32.totalorder %s2174_s0, %s4829_s29 }
  0x21   :  { %p2180_p2 = pnand %p2178_p1, %p2175_p0 }
  0x23   :  { %2183 = shalt.err (!%p2180_p2)
}
  0x24   :  { %s2184_s8 = scalar_lea.vmem %s58_s26, 2048  ;;  %p2189_p4 = scmp.lt.s32.totalorder %s58_s26, %s58_s26 }
  0x25   :  { %p2185_p3 = scmp.ne.s32.totalorder %s58_s26, %s2184_s8  ;;  %p2190_p5 = scmp.lt.s32.totalorder %s2184_s8, %s2184_s8 }
  0x27   :  { %p2191_p6 = por %p2190_p5, %p2189_p4 }
  0x29   :  { %p2192_p7 = pnand %p2191_p6, %p2185_p3 }
  0x2b   :  { %2195 = shalt.err (!%p2192_p7)
}
  0x2c   :  { %s2536_s4 = smov 128   ;;  %s2537_s1 = smov 8  }
  0x2d   :  { %63 = dma.hbm_to_vmem [thread:$0]  %s4829_s29, 2048, %s58_s26, [#allocation7], %s2536_s4, %s2536_s4, %s2537_s1  }
  0x2e   :  { %s4830_s0 = sld [smem:[#allocation77_spill]] }
  0x34   :  { %s2196_s7 = scalar_lea.hbm %s4830_s0, 2048 }
  0x35   :  { %p2197_p8 = scmp.ne.s32.totalorder %s4830_s0, %s2196_s7  ;;  %p2200_p9 = scmp.lt.u32.totalorder %s2196_s7, %s4830_s0 }
  0x37   :  { %p2202_p10 = pnand %p2200_p9, %p2197_p8 }
  0x39   :  { %2205 = shalt.err (!%p2202_p10)
}
  0x3a   :  { %s2206_s24 = scalar_lea.vmem %s2677_s28, 2048  ;;  %p2211_p12 = scmp.lt.s32.totalorder %s2677_s28, %s2677_s28 }
  0x3b   :  { %p2207_p11 = scmp.ne.s32.totalorder %s2677_s28, %s2206_s24  ;;  %p2212_p13 = scmp.lt.s32.totalorder %s2206_s24, %s2206_s24 }
  0x3d   :  { %p2213_p0 = por %p2212_p13, %p2211_p12 }
  0x3f   :  { %p2214_p1 = pnand %p2213_p0, %p2207_p11 }
  0x41   :  { %2217 = shalt.err (!%p2214_p1)
}
  0x42   :  { %93 = dma.hbm_to_vmem [thread:$0]  %s4830_s0, 2048, %s2677_s28, [#allocation10], %s2536_s4, %s2536_s4, %s2537_s1  }
  0x43   :  { %s2538_s5 = smov [#allocation12]   ;;  %s2539_s6 = smov [#allocation15]  }
  0x44   :  { %s111_s27 = sshll.u32 %s2538_s5, 4  ;;  %s141_s2 = sshll.u32 %s2539_s6, 4  ;;  %s112_s27 = int_to_ptr.vmem [resolvable:$true] %s111_s27  ;;  %s2714_s2 = int_to_ptr.vmem [resolvable:$true] %s141_s2 }
  0x45   :  { %s4831_s30 = sld [smem:[#allocation79_spill]] }
  0x4b   :  { %s2218_s3 = scalar_lea.hbm %s4831_s30, 2048 }
  0x4c   :  { %p2219_p2 = scmp.ne.s32.totalorder %s4831_s30, %s2218_s3  ;;  %p2222_p3 = scmp.lt.u32.totalorder %s2218_s3, %s4831_s30 }
  0x4e   :  { %p2224_p4 = pnand %p2222_p3, %p2219_p2 }
  0x50   :  { %2227 = shalt.err (!%p2224_p4)
}
  0x51   :  { %s2228_s28 = scalar_lea.vmem %s112_s27, 2048  ;;  %p2233_p6 = scmp.lt.s32.totalorder %s112_s27, %s112_s27 }
  0x52   :  { %p2229_p5 = scmp.ne.s32.totalorder %s112_s27, %s2228_s28  ;;  %p2234_p7 = scmp.lt.s32.totalorder %s2228_s28, %s2228_s28 }
  0x54   :  { %p2235_p8 = por %p2234_p7, %p2233_p6 }
  0x56   :  { %p2236_p9 = pnand %p2235_p8, %p2229_p5 }
  0x58   :  { %2239 = shalt.err (!%p2236_p9)
}
  0x59   :  { %117 = dma.hbm_to_vmem [thread:$0]  %s4831_s30, 2048, %s112_s27, [#allocation13], %s2536_s4, %s2536_s4, %s2537_s1  }
  0x5a   :  { %s2240_s22 = scalar_lea.hbm %s4753_s13, 2048 }
  0x5b   :  { %p2241_p10 = scmp.ne.s32.totalorder %s4753_s13, %s2240_s22  ;;  %p2244_p11 = scmp.lt.u32.totalorder %s2240_s22, %s4753_s13 }
  0x5d   :  { %p2246_p12 = pnand %p2244_p11, %p2241_p10 }
  0x5f   :  { %2249 = shalt.err (!%p2246_p12)
}
  0x60   :  { %s2250_s3 = scalar_lea.vmem %s2714_s2, 2048  ;;  %p2255_p0 = scmp.lt.s32.totalorder %s2714_s2, %s2714_s2 }
  0x61   :  { %p2251_p13 = scmp.ne.s32.totalorder %s2714_s2, %s2250_s3  ;;  %p2256_p1 = scmp.lt.s32.totalorder %s2250_s3, %s2250_s3 }
  0x63   :  { %p2257_p2 = por %p2256_p1, %p2255_p0 }
  0x65   :  { %p2258_p3 = pnand %p2257_p2, %p2251_p13 }
  0x67   :  { %2261 = shalt.err (!%p2258_p3)
}
  0x68   :  { %147 = dma.hbm_to_vmem [thread:$0]  %s4753_s13, 2048, %s2714_s2, [#allocation16], %s2536_s4, %s2536_s4, %s2537_s1  }
  0x69   :  { %s2540_s25 = smov [#allocation2]   ;;  %s2541_s28 = smov [#allocation8]  }
  0x6a   :  { %s45_s8 = sshll.u32 %s2540_s25, 4  ;;  %s69_s0 = sshll.u32 %s2541_s28, 4  ;;  %s46_s8 = int_to_ptr.vmem [resolvable:$true] %s45_s8  ;;  %s2751_s0 = int_to_ptr.vmem [resolvable:$true] %s69_s0 }
  0x6b   :  { %s4832_s5 = sld [smem:[#allocation71_spill]] }
  0x71   :  { %s2262_s22 = scalar_lea.hbm %s4832_s5, 2048 }
  0x72   :  { %p2263_p4 = scmp.ne.s32.totalorder %s4832_s5, %s2262_s22  ;;  %p2266_p5 = scmp.lt.u32.totalorder %s2262_s22, %s4832_s5 }
  0x74   :  { %p2268_p6 = pnand %p2266_p5, %p2263_p4 }
  0x76   :  { %2271 = shalt.err (!%p2268_p6)
}
  0x77   :  { %s2272_s13 = scalar_lea.vmem %s46_s8, 2048  ;;  %p2277_p8 = scmp.lt.s32.totalorder %s46_s8, %s46_s8 }
  0x78   :  { %p2273_p7 = scmp.ne.s32.totalorder %s46_s8, %s2272_s13  ;;  %p2278_p9 = scmp.lt.s32.totalorder %s2272_s13, %s2272_s13 }
  0x7a   :  { %p2279_p10 = por %p2278_p9, %p2277_p8 }
  0x7c   :  { %p2280_p11 = pnand %p2279_p10, %p2273_p7 }
  0x7e   :  { %2283 = shalt.err (!%p2280_p11)
}
  0x7f   :  { %51 = dma.hbm_to_vmem [thread:$0]  %s4832_s5, 2048, %s46_s8, [#allocation3], %s2536_s4, %s2536_s4, %s2537_s1  }
  0x80   :  { %s4833_s25 = sld [smem:[#allocation73_spill]] }
  0x86   :  { %s2284_s28 = scalar_lea.hbm %s4833_s25, 2048 }
  0x87   :  { %p2285_p12 = scmp.ne.s32.totalorder %s4833_s25, %s2284_s28  ;;  %p2288_p13 = scmp.lt.u32.totalorder %s2284_s28, %s4833_s25 }
  0x89   :  { %p2290_p0 = pnand %p2288_p13, %p2285_p12 }
  0x8b   :  { %2293 = shalt.err (!%p2290_p0)
}
  0x8c   :  { %s2294_s6 = scalar_lea.vmem %s2751_s0, 2048  ;;  %p2299_p2 = scmp.lt.s32.totalorder %s2751_s0, %s2751_s0 }
  0x8d   :  { %p2295_p1 = scmp.ne.s32.totalorder %s2751_s0, %s2294_s6  ;;  %p2300_p3 = scmp.lt.s32.totalorder %s2294_s6, %s2294_s6 }
  0x8f   :  { %p2301_p4 = por %p2300_p3, %p2299_p2 }
  0x91   :  { %p2302_p5 = pnand %p2301_p4, %p2295_p1 }
  0x93   :  { %2305 = shalt.err (!%p2302_p5)
}
  0x94   :  { %75 = dma.hbm_to_vmem [thread:$0]  %s4833_s25, 2048, %s2751_s0, [#allocation7], %s2536_s4, %s2536_s4, %s2537_s1  }
  0x95   :  { %s2542_s7 = smov [#allocation11]   ;;  %s2543_s13 = smov [#allocation14]  }
  0x96   :  { %s99_s24 = sshll.u32 %s2542_s7, 4  ;;  %s129_s2 = sshll.u32 %s2543_s13, 4  ;;  %s100_s24 = int_to_ptr.vmem [resolvable:$true] %s99_s24  ;;  %s2788_s2 = int_to_ptr.vmem [resolvable:$true] %s129_s2 }
  0x97   :  { %s4834_s30 = sld [smem:[#allocation78_spill]] }
  0x9d   :  { %s2306_s28 = scalar_lea.hbm %s4834_s30, 2048 }
  0x9e   :  { %p2307_p6 = scmp.ne.s32.totalorder %s4834_s30, %s2306_s28  ;;  %p2310_p7 = scmp.lt.u32.totalorder %s2306_s28, %s4834_s30 }
  0xa0   :  { %p2312_p8 = pnand %p2310_p7, %p2307_p6 }
  0xa2   :  { %2315 = shalt.err (!%p2312_p8)
}
  0xa3   :  { %s2316_s0 = scalar_lea.vmem %s100_s24, 2048  ;;  %p2321_p10 = scmp.lt.s32.totalorder %s100_s24, %s100_s24 }
  0xa4   :  { %p2317_p9 = scmp.ne.s32.totalorder %s100_s24, %s2316_s0  ;;  %p2322_p11 = scmp.lt.s32.totalorder %s2316_s0, %s2316_s0 }
  0xa6   :  { %p2323_p12 = por %p2322_p11, %p2321_p10 }
  0xa8   :  { %p2324_p13 = pnand %p2323_p12, %p2317_p9 }
  0xaa   :  { %2327 = shalt.err (!%p2324_p13)
}
  0xab   :  { %105 = dma.hbm_to_vmem [thread:$0]  %s4834_s30, 2048, %s100_s24, [#allocation10], %s2536_s4, %s2536_s4, %s2537_s1  }
  0xac   :  { %s2328_s7 = scalar_lea.hbm %s4752_s12, 2048 }
  0xad   :  { %p2329_p0 = scmp.ne.s32.totalorder %s4752_s12, %s2328_s7  ;;  %p2332_p1 = scmp.lt.u32.totalorder %s2328_s7, %s4752_s12 }
  0xaf   :  { %p2334_p2 = pnand %p2332_p1, %p2329_p0 }
  0xb1   :  { %2337 = shalt.err (!%p2334_p2)
}
  0xb2   :  { %s2338_s26 = scalar_lea.vmem %s2788_s2, 2048  ;;  %p2343_p4 = scmp.lt.s32.totalorder %s2788_s2, %s2788_s2 }
  0xb3   :  { %p2339_p3 = scmp.ne.s32.totalorder %s2788_s2, %s2338_s26  ;;  %p2344_p5 = scmp.lt.s32.totalorder %s2338_s26, %s2338_s26 }
  0xb5   :  { %p2345_p6 = por %p2344_p5, %p2343_p4 }
  0xb7   :  { %p2346_p7 = pnand %p2345_p6, %p2339_p3 }
  0xb9   :  { %2349 = shalt.err (!%p2346_p7)
}
  0xba   :  { %135 = dma.hbm_to_vmem [thread:$0]  %s4752_s12, 2048, %s2788_s2, [#allocation13], %s2536_s4, %s2536_s4, %s2537_s1  }
  0xbb   :  { %s2544_s29 = smov [#allocation17]   ;;  %s2350_s25 = scalar_lea.hbm %s4754_s14, 2048 }
  0xbc   :  { %s153_s22 = sshll.u32 %s2544_s29, 4  ;;  %p2351_p8 = scmp.ne.s32.totalorder %s4754_s14, %s2350_s25  ;;  %s154_s22 = int_to_ptr.vmem [resolvable:$true] %s153_s22 }
  0xbd   :  { %p2354_p9 = scmp.lt.u32.totalorder %s2350_s25, %s4754_s14 }
  0xbf   :  { %p2356_p10 = pnand %p2354_p9, %p2351_p8 }
  0xc1   :  { %2359 = shalt.err (!%p2356_p10)
}
  0xc2   :  { %s2360_s13 = scalar_lea.vmem %s154_s22, 2048  ;;  %p2365_p12 = scmp.lt.s32.totalorder %s154_s22, %s154_s22 }
  0xc3   :  { %p2361_p11 = scmp.ne.s32.totalorder %s154_s22, %s2360_s13  ;;  %p2366_p13 = scmp.lt.s32.totalorder %s2360_s13, %s2360_s13 }
  0xc5   :  { %p2367_p0 = por %p2366_p13, %p2365_p12 }
  0xc7   :  { %p2368_p1 = pnand %p2367_p0, %p2361_p11 }
  0xc9   :  { %2371 = shalt.err (!%p2368_p1)
}
  0xca   :  { %159 = dma.hbm_to_vmem [thread:$0]  %s4754_s14, 2048, %s154_s22, [#allocation16], %s2536_s4, %s2536_s4, %s2537_s1  }
  0xcb   :  { %2514 = dma.done.wait [#allocation3], 2048  }
  0xcc   :  { %2515 = vsyncadd [#allocation3], 4294965248 }
  0xcd   :  { %2516 = dma.done.wait [#allocation7], 4096  }
  0xce   :  { %2517 = vsyncadd [#allocation7], 4294963200 }
  0xcf   :  { %2518 = dma.done.wait [#allocation10], 4096  }
  0xd0   :  { %2519 = vsyncadd [#allocation10], 4294963200 }
  0xd1   :  { %2520 = dma.done.wait [#allocation13], 4096  }
  0xd2   :  { %2521 = vsyncadd [#allocation13], 4294963200 }
  0xd3   :  { %2522 = dma.done.wait [#allocation16], 4096  }
  0xd4   :  { %2523 = vsyncadd [#allocation16], 4294963200  ;;  %v2840_v0 = vld [vmem:[#allocation11] sm:$0xff]  ;;  %v2842_v1 = vld [vmem:[#allocation11 + $0x8] sm:$0xff]  ;;  %s5019_s26 = sld [smem:[#allocation75_spill]]  ;;  %s5027_s22 = sld [smem:[#allocation76_spill]] }
  0xd5   :  { %v2844_v2 = vld [vmem:[#allocation11 + $0x10] sm:$0xff]  ;;  %v2846_v3 = vld [vmem:[#allocation11 + $0x18] sm:$0xff]  ;;  %v2848_v4 = vld [vmem:[#allocation11 + $0x20] sm:$0xff]  ;;  %v769_v29 = vand.u32 2147483647, %v2840_v0  ;;  %s5045_s5 = sld [smem:[#allocation74_spill]] }
  0xd6   :  { %v2850_v5 = vld [vmem:[#allocation11 + $0x28] sm:$0xff]  ;;  %v2852_v6 = vld [vmem:[#allocation11 + $0x30] sm:$0xff]  ;;  %v2856_v9 = vld [vmem:[#allocation11 + $0x38] sm:$0xff]  ;;  %v770_v30 = vand.u32 2147483647, %v2842_v1  ;;  %s2546_s12 = smov [#allocation22]  }
  0xd7   :  { %v2858_v10 = vld [vmem:[#allocation11 + $0x40] sm:$0xff]  ;;  %v2860_v11 = vld [vmem:[#allocation11 + $0x48] sm:$0xff]  ;;  %v2865_v15 = vld [vmem:[#allocation11 + $0x50] sm:$0xff]  ;;  %v771_v33 = vand.u32 2147483647, %v2844_v2  ;;  %v785_v47 = vsub.f32 0.0, %v769_v29 }
  0xd8   :  { %v2867_v16 = vld [vmem:[#allocation11 + $0x58] sm:$0xff]  ;;  %v2869_v17 = vld [vmem:[#allocation11 + $0x60] sm:$0xff]  ;;  %v2874_v21 = vld [vmem:[#allocation11 + $0x68] sm:$0xff]  ;;  %v772_v34 = vand.u32 2147483647, %v2846_v3  ;;  %v786_v48 = vsub.f32 0.0, %v770_v30 }
  0xd9   :  { %4835 = vst [vmem:[#allocation38_spill] sm:$0xff] %v2874_v21  ;;  %v2876_v22 = vld [vmem:[#allocation11 + $0x70] sm:$0xff]  ;;  %v2878_v23 = vld [vmem:[#allocation11 + $0x78] sm:$0xff]  ;;  %v2883_v27 = vld [vmem:[#allocation12] sm:$0xff]  ;;  %v773_v39 = vand.u32 2147483647, %v2848_v4 }
  0xda   :  { %4836 = vst [vmem:[#allocation39_spill] sm:$0xff] %v2876_v22  ;;  %4837 = vst [vmem:[#allocation40_spill] sm:$0xff] %v2878_v23  ;;  %v2892_v35 = vld [vmem:[#allocation12 + $0x8] sm:$0xff]  ;;  %v2894_v36 = vld [vmem:[#allocation12 + $0x10] sm:$0xff]  ;;  %v774_v41 = vand.u32 2147483647, %v2850_v5  ;;  %v2904_v42 = vmul.f32 %v2883_v27, %v2883_v27 }
  0xdb   :  { %v2899_v40 = vld [vmem:[#allocation12 + $0x18] sm:$0xff]  ;;  %v2908_v43 = vmul.f32 %v2892_v35, %v2892_v35  ;;  %v2912_v44 = vmul.f32 %v2894_v36, %v2894_v36  ;;  %v775_v45 = vand.u32 2147483647, %v2852_v6  ;;  %v776_v46 = vand.u32 2147483647, %v2856_v9  ;;  %v2918_v53 = vld [vmem:[#allocation12 + $0x20] sm:$0xff] }
  0xdc   :  { %4838 = vst [vmem:[#allocation41_spill] sm:$0xff] %v2904_v42  ;;  %v777_v49 = vand.u32 2147483647, %v2858_v10  ;;  %v778_v50 = vand.u32 2147483647, %v2860_v11  ;;  %v787_v51 = vsub.f32 0.0, %v771_v33  ;;  %v2924_v57 = vmul.f32 %v2899_v40, %v2899_v40 }
  0xdd   :  { %4839 = vst [vmem:[#allocation42_spill] sm:$0xff] %v2908_v43  ;;  %4840 = vst [vmem:[#allocation43_spill] sm:$0xff] %v2912_v44  ;;  %v788_v52 = vsub.f32 0.0, %v772_v34  ;;  %v779_v54 = vand.u32 2147483647, %v2865_v15  ;;  %v789_v56 = vsub.f32 0.0, %v773_v39  ;;  %v2932_v62 = vmul.f32 %v2918_v53, %v2918_v53 }
  0xde   :  { %v780_v55 = vand.u32 2147483647, %v2867_v16  ;;  %4841 = vst [vmem:[#allocation44_spill] sm:$0xff] %v2924_v57  ;;  %v2926_v58 = vld [vmem:[#allocation12 + $0x28] sm:$0xff]  ;;  %v781_v59 = vand.u32 2147483647, %v2869_v17 }
  0xdf   :  { %v782_v60 = vand.u32 2147483647, %v2874_v21  ;;  %v790_v61 = vsub.f32 0.0, %v774_v41  ;;  %4842 = vst [vmem:[#allocation45_spill] sm:$0xff] %v2932_v62  ;;  %v2934_v63 = vld [vmem:[#allocation12 + $0x30] sm:$0xff]  ;;  %v791_v29 = vsub.f32 0.0, %v775_v45  ;;  %v2938_v34 = vmul.f32 %v2926_v58, %v2926_v58 }
  0xe0   :  { %v801_v30 = vmul.f32 1.442695, %v785_v47  ;;  %v803_v33 = vmul.f32 1.442695, %v786_v48  ;;  %v792_v39 = vsub.f32 0.0, %v776_v46  ;;  %v2942_v32 = vmul.f32 %v2934_v63, %v2934_v63  ;;  %v2945_v26 = vld [vmem:[#allocation12 + $0x38] sm:$0xff] }
  0xe1   :  { %4843 = vst [vmem:[#allocation46_spill] sm:$0xff] %v2938_v34  ;;  %v805_v38 = vmul.f32 1.442695, %v787_v51  ;;  %v807_v37 = vmul.f32 1.442695, %v788_v52  ;;  %v793_v31 = vsub.f32 0.0, %v777_v49  ;;  %v2952_v52 = vmul.f32 %v2945_v26, %v2945_v26 }
  0xe2   :  { %4844 = vst [vmem:[#allocation47_spill] sm:$0xff] %v2942_v32  ;;  %v783_v41 = vand.u32 2147483647, %v2876_v22  ;;  %1868 = vpow2.f32 %v801_v30  ;;  %v809_v28 = vmul.f32 1.442695, %v789_v56  ;;  %v794_v47 = vsub.f32 0.0, %v778_v50 }
  0xe3   :  { %v784_v45 = vand.u32 2147483647, %v2878_v23  ;;  %1870 = vpow2.f32 %v803_v33  ;;  %v811_v48 = vmul.f32 1.442695, %v790_v61  ;;  %v2948_v25 = vld [vmem:[#allocation12 + $0x40] sm:$0xff]  ;;  %v795_v46 = vsub.f32 0.0, %v779_v54 }
  0xe4   :  { %4845 = vst [vmem:[#allocation48_spill] sm:$0xff] %v2948_v25  ;;  %1872 = vpow2.f32 %v805_v38  ;;  %v813_v51 = vmul.f32 1.442695, %v791_v29  ;;  %4846 = vst [vmem:[#allocation49_spill] sm:$0xff] %v2952_v52  ;;  %v796_v24 = vsub.f32 0.0, %v780_v55  ;;  %v2956_v56 = vmul.f32 %v2948_v25, %v2948_v25  ;;  %v2958_v33 = vld [vmem:[#allocation12 + $0x48] sm:$0xff] }
  0xe5   :  { %1874 = vpow2.f32 %v807_v37  ;;  %v815_v49 = vmul.f32 1.442695, %v792_v39  ;;  %v797_v30 = vsub.f32 0.0, %v781_v59  ;;  %v798_v50 = vsub.f32 0.0, %v782_v60  ;;  %4848 = vst [vmem:[#allocation51_spill] sm:$0xff] %v2958_v33  ;;  %v2960_v54 = vld [vmem:[#allocation12 + $0x50] sm:$0xff] }
  0xe6   :  { %4847 = vst [vmem:[#allocation50_spill] sm:$0xff] %v2956_v56  ;;  %1876 = vpow2.f32 %v809_v28  ;;  %v817_v61 = vmul.f32 1.442695, %v793_v31  ;;  %4849 = vst [vmem:[#allocation52_spill] sm:$0xff] %v2960_v54  ;;  %v799_v38 = vsub.f32 0.0, %v783_v41  ;;  %v800_v29 = vsub.f32 0.0, %v784_v45 }
  0xe7   :  { %1878 = vpow2.f32 %v811_v48  ;;  %v819_v20 = vmul.f32 1.442695, %v794_v47  ;;  %v2962_v19 = vld [vmem:[#allocation12 + $0x58] sm:$0xff]  ;;  %v2964_v37 = vld [vmem:[#allocation12 + $0x60] sm:$0xff]  ;;  %v821_v55 = vmul.f32 1.442695, %v795_v46  ;;  %v2968_v59 = vmul.f32 %v2958_v33, %v2958_v33 }
  0xe8   :  { %4850 = vst [vmem:[#allocation53_spill] sm:$0xff] %v2962_v19  ;;  %4851 = vst [vmem:[#allocation54_spill] sm:$0xff] %v2964_v37  ;;  %1880 = vpow2.f32 %v813_v51  ;;  %v2972_v28 = vmul.f32 %v2960_v54, %v2960_v54  ;;  %v2974_v31 = vld [vmem:[#allocation12 + $0x68] sm:$0xff]  ;;  %v2976_v60 = vld [vmem:[#allocation12 + $0x70] sm:$0xff]  ;;  %v823_v39 = vmul.f32 1.442695, %v796_v24  ;;  %v2980_v41 = vmul.f32 %v2962_v19, %v2962_v19 }
  0xe9   :  { %4852 = vst [vmem:[#allocation55_spill] sm:$0xff] %v2968_v59  ;;  %4854 = vst [vmem:[#allocation57_spill] sm:$0xff] %v2974_v31  ;;  %1882 = vpow2.f32 %v815_v49  ;;  %v2984_v45 = vmul.f32 %v2964_v37, %v2964_v37  ;;  %v2986_v47 = vld [vmem:[#allocation6] sm:$0xff]  ;;  %v2988_v48 = vld [vmem:[#allocation12 + $0x78] sm:$0xff]  ;;  %v825_v46 = vmul.f32 1.442695, %v797_v30  ;;  %v2992_v51 = vmul.f32 %v2974_v31, %v2974_v31 }
  0xea   :  { %4853 = vst [vmem:[#allocation56_spill] sm:$0xff] %v2972_v28  ;;  %4855 = vst [vmem:[#allocation58_spill] sm:$0xff] %v2976_v60  ;;  %1884 = vpow2.f32 %v817_v61  ;;  %v2996_v24 = vmul.f32 %v2976_v60, %v2976_v60  ;;  %v827_v49 = vmul.f32 1.442695, %v798_v50  ;;  %v829_v18 = vmul.f32 1.442695, %v799_v38 }
  0xeb   :  { %4856 = vst [vmem:[#allocation59_spill] sm:$0xff] %v2980_v41  ;;  %4857 = vst [vmem:[#allocation60_spill] sm:$0xff] %v2984_v45  ;;  %1886 = vpow2.f32 %v819_v20  ;;  %v831_v14 = vmul.f32 1.442695, %v800_v29  ;;  %v3000_v12 = vmul.f32 %v2988_v48, %v2988_v48  ;;  %v3002_v61 = vld [vmem:[#allocation6 + $0x8] sm:$0xff]  ;;  %v3004_v30 = vld [vmem:[#allocation6 + $0x10] sm:$0xff] }
  0xec   :  { %4858 = vst [vmem:[#allocation61_spill] sm:$0xff] %v2986_v47  ;;  %4859 = vst [vmem:[#allocation62_spill] sm:$0xff] %v2988_v48  ;;  %v1869_v13 = vpop.eup %1868  ;;  %1888 = vpow2.f32 %v821_v55  ;;  %v3008_v50 = vld [vmem:[#allocation6 + $0x18] sm:$0xff]  ;;  %v3012_v45 = vld [vmem:[#allocation6 + $0x20] sm:$0xff]  ;;  %s1772_s2 = sshll.u32 %s2546_s12, 4  ;;  %s1773_s2 = int_to_ptr.vmem [resolvable:$true] %s1772_s2 }
  0xed   :  { %4860 = vst [vmem:[#allocation63_spill] sm:$0xff] %v2992_v51  ;;  %4861 = vst [vmem:[#allocation64_spill] sm:$0xff] %v2996_v24  ;;  %v1871_v51 = vpop.eup %1870  ;;  %1890 = vpow2.f32 %v823_v39  ;;  %v836_v20 = vmul.f32 -0.5, %v1869_v13  ;;  %v839_v7 = vand.u32 2147483647, %v1869_v13 }
  0xee   :  { %4862 = vst [vmem:[#allocation65_spill] sm:$0xff] %v3000_v12  ;;  %4863 = vst [vmem:[#allocation66_spill] sm:$0xff] %v3002_v61  ;;  %v1873_v55 = vpop.eup %1872  ;;  %1892 = vpow2.f32 %v825_v46  ;;  %v833_v12 = vadd.f32 1.0, %v1869_v13  ;;  %v845_v24 = vmul.f32 -0.5, %v1871_v51  ;;  %v842_v47 = vadd.f32 1.0, %v1871_v51 }
  0xef   :  { %4864 = vst [vmem:[#allocation67_spill] sm:$0xff] %v3004_v30  ;;  %4865 = vst [vmem:[#allocation68_spill] sm:$0xff] %v3008_v50  ;;  %v1875_v8 = vpop.eup %1874  ;;  %1894 = vpow2.f32 %v827_v49  ;;  %v837_v59 = vadd.f32 1.0, %v836_v20  ;;  %v851_v38 = vadd.f32 1.0, %v1873_v55  ;;  %v854_v61 = vmul.f32 -0.5, %v1873_v55  ;;  %v3016_v49 = vld [vmem:[#allocation6 + $0x28] sm:$0xff] }
  0xf0   :  { %4866 = vst [vmem:[#allocation69_spill] sm:$0xff] %v3012_v45  ;;  %v1877_v28 = vpop.eup %1876  ;;  %1896 = vpow2.f32 %v829_v18  ;;  %v846_v46 = vadd.f32 1.0, %v845_v24  ;;  %v848_v30 = vand.u32 2147483647, %v1871_v51  ;;  %v860_v56 = vadd.f32 1.0, %v1875_v8  ;;  %4867 = vst [vmem:[#allocation70_spill] sm:$0xff] %v3016_v49 }
  0xf1   :  { %v1879_v29 = vpop.eup %1878  ;;  %1898 = vpow2.f32 %v831_v14  ;;  %v855_v32 = vadd.f32 1.0, %v854_v61  ;;  %v857_v41 = vand.u32 2147483647, %v1873_v55  ;;  %v863_v50 = vmul.f32 -0.5, %v1875_v8  ;;  %v3334_v24 = vld [vmem:[#allocation6 + $0x38] sm:$0xff] }
  0xf2   :  { %v1881_v52 = vpop.eup %1880  ;;  %1900 = vlog2.f32 %v833_v12  ;;  %v866_v39 = vand.u32 2147483647, %v1875_v8  ;;  %v869_v18 = vadd.f32 1.0, %v1877_v28  ;;  %v3023_v14 = vmul.f32 %v1869_v13, %v837_v59 }
  0xf3   :  { %v3018_v34 = vpop.eup %1882  ;;  %1902 = vlog2.f32 %v842_v47  ;;  %vm3025_vm0 = vcmp.lt.f32.partialorder %v839_v7, 0.0004427343  ;;  %v864_v12 = vadd.f32 1.0, %v863_v50  ;;  %v872_v61 = vmul.f32 -0.5, %v1877_v28 }
  0xf4   :  { %v3021_v45 = vpop.eup %1884  ;;  %1904 = vlog2.f32 %v851_v38  ;;  %v3031_v57 = vmul.f32 %v1871_v51, %v846_v46  ;;  %v875_v47 = vand.u32 2147483647, %v1877_v28  ;;  %v878_v44 = vadd.f32 1.0, %v1879_v29 }
  0xf5   :  { %v3029_v62 = vpop.eup %1886  ;;  %1906 = vlog2.f32 %v860_v56  ;;  %vm3035_vm1 = vcmp.lt.f32.partialorder %v848_v30, 0.0004427343  ;;  %v3039_v7 = vmul.f32 %v1873_v55, %v855_v32  ;;  %vm3041_vm2 = vcmp.lt.f32.partialorder %v857_v41, 0.0004427343 }
  0xf6   :  { %v3033_v43 = vpop.eup %1888  ;;  %1908 = vlog2.f32 %v869_v18  ;;  %v873_v59 = vadd.f32 1.0, %v872_v61  ;;  %v881_v50 = vmul.f32 -0.5, %v1879_v29  ;;  %vm3047_vm3 = vcmp.lt.f32.partialorder %v866_v39, 0.0004427343 }
  0xf7   :  { %v3045_v51 = vpop.eup %1890  ;;  %1910 = vlog2.f32 %v878_v44  ;;  %v884_v30 = vand.u32 2147483647, %v1879_v29  ;;  %v887_v38 = vadd.f32 1.0, %v1881_v52  ;;  %v3053_v32 = vmul.f32 %v1875_v8, %v864_v12 }
  0xf8   :  { %v3051_v46 = vpop.eup %1892  ;;  %v882_v41 = vadd.f32 1.0, %v881_v50  ;;  %v890_v55 = vmul.f32 -0.5, %v1881_v52  ;;  %v893_v49 = vand.u32 2147483647, %v1881_v52  ;;  %vm3057_vm4 = vcmp.lt.f32.partialorder %v875_v47, 0.0004427343 }
  0xf9   :  { %v3055_v42 = vpop.eup %1894  ;;  %1912 = vlog2.f32 %v887_v38  ;;  %v896_v39 = vadd.f32 1.0, %v3018_v34  ;;  %v899_v44 = vmul.f32 -0.5, %v3018_v34  ;;  %v3065_v48 = vmul.f32 %v1877_v28, %v873_v59 }
  0xfa   :  { %v3063_v61 = vpop.eup %1896  ;;  %vm3067_vm5 = vcmp.lt.f32.partialorder %v884_v30, 0.0004427343  ;;  %v891_v12 = vadd.f32 1.0, %v890_v55  ;;  %v902_v50 = vand.u32 2147483647, %v3018_v34  ;;  %v905_v38 = vadd.f32 1.0, %v3021_v45 }
  0xfb   :  { %v3072_v47 = vpop.eup %1898  ;;  %1914 = vlog2.f32 %v896_v39  ;;  %v900_v60 = vadd.f32 1.0, %v899_v44  ;;  %v908_v23 = vmul.f32 -0.5, %v3021_v45  ;;  %v3076_v31 = vmul.f32 %v1879_v29, %v882_v41 }
  0xfc   :  { %v1901_v22 = vpop.eup %1900  ;;  %vm3078_vm6 = vcmp.lt.f32.partialorder %v893_v49, 0.0004427343  ;;  %v911_v59 = vand.u32 2147483647, %v3021_v45  ;;  %v914_v30 = vadd.f32 1.0, %v3029_v62  ;;  %v3086_v39 = vmul.f32 %v1881_v52, %v891_v12 }
  0xfd   :  { %v1903_v55 = vpop.eup %1902  ;;  %v3084_v37 = vmul.f32 0.6931472, %v1901_v22  ;;  %1916 = vlog2.f32 %v905_v38  ;;  %v909_v44 = vadd.f32 1.0, %v908_v23  ;;  %vm3090_vm7 = vcmp.lt.f32.partialorder %v902_v50, 0.0004427343 }
  0xfe   :  { %v1905_v19 = vpop.eup %1904  ;;  %v3088_v54 = vmul.f32 0.6931472, %v1903_v55  ;;  %1918 = vlog2.f32 %v914_v30  ;;  %v917_v49 = vmul.f32 -0.5, %v3029_v62  ;;  %v3102_v23 = vmul.f32 %v3018_v34, %v900_v60  ;;  %v4921_v55 = vld [vmem:[#allocation53_spill] sm:$0xff] }
  0xff   :  { %v1907_v41 = vpop.eup %1906  ;;  %v3099_v52 = vmul.f32 0.6931472, %v1905_v19  ;;  %v920_v12 = vand.u32 2147483647, %v3029_v62  ;;  %v3108_v30 = vmul.f32 %v3021_v45, %v909_v44  ;;  %vm3110_vm8 = vcmp.lt.f32.partialorder %v911_v59, 0.0004427343 }
 0x100   :  { %v1909_v50 = vpop.eup %1908  ;;  %v3105_v38 = vmul.f32 0.6931472, %v1907_v41  ;;  %v918_v21 = vadd.f32 1.0, %v917_v49  ;;  %v923_v22 = vadd.f32 1.0, %v3033_v43  ;;  %v850_v34 = vsel %vm3035_vm1, %v3031_v57, %v3088_v54 }
 0x101   :  { %v1911_v19 = vpop.eup %1910  ;;  %v3123_v45 = vmul.f32 0.6931472, %v1909_v50  ;;  %v926_v59 = vmul.f32 -0.5, %v3033_v43  ;;  %vm3132_vm9 = vcmp.lt.f32.partialorder %v920_v12, 0.0004427343  ;;  %v932_v60 = vadd.f32 1.0, %v3045_v51 }
 0x102   :  { %v3130_v49 = vmul.f32 0.6931472, %v1911_v19  ;;  %1920 = vlog2.f32 %v923_v22  ;;  %v3137_v54 = vmul.f32 %v3029_v62, %v918_v21  ;;  %v929_v50 = vand.u32 2147483647, %v3033_v43 }
 0x103   :  { %v1913_v57 = vpop.eup %1912  ;;  %v927_v20 = vadd.f32 1.0, %v926_v59  ;;  %v877_v19 = vsel %vm3057_vm4, %v3065_v48, %v3123_v45  ;;  %v935_v12 = vmul.f32 -0.5, %v3045_v51  ;;  %v938_v33 = vand.u32 2147483647, %v3045_v51 }
 0x104   :  { %v889_v44 = vmul.f32 0.6931472, %v1913_v57  ;;  %v886_v21 = vsel %vm3067_vm5, %v3076_v31, %v3130_v49  ;;  %1922 = vlog2.f32 %v932_v60  ;;  %v941_v59 = vadd.f32 1.0, %v3051_v46 }
 0x105   :  { %v1915_v22 = vpop.eup %1914  ;;  %v3152_v62 = vmul.f32 %v3033_v43, %v927_v20  ;;  %vm3158_vm10 = vcmp.lt.f32.partialorder %v929_v50, 0.0004427343  ;;  %v936_v57 = vadd.f32 1.0, %v935_v12  ;;  %v944_v31 = vmul.f32 -0.5, %v3051_v46 }
 0x106   :  { %v895_v48 = vsel %vm3078_vm6, %v3086_v39, %v889_v44  ;;  %v898_v18 = vmul.f32 0.6931472, %v1915_v22  ;;  %1924 = vlog2.f32 %v941_v59  ;;  %v947_v43 = vand.u32 2147483647, %v3051_v46 }
 0x107   :  { %v1917_v25 = vpop.eup %1916  ;;  %v950_v8 = vadd.f32 1.0, %v3055_v42  ;;  %vm3168_vm11 = vcmp.lt.f32.partialorder %v938_v33, 0.0004427343  ;;  %v953_v49 = vmul.f32 -0.5, %v3055_v42  ;;  %v937_v50 = vmul.f32 %v3045_v51, %v936_v57 }
 0x108   :  { %v1919_v60 = vpop.eup %1918  ;;  %v904_v28 = vsel %vm3090_vm7, %v3102_v23, %v898_v18  ;;  %v907_v39 = vmul.f32 0.6931472, %v1917_v25  ;;  %v945_v12 = vadd.f32 1.0, %v944_v31  ;;  %vm3174_vm12 = vcmp.lt.f32.partialorder %v947_v43, 0.0004427343 }
 0x109   :  { %v916_v20 = vmul.f32 0.6931472, %v1919_v60  ;;  %1926 = vlog2.f32 %v950_v8  ;;  %v954_v59 = vadd.f32 1.0, %v953_v49  ;;  %v956_v29 = vand.u32 2147483647, %v3055_v42 }
 0x10a   :  { %v959_v25 = vadd.f32 1.0, %v3063_v61  ;;  %v913_v33 = vsel %vm3110_vm8, %v3108_v30, %v907_v39  ;;  %v962_v51 = vmul.f32 -0.5, %v3063_v61  ;;  %v965_v18 = vand.u32 2147483647, %v3063_v61 }
 0x10b   :  { %v922_v23 = vsel %vm3132_vm9, %v3137_v54, %v916_v20  ;;  %v946_v31 = vmul.f32 %v3051_v46, %v945_v12  ;;  %v955_v43 = vmul.f32 %v3055_v42, %v954_v59  ;;  %v968_v8 = vadd.f32 1.0, %v3072_v47 }
 0x10c   :  { %v1921_v57 = vpop.eup %1920  ;;  %1928 = vlog2.f32 %v959_v25  ;;  %vm3191_vm13 = vcmp.lt.f32.partialorder %v956_v29, 0.0004427343  ;;  %v963_v30 = vadd.f32 1.0, %v962_v51  ;;  %v971_v41 = vmul.f32 -0.5, %v3072_v47 }
 0x10d   :  { %v925_v60 = vmul.f32 0.6931472, %v1921_v57  ;;  %vm3196_vm14 = vcmp.lt.f32.partialorder %v965_v18, 0.0004427343  ;;  %1930 = vlog2.f32 %v968_v8  ;;  %v974_v46 = vand.u32 2147483647, %v3072_v47 }
 0x10e   :  { %v4898_v42 = vmax.f32 %v2840_v0, 0.0  ;;  %v4899_v39 = vsel %vm3025_vm0, %v3023_v14, %v3084_v37  ;;  %v4900_v20 = vmax.f32 %v2842_v1, 0.0  ;;  %v1923_v59 = vpop.eup %1922  ;;  %v964_v25 = vmul.f32 %v3063_v61, %v963_v30 }
 0x10f   :  { %v931_v29 = vsel %vm3158_vm10, %v3152_v62, %v925_v60  ;;  %v972_v51 = vadd.f32 1.0, %v971_v41  ;;  %v4901_v0 = vmax.f32 %v2844_v2, 0.0  ;;  %v4902_v37 = vsel %vm3041_vm2, %v3039_v7, %v3099_v52  ;;  %v707_v60 = vld [vmem:[#allocation9 + $0x10] sm:$0xff] }
 0x110   :  { %v3208_v49 = vadd.f32 %v4899_v39, %v4898_v42  ;;  %v3212_v12 = vadd.f32 %v850_v34, %v4900_v20  ;;  %v934_v1 = vmul.f32 0.6931472, %v1923_v59  ;;  %vm3227_vm15 = vcmp.lt.f32.partialorder %v974_v46, 0.0004427343  ;;  %v1925_v7 = vpop.eup %1924  ;;  %v4917_v39 = vld [vmem:[#allocation51_spill] sm:$0xff]  ;;  %v709_v20 = vld [vmem:[#allocation9 + $0x20] sm:$0xff] }
 0x111   :  { %v3225_v14 = vadd.f32 %v4902_v37, %v4901_v0  ;;  %v4905_v34 = vmax.f32 %v2846_v3, 0.0  ;;  %v4906_v61 = vsel %vm3047_vm3, %v3053_v32, %v3105_v38  ;;  %v4907_v13 = vmax.f32 %v2848_v4, 0.0  ;;  %v710_v59 = vld [vmem:[#allocation9 + $0x28] sm:$0xff]  ;;  %v4920_v37 = vld [vmem:[#allocation52_spill] sm:$0xff] }
 0x112   :  { %v3245_v52 = vmul.f32 %v3072_v47, %v972_v51  ;;  %v4908_v45 = vmax.f32 %v2850_v5, 0.0  ;;  %v4909_v3 = vmax.f32 %v2852_v6, 0.0  ;;  %v4910_v32 = vmax.f32 %v2856_v9, 0.0  ;;  %v4918_v51 = vld [vmem:[#allocation38_spill] sm:$0xff] }
 0x113   :  { %v3238_v2 = vadd.f32 %v4906_v61, %v4905_v34  ;;  %v3242_v62 = vadd.f32 %v877_v19, %v4907_v13  ;;  %v940_v4 = vsel %vm3168_vm11, %v937_v50, %v934_v1  ;;  %v943_v19 = vmul.f32 0.6931472, %v1925_v7  ;;  %v1927_v8 = vpop.eup %1926  ;;  %v712_v34 = vld [vmem:[#allocation9 + $0x38] sm:$0xff]  ;;  %v713_v61 = vld [vmem:[#allocation9 + $0x40] sm:$0xff]  ;;  %v714_v13 = vld [vmem:[#allocation9 + $0x48] sm:$0xff] }
 0x114   :  { %v3249_v18 = vadd.f32 %v886_v21, %v4908_v45  ;;  %v3253_v56 = vadd.f32 %v895_v48, %v4909_v3  ;;  %v3257_v38 = vadd.f32 %v904_v28, %v4910_v32  ;;  %v4911_v57 = vmax.f32 %v2858_v10, 0.0  ;;  %v4922_v7 = vld [vmem:[#allocation54_spill] sm:$0xff] }
 0x115   :  { %v4912_v5 = vmax.f32 %v2860_v11, 0.0  ;;  %v4913_v6 = vmax.f32 %v2865_v15, 0.0  ;;  %v4914_v9 = vmax.f32 %v2867_v16, 0.0  ;;  %v993_v44 = vmul.f32 %v3208_v49, %v2883_v27  ;;  %v706_v16 = vld [vmem:[#allocation9 + $0x8] sm:$0xff] }
 0x116   :  { %v3263_v47 = vadd.f32 %v913_v33, %v4911_v57  ;;  %v994_v10 = vmul.f32 %v3212_v12, %v2892_v35  ;;  %v949_v11 = vsel %vm3174_vm12, %v946_v31, %v943_v19  ;;  %v952_v50 = vmul.f32 0.6931472, %v1927_v8  ;;  %v708_v31 = vld [vmem:[#allocation9 + $0x18] sm:$0xff]  ;;  %v715_v19 = vld [vmem:[#allocation9 + $0x50] sm:$0xff] }
 0x117   :  { %v3267_v21 = vadd.f32 %v922_v23, %v4912_v5  ;;  %v3271_v48 = vadd.f32 %v931_v29, %v4913_v6  ;;  %v3275_v28 = vadd.f32 %v940_v4, %v4914_v9  ;;  %v995_v33 = vmul.f32 %v3225_v14, %v2894_v36  ;;  %v705_v23 = vld [vmem:[#allocation9] sm:$0xff]  ;;  %v1929_v36 = vpop.eup %1928  ;;  %v716_v57 = vld [vmem:[#allocation9 + $0x58] sm:$0xff] }
 0x118   :  { %v996_v15 = vmul.f32 %v3238_v2, %v2899_v40  ;;  %v4915_v30 = vmax.f32 %v2869_v17, 0.0  ;;  %v997_v27 = vmul.f32 %v3242_v62, %v2918_v53  ;;  %v998_v35 = vmul.f32 %v3249_v18, %v2926_v58  ;;  %v4916_v17 = vld [vmem:[#allocation48_spill] sm:$0xff]  ;;  %v1931_v1 = vpop.eup %1930  ;;  %v4923_v6 = vld [vmem:[#allocation57_spill] sm:$0xff] }
 0x119   :  { %v999_v22 = vmul.f32 %v3253_v56, %v2934_v63  ;;  %v958_v40 = vsel %vm3191_vm13, %v955_v43, %v952_v50  ;;  %v1000_v46 = vmul.f32 %v3257_v38, %v2945_v26  ;;  %v1001_v42 = vmul.f32 %v3263_v47, %v4916_v17  ;;  %v711_v58 = vld [vmem:[#allocation9 + $0x30] sm:$0xff]  ;;  %v717_v50 = vld [vmem:[#allocation9 + $0x60] sm:$0xff] }
 0x11a   :  { %v3289_v41 = vadd.f32 %v949_v11, %v4915_v30  ;;  %v1002_v53 = vmul.f32 %v3267_v21, %v4917_v39  ;;  %v961_v29 = vmul.f32 0.6931472, %v1929_v36  ;;  %v4919_v63 = vmax.f32 %v4918_v51, 0.0  ;;  %v718_v30 = vld [vmem:[#allocation9 + $0x68] sm:$0xff] }
 0x11b   :  { %v1003_v43 = vmul.f32 %v3271_v48, %v4920_v37  ;;  %v1004_v26 = vmul.f32 %v3275_v28, %v4921_v55  ;;  %v1009_v3 = vadd.f32 %v993_v44, %v705_v23  ;;  %v1010_v32 = vadd.f32 %v994_v10, %v706_v16  ;;  %v4924_v36 = vld [vmem:[#allocation39_spill] sm:$0xff]  ;;  %v4926_v16 = vld [vmem:[#allocation40_spill] sm:$0xff] }
 0x11c   :  { %v3307_v0 = vadd.f32 %v958_v40, %v4919_v63  ;;  %v1005_v45 = vmul.f32 %v3289_v41, %v4922_v7  ;;  %v1011_v4 = vadd.f32 %v995_v33, %v707_v60  ;;  %v967_v5 = vsel %vm3196_vm14, %v964_v25, %v961_v29  ;;  %v719_v33 = vld [vmem:[#allocation9 + $0x70] sm:$0xff]  ;;  %v4928_v29 = vld [vmem:[#allocation58_spill] sm:$0xff] }
 0x11d   :  { %v970_v8 = vmul.f32 0.6931472, %v1931_v1  ;;  %v1012_v11 = vadd.f32 %v996_v15, %v708_v31  ;;  %v4925_v40 = vmax.f32 %v4924_v36, 0.0  ;;  %v1013_v39 = vadd.f32 %v997_v27, %v709_v20  ;;  %1026 = vst [vmem:[#allocation21 + $0x8] sm:$0xff] %v1010_v32  ;;  %1025 = vst [vmem:[#allocation21] sm:$0xff] %v1009_v3  ;;  %v3332_v20 = vld [vmem:[#allocation6 + $0x30] sm:$0xff] }
 0x11e   :  { %v1006_v9 = vmul.f32 %v3307_v0, %v4923_v6  ;;  %v1014_v44 = vadd.f32 %v998_v35, %v710_v59  ;;  %v1015_v10 = vadd.f32 %v999_v22, %v711_v58  ;;  %1027 = vst [vmem:[#allocation21 + $0x10] sm:$0xff] %v1011_v4  ;;  %v1016_v25 = vadd.f32 %v1000_v46, %v712_v34  ;;  %v3338_v59 = vld [vmem:[#allocation6 + $0x48] sm:$0xff] }
 0x11f   :  { %v3321_v17 = vadd.f32 %v967_v5, %v4925_v40  ;;  %v976_v54 = vsel %vm3227_vm15, %v3245_v52, %v970_v8  ;;  %v1017_v23 = vadd.f32 %v1001_v42, %v713_v61  ;;  %v1018_v15 = vadd.f32 %v1002_v53, %v714_v13  ;;  %1028 = vst [vmem:[#allocation21 + $0x18] sm:$0xff] %v1012_v11  ;;  %v720_v52 = vld [vmem:[#allocation9 + $0x78] sm:$0xff]  ;;  %v3336_v53 = vld [vmem:[#allocation6 + $0x40] sm:$0xff] }
 0x120   :  { %v4927_v60 = vmax.f32 %v4926_v16, 0.0  ;;  %v1019_v35 = vadd.f32 %v1003_v43, %v715_v19  ;;  %v1020_v22 = vadd.f32 %v1004_v26, %v716_v57  ;;  %1029 = vst [vmem:[#allocation21 + $0x20] sm:$0xff] %v1013_v39  ;;  %1030 = vst [vmem:[#allocation21 + $0x28] sm:$0xff] %v1014_v44  ;;  %v1021_v46 = vadd.f32 %v1005_v45, %v717_v50  ;;  %v4929_v63 = vld [vmem:[#allocation62_spill] sm:$0xff] }
 0x121   :  { %v1007_v27 = vmul.f32 %v3321_v17, %v4928_v29  ;;  %1031 = vst [vmem:[#allocation21 + $0x30] sm:$0xff] %v1015_v10  ;;  %v1022_v42 = vadd.f32 %v1006_v9, %v718_v30  ;;  %1032 = vst [vmem:[#allocation21 + $0x38] sm:$0xff] %v1016_v25  ;;  %v1041_v1 = vmul.f32 %v1009_v3, %v1009_v3  ;;  %1932 = vlog2.f32 %v3208_v49  ;;  %v3408_v49 = vld [vmem:[#allocation6 + $0x78] sm:$0xff] }
 0x122   :  { %v3328_v31 = vadd.f32 %v976_v54, %v4927_v60  ;;  %1033 = vst [vmem:[#allocation21 + $0x40] sm:$0xff] %v1017_v23  ;;  %1034 = vst [vmem:[#allocation21 + $0x48] sm:$0xff] %v1018_v15  ;;  %v1042_v34 = vmul.f32 %v1010_v32, %v1010_v32  ;;  %v1043_v61 = vmul.f32 %v1011_v4, %v1011_v4  ;;  %v4930_v54 = vld [vmem:[#allocation41_spill] sm:$0xff]  ;;  %v4931_v32 = vld [vmem:[#allocation42_spill] sm:$0xff]  ;;  %1934 = vlog2.f32 %v3212_v12 }
 0x123   :  { %v1023_v43 = vadd.f32 %v1007_v27, %v719_v33  ;;  %1035 = vst [vmem:[#allocation21 + $0x50] sm:$0xff] %v1019_v35  ;;  %1036 = vst [vmem:[#allocation21 + $0x58] sm:$0xff] %v1020_v22  ;;  %v1044_v13 = vmul.f32 %v1012_v11, %v1012_v11  ;;  %v1045_v45 = vmul.f32 %v1013_v39, %v1013_v39  ;;  %v4932_v11 = vld [vmem:[#allocation43_spill] sm:$0xff]  ;;  %v4933_v60 = vld [vmem:[#allocation44_spill] sm:$0xff]  ;;  %1936 = vlog2.f32 %v3225_v14 }
 0x124   :  { %v1008_v37 = vmul.f32 %v3328_v31, %v4929_v63  ;;  %1037 = vst [vmem:[#allocation21 + $0x60] sm:$0xff] %v1021_v46  ;;  %1038 = vst [vmem:[#allocation21 + $0x68] sm:$0xff] %v1022_v42  ;;  %v1046_v19 = vmul.f32 %v1014_v44, %v1014_v44  ;;  %v1047_v57 = vmul.f32 %v1015_v10, %v1015_v10  ;;  %v4934_v44 = vld [vmem:[#allocation45_spill] sm:$0xff]  ;;  %v4940_v63 = vld [vmem:[#allocation56_spill] sm:$0xff]  ;;  %1938 = vlog2.f32 %v3238_v2 }
 0x125   :  { %1039 = vst [vmem:[#allocation21 + $0x70] sm:$0xff] %v1023_v43  ;;  %v1048_v5 = vmul.f32 %v1016_v25, %v1016_v25  ;;  %v1049_v8 = vmul.f32 %v1017_v23, %v1017_v23  ;;  %v1050_v6 = vmul.f32 %v1018_v15, %v1018_v15  ;;  %v1051_v9 = vmul.f32 %v1019_v35, %v1019_v35  ;;  %v4935_v25 = vld [vmem:[#allocation46_spill] sm:$0xff]  ;;  %v4936_v15 = vld [vmem:[#allocation47_spill] sm:$0xff]  ;;  %v4937_v27 = vld [vmem:[#allocation49_spill] sm:$0xff] }
 0x126   :  { %v1024_v7 = vadd.f32 %v1008_v37, %v720_v52  ;;  %v1052_v50 = vmul.f32 %v1020_v22, %v1020_v22  ;;  %v1053_v30 = vmul.f32 %v1021_v46, %v1021_v46  ;;  %v1054_v36 = vmul.f32 %v1022_v42, %v1022_v42  ;;  %v4938_v22 = vld [vmem:[#allocation50_spill] sm:$0xff]  ;;  %v4939_v46 = vld [vmem:[#allocation55_spill] sm:$0xff] }
 0x127   :  { %v1055_v40 = vmul.f32 %v1023_v43, %v1023_v43  ;;  %v1073_v3 = vsub.f32 %v1041_v1, %v4930_v54  ;;  %v1074_v4 = vsub.f32 %v1042_v34, %v4931_v32  ;;  %v1075_v16 = vsub.f32 %v1043_v61, %v4932_v11  ;;  %v4941_v43 = vld [vmem:[#allocation59_spill] sm:$0xff]  ;;  %v4942_v34 = vld [vmem:[#allocation60_spill] sm:$0xff]  ;;  %v4945_v32 = vld [vmem:[#allocation65_spill] sm:$0xff] }
 0x128   :  { %1040 = vst [vmem:[#allocation21 + $0x78] sm:$0xff] %v1024_v7  ;;  %v1056_v33 = vmul.f32 %v1024_v7, %v1024_v7  ;;  %v1076_v39 = vsub.f32 %v1044_v13, %v4933_v60  ;;  %v1077_v10 = vsub.f32 %v1045_v45, %v4934_v44  ;;  %v1078_v23 = vsub.f32 %v1046_v19, %v4935_v25  ;;  %v4943_v7 = vld [vmem:[#allocation63_spill] sm:$0xff]  ;;  %v4944_v54 = vld [vmem:[#allocation64_spill] sm:$0xff]  ;;  %v3400_v25 = vld [vmem:[#allocation6 + $0x60] sm:$0xff] }
 0x129   :  { %v1079_v29 = vsub.f32 %v1047_v57, %v4936_v15  ;;  %v1080_v35 = vsub.f32 %v1048_v5, %v4937_v27  ;;  %v1081_v52 = vsub.f32 %v1049_v8, %v4938_v22  ;;  %v1082_v42 = vsub.f32 %v1050_v6, %v4939_v46  ;;  %v3391_v60 = vld [vmem:[#allocation6 + $0x50] sm:$0xff]  ;;  %4947 = vst [vmem:[#allocation51_spill] sm:$0xff] %v3400_v25  ;;  %v4950_v46 = vld [vmem:[#allocation66_spill] sm:$0xff]  ;;  %v4955_v22 = vld [vmem:[#allocation61_spill] sm:$0xff] }
 0x12a   :  { %v1083_v37 = vsub.f32 %v1051_v9, %v4940_v63  ;;  %v1084_v1 = vsub.f32 %v1052_v50, %v4941_v43  ;;  %v1085_v61 = vsub.f32 %v1053_v30, %v4942_v34  ;;  %v1086_v13 = vsub.f32 %v1054_v36, %v4943_v7  ;;  %v4951_v14 = vld [vmem:[#allocation67_spill] sm:$0xff] }
 0x12b   :  { %v1087_v45 = vsub.f32 %v1055_v40, %v4944_v54  ;;  %v1088_v19 = vsub.f32 %v1056_v33, %v4945_v32  ;;  %v3362_v11 = vmul.f32 0.5, %v1073_v3  ;;  %v3364_v57 = vmul.f32 0.5, %v1074_v4  ;;  %v1933_v26 = vpop.eup %1932 }
 0x12c   :  { %v3366_v5 = vmul.f32 0.5, %v1075_v16  ;;  %v3368_v8 = vmul.f32 0.5, %v1076_v39  ;;  %v3370_v6 = vmul.f32 0.5, %v1077_v10  ;;  %v3372_v9 = vmul.f32 0.5, %v1078_v23  ;;  %v3398_v10 = vld [vmem:[#allocation6 + $0x58] sm:$0xff]  ;;  %v3402_v23 = vld [vmem:[#allocation6 + $0x68] sm:$0xff] }
 0x12d   :  { %v3374_v50 = vmul.f32 0.5, %v1079_v29  ;;  %v3376_v30 = vmul.f32 0.5, %v1080_v35  ;;  %v3378_v36 = vmul.f32 0.5, %v1081_v52  ;;  %v3380_v40 = vmul.f32 0.5, %v1082_v42  ;;  %4946 = vst [vmem:[#allocation48_spill] sm:$0xff] %v3398_v10  ;;  %4948 = vst [vmem:[#allocation38_spill] sm:$0xff] %v3402_v23 }
 0x12e   :  { %v3382_v33 = vmul.f32 0.5, %v1083_v37  ;;  %v3384_v3 = vmul.f32 0.5, %v1084_v1  ;;  %v3386_v4 = vmul.f32 0.5, %v1085_v61  ;;  %v3388_v16 = vmul.f32 0.5, %v1086_v13  ;;  %v3406_v29 = vld [vmem:[#allocation6 + $0x70] sm:$0xff]  ;;  %v4953_v1 = vld [vmem:[#allocation69_spill] sm:$0xff] }
 0x12f   :  { %v3393_v39 = vmul.f32 0.5, %v1087_v45  ;;  %v3395_v44 = vmul.f32 0.5, %v1088_v19  ;;  %4949 = vst [vmem:[#allocation52_spill] sm:$0xff] %v3406_v29  ;;  %v258_v42 = vand.u32 2147483647, %v4950_v46  ;;  %1940 = vlog2.f32 %v3242_v62  ;;  %v4952_v37 = vld [vmem:[#allocation68_spill] sm:$0xff] }
 0x130   :  { %v259_v63 = vand.u32 2147483647, %v4951_v14  ;;  %v260_v43 = vand.u32 2147483647, %v4952_v37  ;;  %v261_v34 = vand.u32 2147483647, %v4953_v1  ;;  %1942 = vlog2.f32 %v3249_v18 }
 0x131   :  { %v4954_v61 = vld [vmem:[#allocation70_spill] sm:$0xff]  ;;  %v263_v2 = vand.u32 2147483647, %v3332_v20  ;;  %v264_v13 = vand.u32 2147483647, %v3334_v24  ;;  %1944 = vlog2.f32 %v3253_v56  ;;  %v274_v27 = vsub.f32 0.0, %v258_v42 }
 0x132   :  { %v262_v7 = vand.u32 2147483647, %v4954_v61  ;;  %v265_v54 = vand.u32 2147483647, %v3336_v53  ;;  %v266_v62 = vand.u32 2147483647, %v3338_v59  ;;  %1946 = vlog2.f32 %v3257_v38 }
 0x133   :  { %v267_v45 = vand.u32 2147483647, %v3391_v60  ;;  %v268_v32 = vand.u32 2147483647, %v3398_v10  ;;  %v269_v18 = vand.u32 2147483647, %v3400_v25  ;;  %1948 = vlog2.f32 %v3263_v47 }
 0x134   :  { %v270_v19 = vand.u32 2147483647, %v3402_v23  ;;  %v271_v52 = vand.u32 2147483647, %v3406_v29  ;;  %v4956_v12 = vand.u32 2147483647, %v4955_v22  ;;  %1950 = vlog2.f32 %v3267_v21  ;;  %v1935_v23 = vpop.eup %1934 }
 0x135   :  { %v275_v15 = vsub.f32 0.0, %v259_v63  ;;  %v276_v38 = vsub.f32 0.0, %v260_v43  ;;  %1952 = vlog2.f32 %v3271_v48  ;;  %v277_v55 = vsub.f32 0.0, %v261_v34  ;;  %v1937_v25 = vpop.eup %1936 }
 0x136   :  { %v273_v35 = vsub.f32 0.0, %v4956_v12  ;;  %v278_v51 = vsub.f32 0.0, %v262_v7  ;;  %v279_v58 = vsub.f32 0.0, %v263_v2  ;;  %v1106_v47 = vmul.f32 0.6931472, %v1933_v26  ;;  %v1939_v63 = vpop.eup %1938 }
 0x137   :  { %1954 = vlog2.f32 %v3275_v28  ;;  %v280_v29 = vsub.f32 0.0, %v264_v13  ;;  %v3441_v56 = vsub.f32 0.0, %v265_v54  ;;  %v1108_v12 = vmul.f32 0.6931472, %v1935_v23 }
 0x138   :  { %1956 = vlog2.f32 %v3289_v41  ;;  %v3444_v21 = vsub.f32 0.0, %v266_v62  ;;  %v3446_v42 = vsub.f32 0.0, %v267_v45  ;;  %v1110_v48 = vmul.f32 0.6931472, %v1937_v25 }
 0x139   :  { %1958 = vlog2.f32 %v3307_v0  ;;  %v1137_v43 = vsub.f32 %v3362_v11, %v1106_v47  ;;  %v3450_v26 = vsub.f32 0.0, %v268_v32  ;;  %v1941_v28 = vpop.eup %1940  ;;  %v1112_v34 = vmul.f32 0.6931472, %v1939_v63 }
 0x13a   :  { %1960 = vlog2.f32 %v3321_v17  ;;  %v1138_v23 = vsub.f32 %v3364_v57, %v1108_v12  ;;  %v289_v7 = vmul.f32 1.442695, %v273_v35  ;;  %v1943_v41 = vpop.eup %1942  ;;  %v1114_v2 = vmul.f32 0.6931472, %v1941_v28 }
 0x13b   :  { %v1139_v13 = vsub.f32 %v3366_v5, %v1110_v48  ;;  %v3455_v54 = vsub.f32 0.0, %v269_v18  ;;  %v291_v25 = vmul.f32 1.442695, %v274_v27  ;;  %v1945_v62 = vpop.eup %1944  ;;  %v1116_v0 = vmul.f32 0.6931472, %v1943_v41 }
 0x13c   :  { %1962 = vlog2.f32 %v3328_v31  ;;  %v1140_v11 = vsub.f32 %v3368_v8, %v1112_v34  ;;  %v1153_v45 = vadd.f32 %v1138_v23, %v1137_v43  ;;  %v1947_v32 = vpop.eup %1946  ;;  %v1118_v47 = vmul.f32 0.6931472, %v1945_v62 }
 0x13d   :  { %v286_v17 = vsub.f32 0.0, %v270_v19  ;;  %v287_v63 = vsub.f32 0.0, %v271_v52  ;;  %v293_v57 = vmul.f32 1.442695, %v275_v15  ;;  %v1949_v35 = vpop.eup %1948  ;;  %v1141_v12 = vsub.f32 %v3370_v6, %v1114_v2 }
 0x13e   :  { %v1154_v28 = vadd.f32 %v1153_v45, %v1139_v13  ;;  %1964 = vpow2.f32 %v289_v7  ;;  %v295_v5 = vmul.f32 1.442695, %v276_v38  ;;  %v1951_v18 = vpop.eup %1950  ;;  %v1120_v27 = vmul.f32 0.6931472, %v1947_v32 }
 0x13f   :  { %v1122_v48 = vmul.f32 0.6931472, %v1949_v35  ;;  %1966 = vpow2.f32 %v291_v25  ;;  %v297_v41 = vmul.f32 1.442695, %v277_v55  ;;  %v1953_v31 = vpop.eup %1952  ;;  %v1124_v10 = vmul.f32 0.6931472, %v1951_v18 }
 0x140   :  { %v1142_v8 = vsub.f32 %v3372_v9, %v1116_v0  ;;  %v1155_v43 = vadd.f32 %v1154_v28, %v1140_v11  ;;  %1968 = vpow2.f32 %v293_v57  ;;  %v3461_v52 = vmul.f32 0.6931472, %v1953_v31 }
 0x141   :  { %v1955_v19 = vpop.eup %1954  ;;  %v1143_v15 = vsub.f32 %v3374_v50, %v1118_v47  ;;  %v4957_v6 = vand.u32 2147483647, %v3408_v49  ;;  %v299_v38 = vmul.f32 1.442695, %v278_v51  ;;  %1970 = vpow2.f32 %v295_v5 }
 0x142   :  { %v1957_v23 = vpop.eup %1956  ;;  %v3466_v7 = vmul.f32 0.6931472, %v1955_v19  ;;  %v1156_v2 = vadd.f32 %v1155_v43, %v1141_v12  ;;  %v301_v55 = vmul.f32 1.442695, %v279_v58  ;;  %v1144_v9 = vsub.f32 %v3376_v30, %v1120_v27 }
 0x143   :  { %v288_v34 = vsub.f32 0.0, %v4957_v6  ;;  %v1959_v13 = vpop.eup %1958  ;;  %v1145_v25 = vsub.f32 %v3378_v36, %v1122_v48  ;;  %1972 = vpow2.f32 %v297_v41  ;;  %v303_v62 = vmul.f32 1.442695, %v280_v29 }
 0x144   :  { %v1961_v0 = vpop.eup %1960  ;;  %v3470_v11 = vmul.f32 0.6931472, %v1957_v23  ;;  %v1146_v50 = vsub.f32 %v3380_v40, %v1124_v10  ;;  %v1157_v45 = vadd.f32 %v1156_v2, %v1142_v8  ;;  %1974 = vpow2.f32 %v299_v38 }
 0x145   :  { %v3473_v51 = vmul.f32 0.6931472, %v1959_v13  ;;  %v1147_v32 = vsub.f32 %v3382_v33, %v3461_v52  ;;  %1976 = vpow2.f32 %v301_v55  ;;  %v305_v58 = vmul.f32 1.442695, %v3441_v56 }
 0x146   :  { %v1963_v30 = vpop.eup %1962  ;;  %v1148_v36 = vsub.f32 %v3384_v3, %v3466_v7  ;;  %v1158_v29 = vadd.f32 %v1157_v45, %v1143_v15  ;;  %1978 = vpow2.f32 %v303_v62  ;;  %v307_v47 = vmul.f32 1.442695, %v3444_v21 }
 0x147   :  { %v3481_v57 = vmul.f32 0.6931472, %v1961_v0  ;;  %1980 = vpow2.f32 %v305_v58  ;;  %v309_v40 = vmul.f32 1.442695, %v3446_v42  ;;  %v311_v10 = vmul.f32 1.442695, %v3450_v26 }
 0x148   :  { %v1965_v35 = vpop.eup %1964  ;;  %v1149_v33 = vsub.f32 %v3386_v4, %v3470_v11  ;;  %v1159_v56 = vadd.f32 %v1158_v29, %v1144_v9  ;;  %1982 = vpow2.f32 %v307_v47  ;;  %v313_v12 = vmul.f32 1.442695, %v3455_v54 }
 0x149   :  { %v1967_v3 = vpop.eup %1966  ;;  %v3488_v28 = vmul.f32 0.6931472, %v1963_v30  ;;  %1984 = vpow2.f32 %v309_v40  ;;  %v315_v21 = vmul.f32 1.442695, %v286_v17  ;;  %v317_v5 = vmul.f32 1.442695, %v287_v63 }
 0x14a   :  { %v1969_v18 = vpop.eup %1968  ;;  %v1160_v27 = vadd.f32 %v1159_v56, %v1145_v25  ;;  %1986 = vpow2.f32 %v311_v10  ;;  %v319_v42 = vmul.f32 1.442695, %v288_v34  ;;  %v324_v48 = vmul.f32 -0.5, %v1965_v35 }
 0x14b   :  { %v1150_v26 = vsub.f32 %v3388_v16, %v3473_v51  ;;  %1988 = vpow2.f32 %v313_v12  ;;  %v321_v4 = vadd.f32 1.0, %v1965_v35  ;;  %v333_v41 = vmul.f32 -0.5, %v1967_v3  ;;  %v1971_v31 = vpop.eup %1970 }
 0x14c   :  { %v1151_v54 = vsub.f32 %v3393_v39, %v3481_v57  ;;  %v1161_v8 = vadd.f32 %v1160_v27, %v1146_v50  ;;  %1990 = vpow2.f32 %v315_v21  ;;  %v330_v43 = vadd.f32 1.0, %v1967_v3 }
 0x14d   :  { %v3494_v17 = vpop.eup %1972  ;;  %1992 = vpow2.f32 %v317_v5  ;;  %v325_v63 = vadd.f32 1.0, %v324_v48  ;;  %v327_v19 = vand.u32 2147483647, %v1965_v35  ;;  %v339_v52 = vadd.f32 1.0, %v1969_v18 }
 0x14e   :  { %v3496_v15 = vpop.eup %1974  ;;  %v1162_v6 = vadd.f32 %v1161_v8, %v1147_v32  ;;  %1994 = vpow2.f32 %v319_v42  ;;  %v334_v16 = vadd.f32 1.0, %v333_v41  ;;  %v336_v34 = vand.u32 2147483647, %v1967_v3 }
 0x14f   :  { %v3498_v38 = vpop.eup %1976  ;;  %v1152_v39 = vsub.f32 %v3395_v44, %v3488_v28  ;;  %1996 = vlog2.f32 %v321_v4  ;;  %v342_v23 = vmul.f32 -0.5, %v1969_v18  ;;  %v345_v7 = vand.u32 2147483647, %v1969_v18  ;;  %v3737_v44 = vld [vmem:[#allocation8 + $0x8] sm:$0xff] }
 0x150   :  { %v3502_v2 = vpop.eup %1978  ;;  %v1163_v55 = vadd.f32 %v1162_v6, %v1148_v36  ;;  %1998 = vlog2.f32 %v330_v43  ;;  %v348_v13 = vadd.f32 1.0, %v1971_v31  ;;  %v351_v9 = vmul.f32 -0.5, %v1971_v31 }
 0x151   :  { %v3504_v25 = vpop.eup %1980  ;;  %v3506_v62 = vmul.f32 %v1965_v35, %v325_v63  ;;  %2000 = vlog2.f32 %v339_v52  ;;  %v343_v0 = vadd.f32 1.0, %v342_v23  ;;  %v354_v11 = vand.u32 2147483647, %v1971_v31 }
 0x152   :  { %v3508_v50 = vpop.eup %1982  ;;  %v1164_v45 = vadd.f32 %v1163_v55, %v1149_v33  ;;  %vm3510_vm0 = vcmp.lt.f32.partialorder %v327_v19, 0.0004427343  ;;  %v3514_v51 = vmul.f32 %v1967_v3, %v334_v16  ;;  %vm3516_vm1 = vcmp.lt.f32.partialorder %v336_v34, 0.0004427343 }
 0x153   :  { %2002 = vlog2.f32 %v348_v13  ;;  %v357_v58 = vadd.f32 1.0, %v3494_v17  ;;  %v3521_v30 = vpop.eup %1984  ;;  %vm3523_vm2 = vcmp.lt.f32.partialorder %v345_v7, 0.0004427343  ;;  %v352_v29 = vadd.f32 1.0, %v351_v9 }
 0x154   :  { %v360_v47 = vmul.f32 -0.5, %v3494_v17  ;;  %v363_v57 = vand.u32 2147483647, %v3494_v17  ;;  %v3529_v40 = vpop.eup %1986  ;;  %v1165_v10 = vadd.f32 %v1164_v45, %v1150_v26  ;;  %v3531_v35 = vmul.f32 %v1969_v18, %v343_v0 }
 0x155   :  { %2004 = vlog2.f32 %v357_v58  ;;  %v366_v33 = vadd.f32 1.0, %v3496_v15  ;;  %v3534_v56 = vpop.eup %1988  ;;  %vm3536_vm3 = vcmp.lt.f32.partialorder %v354_v11, 0.0004427343  ;;  %v369_v28 = vmul.f32 -0.5, %v3496_v15 }
 0x156   :  { %v361_v3 = vadd.f32 1.0, %v360_v47  ;;  %v372_v21 = vand.u32 2147483647, %v3496_v15  ;;  %v3542_v5 = vpop.eup %1990  ;;  %v1166_v27 = vadd.f32 %v1165_v10, %v1151_v54  ;;  %v375_v18 = vadd.f32 1.0, %v3498_v38 }
 0x157   :  { %2006 = vlog2.f32 %v366_v33  ;;  %v378_v42 = vmul.f32 -0.5, %v3498_v38  ;;  %v3546_v48 = vpop.eup %1992  ;;  %v3548_v26 = vmul.f32 %v1971_v31, %v352_v29  ;;  %vm3550_vm4 = vcmp.lt.f32.partialorder %v363_v57, 0.0004427343 }
 0x158   :  { %v370_v41 = vadd.f32 1.0, %v369_v28  ;;  %v381_v8 = vand.u32 2147483647, %v3498_v38  ;;  %v3555_v43 = vpop.eup %1994  ;;  %v1167_v63 = vadd.f32 %v1166_v27, %v1152_v39  ;;  %2008 = vlog2.f32 %v375_v18 }
 0x159   :  { %v379_v54 = vadd.f32 1.0, %v378_v42  ;;  %v384_v19 = vadd.f32 1.0, %v3502_v2  ;;  %v1997_v52 = vpop.eup %1996  ;;  %v3559_v6 = vmul.f32 %v3494_v17, %v361_v3  ;;  %vm3561_vm5 = vcmp.lt.f32.partialorder %v372_v21, 0.0004427343 }
 0x15a   :  { %v387_v16 = vmul.f32 -0.5, %v3502_v2  ;;  %v390_v34 = vand.u32 2147483647, %v3502_v2  ;;  %v1999_v23 = vpop.eup %1998  ;;  %1168 = vadd.xlane.f32.xlu1 %v1167_v63  ;;  %v3567_v7 = vmul.f32 0.6931472, %v1997_v52  ;;  %v3570_v39 = vmul.f32 %v3496_v15, %v370_v41 }
 0x15b   :  { %2010 = vlog2.f32 %v384_v19  ;;  %v393_v55 = vadd.f32 1.0, %v3504_v25  ;;  %v2001_v17 = vpop.eup %2000  ;;  %v3573_v13 = vmul.f32 0.6931472, %v1999_v23  ;;  %v3576_v9 = vmul.f32 %v3498_v38, %v379_v54 }
 0x15c   :  { %vm3578_vm6 = vcmp.lt.f32.partialorder %v381_v8, 0.0004427343  ;;  %v388_v11 = vadd.f32 1.0, %v387_v16  ;;  %v396_v45 = vmul.f32 -0.5, %v3504_v25  ;;  %v3583_v29 = vmul.f32 0.6931472, %v2001_v17 }
 0x15d   :  { %v2003_v58 = vpop.eup %2002  ;;  %vm3585_vm7 = vcmp.lt.f32.partialorder %v390_v34, 0.0004427343  ;;  %2012 = vlog2.f32 %v393_v55  ;;  %v399_v47 = vand.u32 2147483647, %v3504_v25  ;;  %v329_v38 = vsel %vm3510_vm0, %v3506_v62, %v3567_v7  ;;  %v3735_v62 = vld [vmem:[#allocation8] sm:$0xff]  ;;  %v3754_v7 = vld [vmem:[#allocation8 + $0x10] sm:$0xff] }
 0x15e   :  { %v338_v57 = vsel %vm3516_vm1, %v3514_v51, %v3573_v13  ;;  %v3598_v10 = vmul.f32 0.6931472, %v2003_v58  ;;  %v397_v33 = vadd.f32 1.0, %v396_v45  ;;  %v347_v28 = vsel %vm3523_vm2, %v3531_v35, %v3583_v29  ;;  %v3756_v13 = vld [vmem:[#allocation8 + $0x18] sm:$0xff] }
 0x15f   :  { %v2005_v3 = vpop.eup %2004  ;;  %v3605_v21 = vmul.f32 %v3502_v2, %v388_v11  ;;  %v402_v27 = vadd.f32 1.0, %v3508_v50  ;;  %v405_v18 = vmul.f32 -0.5, %v3508_v50  ;;  %vm3615_vm8 = vcmp.lt.f32.partialorder %v399_v47, 0.0004427343 }
 0x160   :  { %v356_v42 = vsel %vm3536_vm3, %v3548_v26, %v3598_v10  ;;  %v3613_v41 = vmul.f32 0.6931472, %v2005_v3  ;;  %v408_v63 = vand.u32 2147483647, %v3508_v50  ;;  %v411_v19 = vadd.f32 1.0, %v3521_v30 }
 0x161   :  { %v2007_v54 = vpop.eup %2006  ;;  %2014 = vlog2.f32 %v402_v27  ;;  %v406_v2 = vadd.f32 1.0, %v405_v18  ;;  %v414_v52 = vmul.f32 -0.5, %v3521_v30  ;;  %v3629_v23 = vmul.f32 %v3504_v25, %v397_v33  ;;  %v3800_v18 = vld [vmem:[#allocation8 + $0x38] sm:$0xff] }
 0x162   :  { %v3626_v34 = vmul.f32 0.6931472, %v2007_v54  ;;  %v417_v55 = vand.u32 2147483647, %v3521_v30  ;;  %v2009_v17 = vpop.eup %2008  ;;  %vm3632_vm9 = vcmp.lt.f32.partialorder %v408_v63, 0.0004427343  ;;  %2016 = vlog2.f32 %v411_v19 }
 0x163   :  { %v415_v45 = vadd.f32 1.0, %v414_v52  ;;  %v420_v58 = vadd.f32 1.0, %v3529_v40  ;;  %v3641_v3 = vmul.f32 0.6931472, %v2009_v17  ;;  %v3644_v25 = vmul.f32 %v3508_v50, %v406_v2 }
 0x164   :  { %v423_v33 = vmul.f32 -0.5, %v3529_v40  ;;  %vm3647_vm10 = vcmp.lt.f32.partialorder %v417_v55, 0.0004427343  ;;  %v426_v63 = vand.u32 2147483647, %v3529_v40  ;;  %v429_v54 = vadd.f32 1.0, %v3534_v56 }
 0x165   :  { %v2011_v27 = vpop.eup %2010  ;;  %2018 = vlog2.f32 %v420_v58  ;;  %v3654_v52 = vmul.f32 %v3521_v30, %v415_v45  ;;  %v432_v50 = vmul.f32 -0.5, %v3534_v56  ;;  %v383_v55 = vsel %vm3578_vm6, %v3576_v9, %v3641_v3 }
 0x166   :  { %v386_v19 = vmul.f32 0.6931472, %v2011_v27  ;;  %v424_v17 = vadd.f32 1.0, %v423_v33  ;;  %2020 = vlog2.f32 %v429_v54  ;;  %v435_v58 = vand.u32 2147483647, %v3534_v56 }
 0x167   :  { %v2013_v2 = vpop.eup %2012  ;;  %v438_v47 = vadd.f32 1.0, %v3542_v5  ;;  %vm3666_vm11 = vcmp.lt.f32.partialorder %v426_v63, 0.0004427343  ;;  %v433_v33 = vadd.f32 1.0, %v432_v50  ;;  %v441_v9 = vmul.f32 -0.5, %v3542_v5 }
 0x168   :  { %v392_v27 = vsel %vm3585_vm7, %v3605_v21, %v386_v19  ;;  %v395_v30 = vmul.f32 0.6931472, %v2013_v2  ;;  %v425_v16 = vmul.f32 %v3529_v40, %v424_v17  ;;  %v444_v0 = vand.u32 2147483647, %v3542_v5 }
 0x169   :  { %2022 = vlog2.f32 %v438_v47  ;;  %vm3676_vm12 = vcmp.lt.f32.partialorder %v435_v58, 0.0004427343  ;;  %v447_v21 = vadd.f32 1.0, %v3546_v48  ;;  %v450_v63 = vmul.f32 -0.5, %v3546_v48 }
 0x16a   :  { %v401_v3 = vsel %vm3615_vm8, %v3629_v23, %v395_v30  ;;  %v434_v40 = vmul.f32 %v3534_v56, %v433_v33  ;;  %v442_v47 = vadd.f32 1.0, %v441_v9  ;;  %v453_v19 = vand.u32 2147483647, %v3546_v48 }
 0x16b   :  { %v2015_v54 = vpop.eup %2014  ;;  %v456_v17 = vadd.f32 1.0, %v3555_v43  ;;  %2024 = vlog2.f32 %v447_v21  ;;  %v451_v8 = vadd.f32 1.0, %v450_v63  ;;  %v459_v23 = vmul.f32 -0.5, %v3555_v43 }
 0x16c   :  { %v404_v50 = vmul.f32 0.6931472, %v2015_v54  ;;  %v2017_v2 = vpop.eup %2016  ;;  %v3687_v58 = vmul.f32 %v3542_v5, %v442_v47  ;;  %vm3689_vm13 = vcmp.lt.f32.partialorder %v444_v0, 0.0004427343  ;;  %v462_v56 = vand.u32 2147483647, %v3555_v43 }
 0x16d   :  { %2026 = vlog2.f32 %v456_v17  ;;  %v413_v9 = vmul.f32 0.6931472, %v2017_v2  ;;  %v3698_v21 = vmul.f32 %v3546_v48, %v451_v8  ;;  %vm3700_vm14 = vcmp.lt.f32.partialorder %v453_v19, 0.0004427343  ;;  %v3820_v8 = vld [vmem:[#allocation8 + $0x58] sm:$0xff] }
 0x16e   :  { %v410_v33 = vsel %vm3632_vm9, %v3644_v25, %v404_v50  ;;  %v460_v5 = vadd.f32 1.0, %v459_v23  ;;  %vm3704_vm15 = vcmp.lt.f32.partialorder %v462_v56, 0.0004427343  ;;  %v4990_v47 = vmax.f32 %v4955_v22, 0.0  ;;  %v3818_v50 = vld [vmem:[#allocation8 + $0x50] sm:$0xff]  ;;  %v208_v54 = vld [vmem:[#allocation2 + $0x78] sm:$0xff] }
 0x16f   :  { %v2019_v0 = vpop.eup %2018  ;;  %v4991_v48 = vmax.f32 %v4950_v46, 0.0  ;;  %v4992_v19 = vmax.f32 %v4951_v14, 0.0  ;;  %v419_v46 = vsel %vm3647_vm10, %v3654_v52, %v413_v9  ;;  %v4993_v14 = vmax.f32 %v4952_v37, 0.0  ;;  %v3802_v52 = vld [vmem:[#allocation8 + $0x40] sm:$0xff]  ;;  %v194_v9 = vld [vmem:[#allocation2 + $0x8] sm:$0xff] }
 0x170   :  { %v3715_v11 = vadd.f32 %v329_v38, %v4990_v47  ;;  %v422_v51 = vmul.f32 0.6931472, %v2019_v0  ;;  %v3743_v32 = vmul.f32 %v3555_v43, %v460_v5  ;;  %v2021_v35 = vpop.eup %2020  ;;  %v4994_v29 = vmax.f32 %v4953_v1, 0.0  ;;  %v3828_v5 = vld [vmem:[#allocation8 + $0x60] sm:$0xff]  ;;  %v5011_v0 = vld [vmem:[#allocation51_spill] sm:$0xff] }
 0x171   :  { %v3724_v25 = vadd.f32 %v338_v57, %v4991_v48  ;;  %v3733_v22 = vadd.f32 %v347_v28, %v4992_v19  ;;  %v3752_v36 = vadd.f32 %v356_v42, %v4993_v14  ;;  %v4995_v43 = vsel %vm3550_vm4, %v3559_v6, %v3613_v41  ;;  %v3784_v6 = vld [vmem:[#allocation8 + $0x20] sm:$0xff]  ;;  %v3786_v28 = vld [vmem:[#allocation8 + $0x28] sm:$0xff]  ;;  %v196_v14 = vld [vmem:[#allocation2 + $0x18] sm:$0xff] }
 0x172   :  { %v3765_v37 = vadd.f32 %v4995_v43, %v4994_v29  ;;  %v4996_v12 = vmax.f32 %v4954_v61, 0.0  ;;  %v4997_v26 = vsel %vm3561_vm5, %v3570_v39, %v3626_v34  ;;  %v4998_v57 = vmax.f32 %v3332_v20, 0.0  ;;  %v3788_v61 = vld [vmem:[#allocation8 + $0x30] sm:$0xff] }
 0x173   :  { %v5000_v1 = vmax.f32 %v3334_v24, 0.0  ;;  %v428_v31 = vsel %vm3666_vm11, %v425_v16, %v422_v51  ;;  %v431_v39 = vmul.f32 0.6931472, %v2021_v35  ;;  %v5002_v42 = vmax.f32 %v3336_v53, 0.0  ;;  %v2023_v24 = vpop.eup %2022  ;;  %v5008_v16 = vld [vmem:[#allocation48_spill] sm:$0xff]  ;;  %v3840_v35 = vld [vmem:[#allocation8 + $0x68] sm:$0xff] }
 0x174   :  { %v3774_v38 = vadd.f32 %v4997_v26, %v4996_v12  ;;  %v3778_v10 = vadd.f32 %v383_v55, %v4998_v57  ;;  %v5004_v20 = vmax.f32 %v3338_v59, 0.0  ;;  %v3804_v55 = vld [vmem:[#allocation8 + $0x48] sm:$0xff]  ;;  %v5009_v17 = vmax.f32 %v5008_v16, 0.0  ;;  %v195_v51 = vld [vmem:[#allocation2 + $0x10] sm:$0xff]  ;;  %v200_v16 = vld [vmem:[#allocation2 + $0x38] sm:$0xff] }
 0x175   :  { %v3782_v4 = vadd.f32 %v392_v27, %v5000_v1  ;;  %v3794_v41 = vadd.f32 %v401_v3, %v5002_v42  ;;  %v5006_v27 = vmax.f32 %v3391_v60, 0.0  ;;  %v481_v59 = vmul.f32 %v3715_v11, %v3735_v62  ;;  %v197_v1 = vld [vmem:[#allocation2 + $0x20] sm:$0xff] }
 0x176   :  { %4999 = vst [vmem:[#allocation53_spill] sm:$0xff] %v3778_v10  ;;  %v3798_v34 = vadd.f32 %v410_v33, %v5004_v20  ;;  %v3812_v53 = vadd.f32 %v428_v31, %v5009_v17  ;;  %v482_v3 = vmul.f32 %v3724_v25, %v3737_v44  ;;  %v437_v23 = vsel %vm3676_vm12, %v434_v40, %v431_v39  ;;  %v193_v33 = vld [vmem:[#allocation2] sm:$0xff]  ;;  %v198_v31 = vld [vmem:[#allocation2 + $0x28] sm:$0xff]  ;;  %v199_v39 = vld [vmem:[#allocation2 + $0x30] sm:$0xff] }
 0x177   :  { %5001 = vst [vmem:[#allocation54_spill] sm:$0xff] %v3782_v4  ;;  %5003 = vst [vmem:[#allocation57_spill] sm:$0xff] %v3794_v41  ;;  %v3808_v45 = vadd.f32 %v419_v46, %v5006_v27  ;;  %v440_v60 = vmul.f32 0.6931472, %v2023_v24  ;;  %v483_v2 = vmul.f32 %v3733_v22, %v3754_v7  ;;  %v484_v56 = vmul.f32 %v3752_v36, %v3756_v13  ;;  %v2025_v46 = vpop.eup %2024  ;;  %v5014_v20 = vld [vmem:[#allocation38_spill] sm:$0xff] }
 0x178   :  { %5005 = vst [vmem:[#allocation39_spill] sm:$0xff] %v3798_v34  ;;  %5010 = vst [vmem:[#allocation58_spill] sm:$0xff] %v3812_v53  ;;  %v5012_v47 = vmax.f32 %v5011_v0, 0.0  ;;  %v485_v19 = vmul.f32 %v3765_v37, %v3784_v6  ;;  %v486_v15 = vmul.f32 %v3774_v38, %v3786_v28  ;;  %v487_v40 = vmul.f32 %v3778_v10, %v3788_v61  ;;  %v2027_v57 = vpop.eup %2026  ;;  %v201_v17 = vld [vmem:[#allocation2 + $0x40] sm:$0xff]  ;;  %v3868_v10 = vld [vmem:[#allocation8 + $0x78] sm:$0xff] }
 0x179   :  { %5007 = vst [vmem:[#allocation40_spill] sm:$0xff] %v3808_v45  ;;  %v446_v29 = vsel %vm3689_vm13, %v3687_v58, %v440_v60  ;;  %v488_v43 = vmul.f32 %v3782_v4, %v3800_v18  ;;  %v489_v12 = vmul.f32 %v3794_v41, %v3802_v52  ;;  %v490_v26 = vmul.f32 %v3798_v34, %v3804_v55  ;;  %v204_v41 = vld [vmem:[#allocation2 + $0x58] sm:$0xff]  ;;  %v205_v4 = vld [vmem:[#allocation2 + $0x60] sm:$0xff] }
 0x17a   :  { %v3832_v48 = vadd.f32 %v437_v23, %v5012_v47  ;;  %v449_v42 = vmul.f32 0.6931472, %v2025_v46  ;;  %v5015_v24 = vmax.f32 %v5014_v20, 0.0  ;;  %v491_v58 = vmul.f32 %v3808_v45, %v3818_v50  ;;  %v202_v23 = vld [vmem:[#allocation2 + $0x48] sm:$0xff]  ;;  %v203_v46 = vld [vmem:[#allocation2 + $0x50] sm:$0xff] }
 0x17b   :  { %v492_v30 = vmul.f32 %v3812_v53, %v3820_v8  ;;  %v458_v60 = vmul.f32 0.6931472, %v2027_v57  ;;  %v497_v47 = vadd.f32 %v481_v59, %v193_v33  ;;  %v498_v34 = vadd.f32 %v482_v3, %v194_v9  ;;  %v3861_v20 = vld [vmem:[#allocation8 + $0x70] sm:$0xff]  ;;  %v206_v57 = vld [vmem:[#allocation2 + $0x68] sm:$0xff] }
 0x17c   :  { %5013 = vst [vmem:[#allocation62_spill] sm:$0xff] %v3832_v48  ;;  %v3853_v27 = vadd.f32 %v446_v29, %v5015_v24  ;;  %v493_v0 = vmul.f32 %v3832_v48, %v3828_v5  ;;  %v455_v29 = vsel %vm3700_vm14, %v3698_v21, %v449_v42  ;;  %v499_v53 = vadd.f32 %v483_v2, %v195_v51  ;;  %v5016_v3 = vld [vmem:[#allocation52_spill] sm:$0xff] }
 0x17d   :  { %v500_v45 = vadd.f32 %v484_v56, %v196_v14  ;;  %v464_v59 = vsel %vm3704_vm15, %v3743_v32, %v458_v60  ;;  %v5017_v33 = vmax.f32 %v5016_v3, 0.0  ;;  %v501_v48 = vadd.f32 %v485_v19, %v197_v1  ;;  %514 = vst [vmem:[#allocation18 + $0x8] sm:$0xff] %v498_v34  ;;  %513 = vst [vmem:[#allocation18] sm:$0xff] %v497_v47  ;;  %v207_v21 = vld [vmem:[#allocation2 + $0x70] sm:$0xff] }
 0x17e   :  { %v494_v24 = vmul.f32 %v3853_v27, %v3840_v35  ;;  %v502_v63 = vadd.f32 %v486_v15, %v198_v31  ;;  %v5018_v2 = vmax.f32 %v3408_v49, 0.0  ;;  %v503_v51 = vadd.f32 %v487_v40, %v199_v39  ;;  %515 = vst [vmem:[#allocation18 + $0x10] sm:$0xff] %v499_v53 }
 0x17f   :  { %v3875_v9 = vadd.f32 %v455_v29, %v5017_v33  ;;  %v504_v14 = vadd.f32 %v488_v43, %v200_v16  ;;  %v505_v42 = vadd.f32 %v489_v12, %v201_v17  ;;  %516 = vst [vmem:[#allocation18 + $0x18] sm:$0xff] %v500_v45  ;;  %v506_v60 = vadd.f32 %v490_v26, %v202_v23 }
 0x180   :  { %v3879_v56 = vadd.f32 %v464_v59, %v5018_v2  ;;  %v507_v29 = vadd.f32 %v491_v58, %v203_v46  ;;  %v508_v19 = vadd.f32 %v492_v30, %v204_v41  ;;  %517 = vst [vmem:[#allocation18 + $0x20] sm:$0xff] %v501_v48  ;;  %518 = vst [vmem:[#allocation18 + $0x28] sm:$0xff] %v502_v63  ;;  %2028 = vlog2.f32 %v3715_v11 }
 0x181   :  { %v495_v32 = vmul.f32 %v3875_v9, %v3861_v20  ;;  %v509_v49 = vadd.f32 %v493_v0, %v205_v4  ;;  %v510_v1 = vadd.f32 %v494_v24, %v206_v57  ;;  %519 = vst [vmem:[#allocation18 + $0x30] sm:$0xff] %v503_v51  ;;  %520 = vst [vmem:[#allocation18 + $0x38] sm:$0xff] %v504_v14  ;;  %2030 = vlog2.f32 %v3724_v25 }
 0x182   :  { %v496_v15 = vmul.f32 %v3879_v56, %v3868_v10  ;;  %521 = vst [vmem:[#allocation18 + $0x40] sm:$0xff] %v505_v42  ;;  %522 = vst [vmem:[#allocation18 + $0x48] sm:$0xff] %v506_v60  ;;  %v529_v41 = vmul.f32 %v497_v47, %v497_v47  ;;  %v530_v12 = vmul.f32 %v498_v34, %v498_v34  ;;  %2032 = vlog2.f32 %v3733_v22  ;;  %v3976_v22 = vld [vmem:[%s4751_s11] sm:$0x1] }
 0x183   :  { %v511_v40 = vadd.f32 %v495_v32, %v207_v21  ;;  %523 = vst [vmem:[#allocation18 + $0x50] sm:$0xff] %v507_v29  ;;  %524 = vst [vmem:[#allocation18 + $0x58] sm:$0xff] %v508_v19  ;;  %v531_v26 = vmul.f32 %v499_v53, %v499_v53  ;;  %v532_v31 = vmul.f32 %v500_v45, %v500_v45  ;;  %2034 = vlog2.f32 %v3752_v36 }
 0x184   :  { %v512_v43 = vadd.f32 %v496_v15, %v208_v54  ;;  %525 = vst [vmem:[#allocation18 + $0x60] sm:$0xff] %v509_v49  ;;  %526 = vst [vmem:[#allocation18 + $0x68] sm:$0xff] %v510_v1  ;;  %v533_v39 = vmul.f32 %v501_v48, %v501_v48  ;;  %v534_v58 = vmul.f32 %v502_v63, %v502_v63  ;;  %2036 = vlog2.f32 %v3765_v37 }
 0x185   :  { %527 = vst [vmem:[#allocation18 + $0x70] sm:$0xff] %v511_v40  ;;  %v535_v4 = vmul.f32 %v503_v51, %v503_v51  ;;  %v536_v30 = vmul.f32 %v504_v14, %v504_v14  ;;  %v537_v16 = vmul.f32 %v505_v42, %v505_v42  ;;  %v538_v17 = vmul.f32 %v506_v60, %v506_v60 }
 0x186   :  { %528 = vst [vmem:[#allocation18 + $0x78] sm:$0xff] %v512_v43  ;;  %v539_v23 = vmul.f32 %v507_v29, %v507_v29  ;;  %v540_v0 = vmul.f32 %v508_v19, %v508_v19  ;;  %v541_v46 = vmul.f32 %v509_v49, %v509_v49  ;;  %v542_v24 = vmul.f32 %v510_v1, %v510_v1 }
 0x187   :  { %v543_v57 = vmul.f32 %v511_v40, %v511_v40  ;;  %v544_v59 = vmul.f32 %v512_v43, %v512_v43  ;;  %v545_v3 = vmul.f32 %v3735_v62, %v3735_v62  ;;  %v546_v34 = vmul.f32 %v3737_v44, %v3737_v44  ;;  %v3933_v40 = vld [vmem:[%s5019_s26] sm:$0x1] }
 0x188   :  { %v547_v45 = vmul.f32 %v3754_v7, %v3754_v7  ;;  %v548_v53 = vmul.f32 %v3756_v13, %v3756_v13  ;;  %v549_v48 = vmul.f32 %v3784_v6, %v3784_v6  ;;  %v550_v47 = vmul.f32 %v3786_v28, %v3786_v28 }
 0x189   :  { %v551_v33 = vmul.f32 %v3788_v61, %v3788_v61  ;;  %v552_v62 = vmul.f32 %v3800_v18, %v3800_v18  ;;  %v553_v44 = vmul.f32 %v3802_v52, %v3802_v52  ;;  %v554_v7 = vmul.f32 %v3804_v55, %v3804_v55 }
 0x18a   :  { %v555_v13 = vmul.f32 %v3818_v50, %v3818_v50  ;;  %v556_v6 = vmul.f32 %v3820_v8, %v3820_v8  ;;  %v557_v28 = vmul.f32 %v3828_v5, %v3828_v5  ;;  %v558_v61 = vmul.f32 %v3840_v35, %v3840_v35 }
 0x18b   :  { %v559_v18 = vmul.f32 %v3861_v20, %v3861_v20  ;;  %v560_v52 = vmul.f32 %v3868_v10, %v3868_v10  ;;  %v561_v63 = vsub.f32 %v529_v41, %v545_v3  ;;  %v562_v55 = vsub.f32 %v530_v12, %v546_v34  ;;  %v3920_v10 = vld [vmem:[%s4750_s10] sm:$0x1] }
 0x18c   :  { %v563_v21 = vsub.f32 %v531_v26, %v547_v45  ;;  %v564_v2 = vsub.f32 %v532_v31, %v548_v53  ;;  %v565_v50 = vsub.f32 %v533_v39, %v549_v48  ;;  %v566_v51 = vsub.f32 %v534_v58, %v550_v47  ;;  %v3945_v26 = vld [vmem:[%s4756_s16] sm:$0x1]  ;;  %v3987_v53 = vld [vmem:[#allocation15 + $0x8] sm:$0xff]  ;;  %v3991_v47 = vld [vmem:[#allocation15 + $0x10] sm:$0xff] }
 0x18d   :  { %v567_v14 = vsub.f32 %v535_v4, %v551_v33  ;;  %v568_v8 = vsub.f32 %v536_v30, %v552_v62  ;;  %v569_v42 = vsub.f32 %v537_v16, %v553_v44  ;;  %v570_v54 = vsub.f32 %v538_v17, %v554_v7  ;;  %v3985_v45 = vld [vmem:[#allocation15] sm:$0xff]  ;;  %v3993_v33 = vld [vmem:[#allocation15 + $0x18] sm:$0xff] }
 0x18e   :  { %v571_v5 = vsub.f32 %v539_v23, %v555_v13  ;;  %v572_v32 = vsub.f32 %v540_v0, %v556_v6  ;;  %v573_v60 = vsub.f32 %v541_v46, %v557_v28  ;;  %v574_v35 = vsub.f32 %v542_v24, %v558_v61  ;;  %v3995_v62 = vld [vmem:[#allocation15 + $0x20] sm:$0xff]  ;;  %v4000_v61 = vld [vmem:[#allocation15 + $0x28] sm:$0xff] }
 0x18f   :  { %v575_v29 = vsub.f32 %v543_v57, %v559_v18  ;;  %v576_v19 = vsub.f32 %v544_v59, %v560_v52  ;;  %v3922_v20 = vmul.f32 0.5, %v561_v63  ;;  %v3924_v15 = vmul.f32 0.5, %v562_v55  ;;  %v5020_v59 = vld [vmem:[#allocation53_spill] sm:$0xff]  ;;  %v5023_v52 = vld [vmem:[#allocation39_spill] sm:$0xff] }
 0x190   :  { %v3926_v49 = vmul.f32 0.5, %v563_v21  ;;  %v3928_v1 = vmul.f32 0.5, %v564_v2  ;;  %v3935_v43 = vmul.f32 0.5, %v565_v50  ;;  %v3937_v41 = vmul.f32 0.5, %v566_v51  ;;  %v5022_v13 = vld [vmem:[#allocation57_spill] sm:$0xff]  ;;  %v4004_v55 = vld [vmem:[#allocation15 + $0x30] sm:$0xff]  ;;  %v2029_v51 = vpop.eup %2028 }
 0x191   :  { %v3939_v12 = vmul.f32 0.5, %v567_v14  ;;  %v3947_v31 = vmul.f32 0.5, %v568_v8  ;;  %v3949_v39 = vmul.f32 0.5, %v569_v42  ;;  %v1182_v58 = vand.u32 2147483647, %v3920_v10  ;;  %v4006_v21 = vld [vmem:[#allocation15 + $0x38] sm:$0xff] }
 0x192   :  { %v3953_v4 = vmul.f32 0.5, %v570_v54  ;;  %v3955_v30 = vmul.f32 0.5, %v571_v5  ;;  %v669_v11 = vand.u32 2147483647, %v3933_v40  ;;  %v3959_v16 = vmul.f32 0.5, %v572_v32  ;;  %v5024_v14 = vld [vmem:[#allocation40_spill] sm:$0xff] }
 0x193   :  { %v3961_v17 = vmul.f32 0.5, %v573_v60  ;;  %v1694_v23 = vand.u32 2147483647, %v3945_v26  ;;  %v3965_v0 = vmul.f32 0.5, %v574_v35  ;;  %v1183_v25 = vsub.f32 0.0, %v1182_v58  ;;  %v4011_v8 = vld [vmem:[#allocation15 + $0x40] sm:$0xff]  ;;  %v2031_v60 = vpop.eup %2030 }
 0x194   :  { %v670_v46 = vsub.f32 0.0, %v669_v11  ;;  %v3968_v24 = vmul.f32 0.5, %v575_v29  ;;  %v3970_v57 = vmul.f32 0.5, %v576_v19  ;;  %2038 = vlog2.f32 %v3774_v38  ;;  %v5021_v38 = vld [vmem:[#allocation54_spill] sm:$0xff]  ;;  %v4019_v19 = vld [vmem:[#allocation15 + $0x50] sm:$0xff]  ;;  %v4021_v58 = vld [vmem:[#allocation15 + $0x58] sm:$0xff] }
 0x195   :  { %v1695_v36 = vsub.f32 0.0, %v1694_v23  ;;  %2040 = vlog2.f32 %v5020_v59  ;;  %v3982_v37 = vmul.f32 %v3976_v22, %v3976_v22  ;;  %v1184_v6 = vmul.f32 1.442695, %v1183_v25  ;;  %v4013_v42 = vld [vmem:[#allocation15 + $0x48] sm:$0xff]  ;;  %v2033_v25 = vpop.eup %2032  ;;  %v4026_v59 = vld [vmem:[#allocation15 + $0x60] sm:$0xff]  ;;  %v4037_v32 = vld [vmem:[#allocation15 + $0x70] sm:$0xff] }
 0x196   :  { %2042 = vlog2.f32 %v5021_v38  ;;  %v671_v28 = vmul.f32 1.442695, %v670_v46  ;;  %v594_v35 = vmul.f32 0.6931472, %v2029_v51  ;;  %v5025_v29 = vld [vmem:[#allocation58_spill] sm:$0xff]  ;;  %vm693_vm3 = vcmask 1040384  }
 0x197   :  { %2044 = vlog2.f32 %v5022_v13  ;;  %v1696_v63 = vmul.f32 1.442695, %v1695_v36  ;;  %v596_v46 = vmul.f32 0.6931472, %v2031_v60  ;;  %v5026_v36 = vld [vmem:[#allocation62_spill] sm:$0xff] }
 0x198   :  { %2046 = vlog2.f32 %v5023_v52  ;;  %v2035_v52 = vpop.eup %2034  ;;  %v598_v51 = vmul.f32 0.6931472, %v2033_v25 }
 0x199   :  { %2048 = vlog2.f32 %v5024_v14  ;;  %v625_v14 = vsub.f32 %v3922_v20, %v594_v35  ;;  %v2037_v11 = vpop.eup %2036  ;;  %v600_v60 = vmul.f32 0.6931472, %v2035_v52 }
 0x19a   :  { %2050 = vlog2.f32 %v5025_v29  ;;  %v4032_v29 = vld [vmem:[#allocation15 + $0x68] sm:$0xff]  ;;  %v602_v25 = vmul.f32 0.6931472, %v2037_v11  ;;  %v1281_v11 = vand.u32 2147483647, %v3985_v45 }
 0x19b   :  { %2052 = vlog2.f32 %v5026_v36  ;;  %v626_v36 = vsub.f32 %v3924_v15, %v596_v46  ;;  %v628_v52 = vsub.f32 %v3928_v1, %v600_v60  ;;  %v4053_v1 = vld [vmem:[%s5027_s22] sm:$0x1]  ;;  %v1284_v60 = vand.u32 2147483647, %v3993_v33 }
 0x19c   :  { %2054 = vlog2.f32 %v3853_v27  ;;  %v627_v27 = vsub.f32 %v3926_v49, %v598_v51  ;;  %v629_v51 = vsub.f32 %v3935_v43, %v602_v25  ;;  %v4065_v25 = vld [vmem:[%s4757_s17] sm:$0x1]  ;;  %v1297_v54 = vsub.f32 0.0, %v1281_v11 }
 0x19d   :  { %2056 = vlog2.f32 %v3875_v9  ;;  %v641_v5 = vadd.f32 %v626_v36, %v625_v14  ;;  %v4044_v9 = vld [vmem:[#allocation15 + $0x78] sm:$0xff]  ;;  %v1283_v14 = vand.u32 2147483647, %v3991_v47  ;;  %v4070_v46 = vmul.f32 %v4065_v25, %v4065_v25 }
 0x19e   :  { %v2039_v38 = vpop.eup %2038  ;;  %2058 = vlog2.f32 %v3879_v56  ;;  %v1282_v56 = vand.u32 2147483647, %v3987_v53 }
 0x19f   :  { %v2041_v35 = vpop.eup %2040  ;;  %v604_v23 = vmul.f32 0.6931472, %v2039_v38  ;;  %2060 = vpow2.f32 %v1184_v6  ;;  %v642_v20 = vadd.f32 %v641_v5, %v627_v27 }
 0x1a0   :  { %v2043_v15 = vpop.eup %2042  ;;  %2062 = vpow2.f32 %v671_v28  ;;  %v606_v49 = vmul.f32 0.6931472, %v2041_v35  ;;  %v4057_v28 = vmul.f32 %v4053_v1, %v4053_v1 }
 0x1a1   :  { %v2045_v13 = vpop.eup %2044  ;;  %2064 = vpow2.f32 %v1696_v63  ;;  %v608_v38 = vmul.f32 0.6931472, %v2043_v15  ;;  %v630_v43 = vsub.f32 %v3937_v41, %v604_v23  ;;  %v643_v5 = vadd.f32 %v642_v20, %v628_v52 }
 0x1a2   :  { %v2047_v6 = vpop.eup %2046  ;;  %v610_v35 = vmul.f32 0.6931472, %v2045_v13  ;;  %v631_v23 = vsub.f32 %v3939_v12, %v606_v49  ;;  %v1288_v52 = vand.u32 2147483647, %v4006_v21 }
 0x1a3   :  { %v2049_v36 = vpop.eup %2048  ;;  %v612_v15 = vmul.f32 0.6931472, %v2047_v6  ;;  %v644_v20 = vadd.f32 %v643_v5, %v629_v51  ;;  %v632_v7 = vsub.f32 %v3947_v31, %v608_v38 }
 0x1a4   :  { %v2051_v27 = vpop.eup %2050  ;;  %v614_v41 = vmul.f32 0.6931472, %v2049_v36  ;;  %v633_v34 = vsub.f32 %v3949_v39, %v610_v35 }
 0x1a5   :  { %v2053_v50 = vpop.eup %2052  ;;  %v616_v18 = vmul.f32 0.6931472, %v2051_v27  ;;  %v645_v3 = vadd.f32 %v644_v20, %v630_v43  ;;  %v634_v51 = vsub.f32 %v3953_v4, %v612_v15 }
 0x1a6   :  { %v2055_v2 = vpop.eup %2054  ;;  %v618_v49 = vmul.f32 0.6931472, %v2053_v50  ;;  %v635_v27 = vsub.f32 %v3955_v30, %v614_v41 }
 0x1a7   :  { %v2057_v48 = vpop.eup %2056  ;;  %v646_v44 = vadd.f32 %v645_v3, %v631_v23  ;;  %v620_v43 = vmul.f32 0.6931472, %v2055_v2  ;;  %v636_v20 = vsub.f32 %v3959_v16, %v616_v18 }
 0x1a8   :  { %v2059_v12 = vpop.eup %2058  ;;  %v622_v4 = vmul.f32 0.6931472, %v2057_v48  ;;  %v637_v2 = vsub.f32 %v3961_v17, %v618_v49  ;;  %v1298_v48 = vsub.f32 0.0, %v1282_v56  ;;  %v665_v56 = vld [vmem:[%s5045_s5] sm:$0x1] }
 0x1a9   :  { %v2061_v38 = vpop.eup %2060  ;;  %v647_v15 = vadd.f32 %v646_v44, %v632_v7  ;;  %v4089_v31 = vmul.f32 0.6931472, %v2059_v12  ;;  %v1299_v44 = vsub.f32 0.0, %v1283_v14  ;;  %v638_v7 = vsub.f32 %v3965_v0, %v620_v43 }
 0x1aa   :  { %v2063_v35 = vpop.eup %2062  ;;  %v1186_v36 = vadd.f32 1.0, %v2061_v38  ;;  %v1189_v50 = vmul.f32 -0.5, %v2061_v38  ;;  %v1192_v30 = vand.u32 2147483647, %v2061_v38  ;;  %v639_v11 = vsub.f32 %v3968_v24, %v622_v4 }
 0x1ab   :  { %v2065_v13 = vpop.eup %2064  ;;  %v673_v5 = vadd.f32 1.0, %v2063_v35  ;;  %v676_v3 = vmul.f32 -0.5, %v2063_v35  ;;  %v648_v41 = vadd.f32 %v647_v15, %v633_v34  ;;  %v679_v6 = vand.u32 2147483647, %v2063_v35 }
 0x1ac   :  { %2066 = vlog2.f32 %v1186_v36  ;;  %v1190_v23 = vadd.f32 1.0, %v1189_v50  ;;  %v1698_v39 = vadd.f32 1.0, %v2065_v13  ;;  %v1701_v16 = vmul.f32 -0.5, %v2065_v13 }
 0x1ad   :  { %2068 = vlog2.f32 %v673_v5  ;;  %v1704_v18 = vand.u32 2147483647, %v2065_v13  ;;  %v649_v63 = vadd.f32 %v648_v41, %v634_v51  ;;  %v677_v36 = vadd.f32 1.0, %v676_v3 }
 0x1ae   :  { %2070 = vlog2.f32 %v1698_v39  ;;  %v1300_v34 = vsub.f32 0.0, %v1284_v60  ;;  %v640_v17 = vsub.f32 %v3970_v57, %v4089_v31  ;;  %v1191_v49 = vmul.f32 %v2061_v38, %v1190_v23 }
 0x1af   :  { %v650_v12 = vadd.f32 %v649_v63, %v635_v27  ;;  %vm4100_vm0 = vcmp.lt.f32.partialorder %v1192_v30, 0.0004427343  ;;  %vm4104_vm1 = vcmp.lt.f32.partialorder %v679_v6, 0.0004427343  ;;  %v1702_v0 = vadd.f32 1.0, %v1701_v16 }
 0x1b0   :  { %vm4108_vm2 = vcmp.lt.f32.partialorder %v1704_v18, 0.0004427343  ;;  %v5034_v14 = vand.u32 2147483647, %v3995_v62  ;;  %v5035_v57 = vand.u32 2147483647, %v4000_v61  ;;  %v678_v6 = vmul.f32 %v2063_v35, %v677_v36 }
 0x1b1   :  { %v651_v5 = vadd.f32 %v650_v12, %v636_v20  ;;  %v5036_v31 = vand.u32 2147483647, %v4004_v55  ;;  %v1304_v27 = vsub.f32 0.0, %v1288_v52  ;;  %v1313_v39 = vmul.f32 1.442695, %v1297_v54 }
 0x1b2   :  { %v1301_v60 = vsub.f32 0.0, %v5034_v14  ;;  %v1302_v63 = vsub.f32 0.0, %v5035_v57  ;;  %v1315_v43 = vmul.f32 1.442695, %v1298_v48  ;;  %v1317_v50 = vmul.f32 1.442695, %v1299_v44 }
 0x1b3   :  { %v1303_v38 = vsub.f32 0.0, %v5036_v31  ;;  %v652_v4 = vadd.f32 %v651_v5, %v637_v2  ;;  %v5037_v15 = vand.u32 2147483647, %v4011_v8  ;;  %v5038_v3 = vand.u32 2147483647, %v4013_v42 }
 0x1b4   :  { %v1319_v23 = vmul.f32 1.442695, %v1300_v34  ;;  %v1703_v16 = vmul.f32 %v2065_v13, %v1702_v0  ;;  %v5039_v18 = vand.u32 2147483647, %v4019_v19  ;;  %2072 = vpow2.f32 %v1313_v39 }
 0x1b5   :  { %v1305_v30 = vsub.f32 0.0, %v5037_v15  ;;  %v1306_v41 = vsub.f32 0.0, %v5038_v3  ;;  %v1321_v14 = vmul.f32 1.442695, %v1301_v60  ;;  %v653_v35 = vadd.f32 %v652_v4, %v638_v7 }
 0x1b6   :  { %v2067_v20 = vpop.eup %2066  ;;  %v1307_v12 = vsub.f32 0.0, %v5039_v18  ;;  %2074 = vpow2.f32 %v1315_v43  ;;  %v1323_v48 = vmul.f32 1.442695, %v1302_v63  ;;  %v5040_v44 = vand.u32 2147483647, %v4021_v58 }
 0x1b7   :  { %v2069_v52 = vpop.eup %2068  ;;  %v1188_v54 = vmul.f32 0.6931472, %v2067_v20  ;;  %v5041_v5 = vand.u32 2147483647, %v4026_v59  ;;  %2076 = vpow2.f32 %v1317_v50  ;;  %v654_v13 = vadd.f32 %v653_v35, %v639_v11  ;;  %v1178_v50 = vld [vmem:[%s4749_s9] sm:$0x1] }
 0x1b8   :  { %v675_v2 = vmul.f32 0.6931472, %v2069_v52  ;;  %v1308_v36 = vsub.f32 0.0, %v5040_v44  ;;  %v2071_v34 = vpop.eup %2070  ;;  %2078 = vpow2.f32 %v1319_v23  ;;  %v1325_v60 = vmul.f32 1.442695, %v1303_v38 }
 0x1b9   :  { %v1309_v57 = vsub.f32 0.0, %v5041_v5  ;;  %v1194_v0 = vsel %vm4100_vm0, %v1191_v49, %v1188_v54  ;;  %v5042_v7 = vmax.f32 %v3920_v10, 0.0  ;;  %v1700_v39 = vmul.f32 0.6931472, %v2071_v34 }
 0x1ba   :  { %v681_v63 = vsel %vm4104_vm1, %v678_v6, %v675_v2  ;;  %2080 = vpow2.f32 %v1321_v14  ;;  %v655_v43 = vadd.f32 %v654_v13, %v640_v17  ;;  %v5043_v11 = vmax.f32 %v3933_v40, 0.0 }
 0x1bb   :  { %v1195_v31 = vadd.f32 %v1194_v0, %v5042_v7  ;;  %v5044_v49 = vand.u32 2147483647, %v4032_v29  ;;  %2082 = vpow2.f32 %v1323_v48  ;;  %v1706_v17 = vsel %vm4108_vm2, %v1703_v16, %v1700_v39 }
 0x1bc   :  { %v682_v4 = vadd.f32 %v681_v63, %v5043_v11  ;;  %v1327_v38 = vmul.f32 1.442695, %v1304_v27  ;;  %656 = vadd.xlane.f32.xlu0 %v655_v43  ;;  %v5046_v40 = vmax.f32 %v3945_v26, 0.0  ;;  %v1329_v3 = vmul.f32 1.442695, %v1305_v30 }
 0x1bd   :  { %v1310_v51 = vsub.f32 0.0, %v5044_v49  ;;  %v1196_v10 = vmul.f32 %v1195_v31, %v3976_v22  ;;  %2084 = vlog2.f32 %v1195_v31  ;;  %v1690_v22 = vld [vmem:[%s4755_s15] sm:$0x1]  ;;  %v5047_v20 = vand.u32 2147483647, %v4037_v32  ;;  %s2545_s15 = smov [#allocation19]  }
 0x1be   :  { %v683_v6 = vmul.f32 %v682_v4, %v4053_v1  ;;  %2086 = vlog2.f32 %v682_v4  ;;  %v1707_v15 = vadd.f32 %v1706_v17, %v5046_v40  ;;  %v1331_v24 = vmul.f32 1.442695, %v1306_v41  ;;  %v2073_v14 = vpop.eup %2072  ;;  %s1750_s13 = sshll.u32 %s2545_s15, 4  ;;  %s1751_s13 = int_to_ptr.vmem [resolvable:$true] %s1750_s13 }
 0x1bf   :  { %v1197_v23 = vadd.f32 %v1196_v10, %v1178_v50  ;;  %v1311_v18 = vsub.f32 0.0, %v5047_v20  ;;  %2088 = vpow2.f32 %v1325_v60  ;;  %v1333_v1 = vmul.f32 1.442695, %v1307_v12  ;;  %s2372_s14 = scalar_lea.vmem %s1751_s13, 16  ;;  %s2376_s3 = scalar_lea.vmem %s1751_s13, 32 }
 0x1c0   :  { %v684_v16 = vadd.f32 %v683_v6, %v665_v56  ;;  %v1708_v27 = vmul.f32 %v1707_v15, %v4065_v25  ;;  %2090 = vlog2.f32 %v1707_v15  ;;  %v5048_v30 = vand.u32 2147483647, %v4044_v9  ;;  %v4158_v54 = vpop.eup %2074  ;;  %p2373_p2 = scmp.ne.s32.totalorder %s1751_s13, %s2372_s14  ;;  %p2377_p3 = scmp.lt.s32.totalorder %s1751_s13, %s1751_s13 }
 0x1c1   :  { %v1199_v26 = vmul.f32 %v1197_v23, %v1197_v23  ;;  %1198 = vst [vmem:[#allocation22] sm:$0x1] %v1197_v23  ;;  %2092 = vpow2.f32 %v1327_v38  ;;  %v1335_v35 = vmul.f32 1.442695, %v1308_v36  ;;  %v1337_v41 = vmul.f32 1.442695, %v1309_v57  ;;  %v4160_v44 = vpop.eup %2076  ;;  %p2378_p4 = scmp.lt.s32.totalorder %s2376_s3, %s2372_s14 }
 0x1c2   :  { %v1312_v52 = vsub.f32 0.0, %v5048_v30  ;;  %v686_v48 = vmul.f32 %v684_v16, %v684_v16  ;;  %685 = vst [vmem:[#allocation19] sm:$0x1] %v684_v16  ;;  %v1709_v2 = vadd.f32 %v1708_v27, %v1690_v22  ;;  %2094 = vpow2.f32 %v1329_v3  ;;  %v4163_v34 = vpop.eup %2078 }
 0x1c3   :  { %v1201_v25 = vsub.f32 %v1199_v26, %v3982_v37  ;;  %2096 = vpow2.f32 %v1331_v24  ;;  %v1339_v12 = vmul.f32 1.442695, %v1310_v51  ;;  %v1348_v5 = vmul.f32 -0.5, %v2073_v14  ;;  %p2379_p5 = por %p2378_p4, %p2377_p3 }
 0x1c4   :  { %v688_v13 = vsub.f32 %v686_v48, %v4057_v28  ;;  %v1711_v0 = vmul.f32 %v1709_v2, %v1709_v2  ;;  %1710 = vst [vmem:[#allocation25] sm:$0x1] %v1709_v2  ;;  %2098 = vpow2.f32 %v1333_v1  ;;  %v1341_v36 = vmul.f32 1.442695, %v1311_v18  ;;  %v4166_v60 = vpop.eup %2080 }
 0x1c5   :  { %v1202_v7 = vmul.f32 0.5, %v1201_v25  ;;  %2100 = vpow2.f32 %v1335_v35  ;;  %v1343_v57 = vmul.f32 1.442695, %v1312_v52  ;;  %v1345_v31 = vadd.f32 1.0, %v2073_v14  ;;  %v4168_v63 = vpop.eup %2082  ;;  %p2380_p6 = pnand %p2379_p5, %p2373_p2 }
 0x1c6   :  { %v1713_v37 = vsub.f32 %v1711_v0, %v4070_v46  ;;  %2102 = vpow2.f32 %v1337_v41  ;;  %v1349_v39 = vadd.f32 1.0, %v1348_v5  ;;  %v1357_v43 = vmul.f32 -0.5, %v4158_v54 }
 0x1c7   :  { %v2085_v50 = vpop.eup %2084  ;;  %v689_v28 = vmul.f32 0.5, %v688_v13  ;;  %2104 = vpow2.f32 %v1339_v12  ;;  %v1351_v11 = vand.u32 2147483647, %v2073_v14  ;;  %v1354_v4 = vadd.f32 1.0, %v4158_v54 }
 0x1c8   :  { %v2087_v49 = vpop.eup %2086  ;;  %v1204_v51 = vmul.f32 0.6931472, %v2085_v50  ;;  %2106 = vpow2.f32 %v1341_v36  ;;  %v1358_v10 = vadd.f32 1.0, %v1357_v43  ;;  %v1363_v56 = vadd.f32 1.0, %v4160_v44 }
 0x1c9   :  { %v4174_v17 = vpop.eup %2088  ;;  %v691_v38 = vmul.f32 0.6931472, %v2087_v49  ;;  %v1714_v46 = vmul.f32 0.5, %v1713_v37  ;;  %2108 = vpow2.f32 %v1343_v57  ;;  %v1366_v6 = vmul.f32 -0.5, %v4160_v44  ;;  %v4435_v37 = vld [vmem:[#allocation17 + $0x18] sm:$0xff] }
 0x1ca   :  { %v2091_v40 = vpop.eup %2090  ;;  %v1205_v15 = vsub.f32 %v1202_v7, %v1204_v51  ;;  %2110 = vlog2.f32 %v1345_v31  ;;  %v4177_v3 = vmul.f32 %v2073_v14, %v1349_v39  ;;  %v1360_v23 = vand.u32 2147483647, %v4158_v54 }
 0x1cb   :  { %v4180_v22 = vpop.eup %2092  ;;  %v692_v20 = vsub.f32 %v689_v28, %v691_v38  ;;  %v1716_v18 = vmul.f32 0.6931472, %v2091_v40  ;;  %2112 = vlog2.f32 %v1354_v4  ;;  %v4183_v24 = vmul.f32 %v4158_v54, %v1358_v10 }
 0x1cc   :  { %v4185_v16 = vpop.eup %2094  ;;  %v1206_v27 = vsel %vm693_vm3, %v1205_v15, 0.0  ;;  %vm4188_vm4 = vcmp.lt.f32.partialorder %v1351_v11, 0.0004427343  ;;  %2114 = vlog2.f32 %v1363_v56  ;;  %v1369_v14 = vand.u32 2147483647, %v4160_v44 }
 0x1cd   :  { %v1372_v26 = vadd.f32 1.0, %v4163_v34  ;;  %v4194_v30 = vpop.eup %2096  ;;  %1207 = vadd.xlane.f32.xlu1 %v1206_v27  ;;  %v694_v52 = vsel %vm693_vm3, %v692_v20, 0.0  ;;  %v1717_v35 = vsub.f32 %v1714_v46, %v1716_v18  ;;  %v1367_v54 = vadd.f32 1.0, %v1366_v6 }
 0x1ce   :  { %v1375_v48 = vmul.f32 -0.5, %v4163_v34  ;;  %v4198_v2 = vpop.eup %2098  ;;  %695 = vadd.xlane.f32.xlu0 %v694_v52  ;;  %vm4200_vm5 = vcmp.lt.f32.partialorder %v1360_v23, 0.0004427343  ;;  %v1378_v25 = vand.u32 2147483647, %v4163_v34  ;;  %v1381_v12 = vadd.f32 1.0, %v4166_v60 }
 0x1cf   :  { %2116 = vlog2.f32 %v1372_v26  ;;  %v1384_v5 = vmul.f32 -0.5, %v4166_v60  ;;  %v4207_v13 = vpop.eup %2100  ;;  %v1718_v0 = vsel %vm693_vm3, %v1717_v35, 0.0  ;;  %v1387_v7 = vand.u32 2147483647, %v4166_v60 }
 0x1d0   :  { %v1376_v36 = vadd.f32 1.0, %v1375_v48  ;;  %v1390_v57 = vadd.f32 1.0, %v4168_v63  ;;  %v4212_v31 = vpop.eup %2102  ;;  %vm4214_vm6 = vcmp.lt.f32.partialorder %v1369_v14, 0.0004427343  ;;  %2118 = vlog2.f32 %v1381_v12 }
 0x1d1   :  { %v1385_v39 = vadd.f32 1.0, %v1384_v5  ;;  %v1393_v43 = vmul.f32 -0.5, %v4168_v63  ;;  %v4219_v50 = vpop.eup %2104  ;;  %1719 = vadd.xlane.f32.xlu1 %v1718_v0  ;;  %v4222_v28 = vmul.f32 %v4160_v44, %v1367_v54  ;;  %vm4224_vm7 = vcmp.lt.f32.partialorder %v1378_v25, 0.0004427343 }
 0x1d2   :  { %2120 = vlog2.f32 %v1390_v57  ;;  %v1396_v4 = vand.u32 2147483647, %v4168_v63  ;;  %v4229_v49 = vpop.eup %2106  ;;  %v4232_v51 = vmul.f32 %v4163_v34, %v1376_v36  ;;  %v1399_v56 = vadd.f32 1.0, %v4174_v17 }
 0x1d3   :  { %v1394_v10 = vadd.f32 1.0, %v1393_v43  ;;  %v1402_v38 = vmul.f32 -0.5, %v4174_v17  ;;  %v4236_v46 = vpop.eup %2108  ;;  %vm4238_vm8 = vcmp.lt.f32.partialorder %v1387_v7, 0.0004427343  ;;  %v1405_v6 = vand.u32 2147483647, %v4174_v17 }
 0x1d4   :  { %v1408_v40 = vadd.f32 1.0, %v4180_v22  ;;  %v1411_v15 = vmul.f32 -0.5, %v4180_v22  ;;  %v2111_v23 = vpop.eup %2110  ;;  %v4246_v34 = vmul.f32 %v4166_v60, %v1385_v39  ;;  %2122 = vlog2.f32 %v1399_v56 }
 0x1d5   :  { %v1403_v20 = vadd.f32 1.0, %v1402_v38  ;;  %v1414_v18 = vand.u32 2147483647, %v4180_v22  ;;  %v2113_v27 = vpop.eup %2112  ;;  %v4249_v14 = vmul.f32 0.6931472, %v2111_v23  ;;  %v4258_v48 = vmul.f32 %v4168_v63, %v1394_v10 }
 0x1d6   :  { %vm4251_vm9 = vcmp.lt.f32.partialorder %v1396_v4, 0.0004427343  ;;  %2124 = vlog2.f32 %v1408_v40  ;;  %v1412_v52 = vadd.f32 1.0, %v1411_v15  ;;  %v2115_v35 = vpop.eup %2114  ;;  %v4255_v54 = vmul.f32 0.6931472, %v2113_v27 }
 0x1d7   :  { %v4261_v60 = vmul.f32 %v4174_v17, %v1403_v20  ;;  %v1417_v25 = vadd.f32 1.0, %v4185_v16  ;;  %v4268_v5 = vmul.f32 0.6931472, %v2115_v35  ;;  %vm4270_vm10 = vcmp.lt.f32.partialorder %v1405_v6, 0.0004427343 }
 0x1d8   :  { %vm4274_vm11 = vcmp.lt.f32.partialorder %v1414_v18, 0.0004427343  ;;  %v1420_v63 = vmul.f32 -0.5, %v4185_v16  ;;  %v4280_v7 = vmul.f32 %v4180_v22, %v1412_v52  ;;  %v1423_v57 = vand.u32 2147483647, %v4185_v16 }
 0x1d9   :  { %v2117_v17 = vpop.eup %2116  ;;  %2126 = vlog2.f32 %v1417_v25  ;;  %v1426_v39 = vadd.f32 1.0, %v4194_v30  ;;  %v1429_v56 = vmul.f32 -0.5, %v4194_v30  ;;  %v1432_v6 = vand.u32 2147483647, %v4194_v30 }
 0x1da   :  { %v4288_v4 = vmul.f32 0.6931472, %v2117_v17  ;;  %v1421_v10 = vadd.f32 1.0, %v1420_v63  ;;  %v2119_v38 = vpop.eup %2118  ;;  %v1435_v40 = vadd.f32 1.0, %v4198_v2  ;;  %vm4303_vm12 = vcmp.lt.f32.partialorder %v1423_v57, 0.0004427343 }
 0x1db   :  { %2128 = vlog2.f32 %v1426_v39  ;;  %v4301_v20 = vmul.f32 0.6931472, %v2119_v38  ;;  %v1430_v27 = vadd.f32 1.0, %v1429_v56  ;;  %v1438_v25 = vmul.f32 -0.5, %v4198_v2 }
 0x1dc   :  { %v2121_v15 = vpop.eup %2120  ;;  %v4310_v35 = vmul.f32 %v4185_v16, %v1421_v10  ;;  %2130 = vlog2.f32 %v1435_v40  ;;  %vm4317_vm13 = vcmp.lt.f32.partialorder %v1432_v6, 0.0004427343  ;;  %v1441_v57 = vand.u32 2147483647, %v4198_v2 }
 0x1dd   :  { %v4307_v52 = vmul.f32 0.6931472, %v2121_v15  ;;  %v1444_v39 = vadd.f32 1.0, %v4207_v13  ;;  %v4324_v16 = vmul.f32 %v4194_v30, %v1430_v27  ;;  %v1439_v10 = vadd.f32 1.0, %v1438_v25 }
 0x1de   :  { %v2123_v56 = vpop.eup %2122  ;;  %v1447_v38 = vmul.f32 -0.5, %v4207_v13  ;;  %v1450_v40 = vand.u32 2147483647, %v4207_v13  ;;  %v1453_v23 = vadd.f32 1.0, %v4212_v31  ;;  %vm4338_vm14 = vcmp.lt.f32.partialorder %v1441_v57, 0.0004427343 }
 0x1df   :  { %v1398_v6 = vsel %vm4251_vm9, %v4258_v48, %v4307_v52  ;;  %v1401_v63 = vmul.f32 0.6931472, %v2123_v56  ;;  %2132 = vlog2.f32 %v1444_v39  ;;  %v4336_v30 = vmul.f32 %v4198_v2, %v1439_v10 }
 0x1e0   :  { %v2125_v15 = vpop.eup %2124  ;;  %v1448_v25 = vadd.f32 1.0, %v1447_v38  ;;  %vm4342_vm15 = vcmp.lt.f32.partialorder %v1450_v40, 0.0004427343  ;;  %2134 = vlog2.f32 %v1453_v23  ;;  %v1456_v26 = vmul.f32 -0.5, %v4212_v31 }
 0x1e1   :  { %v4333_v22 = vmul.f32 0.6931472, %v2125_v15  ;;  %v1459_v48 = vand.u32 2147483647, %v4212_v31  ;;  %v1407_v2 = vsel %vm4270_vm10, %v4261_v60, %v1401_v63  ;;  %v1462_v39 = vadd.f32 1.0, %v4219_v50 }
 0x1e2   :  { %v1465_v56 = vmul.f32 -0.5, %v4219_v50  ;;  %v1449_v23 = vmul.f32 %v4207_v13, %v1448_v25  ;;  %v1457_v38 = vadd.f32 1.0, %v1456_v26  ;;  %v1471_v40 = vadd.f32 1.0, %v4229_v49 }
 0x1e3   :  { %v2127_v52 = vpop.eup %2126  ;;  %v1416_v57 = vsel %vm4274_vm11, %v4280_v7, %v4333_v22  ;;  %2136 = vlog2.f32 %v1462_v39  ;;  %v1468_v60 = vand.u32 2147483647, %v4219_v50  ;;  %v1474_v0 = vmul.f32 -0.5, %v4229_v49 }
 0x1e4   :  { %v1419_v10 = vmul.f32 0.6931472, %v2127_v52  ;;  %v1466_v12 = vadd.f32 1.0, %v1465_v56  ;;  %vm4364_vm0 = vcmp.lt.f32.partialorder %v1459_v48, 0.0004427343  ;;  %2138 = vlog2.f32 %v1471_v40 }
 0x1e5   :  { %v2129_v15 = vpop.eup %2128  ;;  %v1458_v63 = vmul.f32 %v4212_v31, %v1457_v38  ;;  %v1475_v26 = vadd.f32 1.0, %v1474_v0  ;;  %v1477_v52 = vand.u32 2147483647, %v4229_v49  ;;  %vm4373_vm1 = vcmp.lt.f32.partialorder %v1468_v60, 0.0004427343 }
 0x1e6   :  { %v1425_v36 = vsel %vm4303_vm12, %v4310_v35, %v1419_v10  ;;  %v1428_v7 = vmul.f32 0.6931472, %v2129_v15  ;;  %v2131_v13 = vpop.eup %2130  ;;  %v4370_v25 = vmul.f32 %v4219_v50, %v1466_v12  ;;  %v1480_v18 = vadd.f32 1.0, %v4236_v46 }
 0x1e7   :  { %v1437_v39 = vmul.f32 0.6931472, %v2131_v13  ;;  %v1483_v35 = vmul.f32 -0.5, %v4236_v46  ;;  %v4383_v31 = vmul.f32 %v4229_v49, %v1475_v26  ;;  %vm4385_vm2 = vcmp.lt.f32.partialorder %v1477_v52, 0.0004427343  ;;  %v4461_v26 = vld [vmem:[#allocation17 + $0x20] sm:$0xff] }
 0x1e8   :  { %v1434_v48 = vsel %vm4317_vm13, %v4324_v16, %v1428_v7  ;;  %v1486_v12 = vand.u32 2147483647, %v4236_v46  ;;  %2140 = vlog2.f32 %v1480_v18  ;;  %v5079_v15 = vmax.f32 %v3985_v45, 0.0  ;;  %v4402_v16 = vld [vmem:[#allocation17] sm:$0xff]  ;;  %v4463_v52 = vld [vmem:[#allocation17 + $0x28] sm:$0xff] }
 0x1e9   :  { %v2133_v10 = vpop.eup %2132  ;;  %v1443_v38 = vsel %vm4338_vm14, %v4336_v30, %v1437_v39  ;;  %v1484_v40 = vadd.f32 1.0, %v1483_v35  ;;  %v5080_v49 = vsel %vm4188_vm4, %v4177_v3, %v4249_v14  ;;  %v5081_v0 = vmax.f32 %v3987_v53, 0.0  ;;  %v4475_v39 = vld [vmem:[#allocation17 + $0x30] sm:$0xff] }
 0x1ea   :  { %v4400_v17 = vadd.f32 %v5080_v49, %v5079_v15  ;;  %v1446_v60 = vmul.f32 0.6931472, %v2133_v10  ;;  %v5082_v30 = vsel %vm4200_vm5, %v4183_v24, %v4255_v54  ;;  %v5083_v45 = vmax.f32 %v3991_v47, 0.0  ;;  %v2135_v24 = vpop.eup %2134  ;;  %v4431_v54 = vld [vmem:[#allocation17 + $0x8] sm:$0xff]  ;;  %v4433_v47 = vld [vmem:[#allocation17 + $0x10] sm:$0xff]  ;;  %v1217_v15 = vld [vmem:[#allocation14] sm:$0xff] }
 0x1eb   :  { %v4411_v27 = vadd.f32 %v5082_v30, %v5081_v0  ;;  %v5084_v3 = vsel %vm4214_vm6, %v4222_v28, %v4268_v5  ;;  %v5085_v14 = vmax.f32 %v3993_v33, 0.0  ;;  %v5086_v53 = vsel %vm4224_vm7, %v4232_v51, %v4288_v4  ;;  %v4497_v10 = vld [vmem:[#allocation17 + $0x50] sm:$0xff]  ;;  %v1218_v49 = vld [vmem:[#allocation14 + $0x8] sm:$0xff] }
 0x1ec   :  { %v4420_v1 = vadd.f32 %v5084_v3, %v5083_v45  ;;  %v4438_v28 = vmul.f32 %v4236_v46, %v1484_v40  ;;  %vm4440_vm3 = vcmp.lt.f32.partialorder %v1486_v12, 0.0004427343  ;;  %v5089_v33 = vmax.f32 %v3995_v62, 0.0  ;;  %v4495_v12 = vld [vmem:[#allocation17 + $0x48] sm:$0xff]  ;;  %5103 = vst [vmem:[#allocation46_spill] sm:$0xff] %v4497_v10  ;;  %v4499_v40 = vld [vmem:[#allocation17 + $0x58] sm:$0xff] }
 0x1ed   :  { %v4429_v41 = vadd.f32 %v5086_v53, %v5085_v14  ;;  %v5090_v11 = vsel %vm4238_vm8, %v4246_v34, %v4301_v20  ;;  %v5091_v4 = vmax.f32 %v4000_v61, 0.0  ;;  %v5092_v46 = vmax.f32 %v4004_v55, 0.0  ;;  %v4477_v55 = vld [vmem:[#allocation17 + $0x38] sm:$0xff]  ;;  %5102 = vst [vmem:[#allocation45_spill] sm:$0xff] %v4495_v12  ;;  %5104 = vst [vmem:[#allocation47_spill] sm:$0xff] %v4499_v40  ;;  %v1219_v3 = vld [vmem:[#allocation14 + $0x10] sm:$0xff] }
 0x1ee   :  { %v4451_v51 = vadd.f32 %v5090_v11, %v5089_v33  ;;  %v1452_v62 = vsel %vm4342_vm15, %v1449_v23, %v1446_v60  ;;  %v1455_v44 = vmul.f32 0.6931472, %v2135_v24  ;;  %v5093_v34 = vmax.f32 %v4006_v21, 0.0  ;;  %v4509_v60 = vld [vmem:[#allocation17 + $0x60] sm:$0xff]  ;;  %v1220_v14 = vld [vmem:[#allocation14 + $0x18] sm:$0xff] }
 0x1ef   :  { %v4455_v7 = vadd.f32 %v1398_v6, %v5091_v4  ;;  %v4459_v13 = vadd.f32 %v1407_v2, %v5092_v46  ;;  %v5094_v61 = vmax.f32 %v4011_v8, 0.0  ;;  %v4479_v2 = vld [vmem:[#allocation17 + $0x40] sm:$0xff]  ;;  %v5096_v18 = vmax.f32 %v4013_v42, 0.0  ;;  %5105 = vst [vmem:[#allocation49_spill] sm:$0xff] %v4509_v60  ;;  %v1222_v4 = vld [vmem:[#allocation14 + $0x28] sm:$0xff]  ;;  %v1223_v46 = vld [vmem:[#allocation14 + $0x30] sm:$0xff] }
 0x1f0   :  { %v4469_v20 = vadd.f32 %v1416_v57, %v5093_v34  ;;  %5095 = vst [vmem:[#allocation41_spill] sm:$0xff] %v4479_v2  ;;  %v5098_v43 = vmax.f32 %v4019_v19, 0.0  ;;  %v5100_v21 = vmax.f32 %v4021_v58, 0.0  ;;  %v1505_v8 = vmul.f32 %v4400_v17, %v4402_v16  ;;  %v1221_v53 = vld [vmem:[#allocation14 + $0x20] sm:$0xff] }
 0x1f1   :  { %v4473_v6 = vadd.f32 %v1425_v36, %v5094_v61  ;;  %v4483_v35 = vadd.f32 %v1434_v48, %v5096_v18  ;;  %v2137_v36 = vpop.eup %2136  ;;  %v1461_v42 = vsel %vm4364_vm0, %v1458_v63, %v1455_v44  ;;  %v1506_v19 = vmul.f32 %v4411_v27, %v4431_v54 }
 0x1f2   :  { %v4487_v23 = vadd.f32 %v1443_v38, %v5098_v43  ;;  %v4491_v57 = vadd.f32 %v1452_v62, %v5100_v21  ;;  %v1507_v58 = vmul.f32 %v4420_v1, %v4433_v47  ;;  %v1508_v48 = vmul.f32 %v4429_v41, %v4435_v37  ;;  %v2139_v38 = vpop.eup %2138  ;;  %v4525_v62 = vld [vmem:[#allocation17 + $0x68] sm:$0xff]  ;;  %v1224_v43 = vld [vmem:[#allocation14 + $0x38] sm:$0xff]  ;;  %v1225_v21 = vld [vmem:[#allocation14 + $0x40] sm:$0xff] }
 0x1f3   :  { %5097 = vst [vmem:[#allocation42_spill] sm:$0xff] %v4483_v35  ;;  %v1464_v0 = vmul.f32 0.6931472, %v2137_v36  ;;  %v5106_v30 = vmax.f32 %v4026_v59, 0.0  ;;  %v1509_v22 = vmul.f32 %v4451_v51, %v4461_v26  ;;  %v1510_v63 = vmul.f32 %v4455_v7, %v4463_v52  ;;  %v4536_v36 = vld [vmem:[#allocation17 + $0x70] sm:$0xff] }
 0x1f4   :  { %5099 = vst [vmem:[#allocation43_spill] sm:$0xff] %v4487_v23  ;;  %5101 = vst [vmem:[#allocation44_spill] sm:$0xff] %v4491_v57  ;;  %v1473_v24 = vmul.f32 0.6931472, %v2139_v38  ;;  %v1511_v33 = vmul.f32 %v4459_v13, %v4475_v39  ;;  %v1512_v11 = vmul.f32 %v4469_v20, %v4477_v55  ;;  %v1513_v59 = vmul.f32 %v4473_v6, %v4479_v2 }
 0x1f5   :  { %v4513_v45 = vadd.f32 %v1461_v42, %v5106_v30  ;;  %v1470_v44 = vsel %vm4373_vm1, %v4370_v25, %v1464_v0  ;;  %v1514_v34 = vmul.f32 %v4483_v35, %v4495_v12  ;;  %v1515_v61 = vmul.f32 %v4487_v23, %v4497_v10  ;;  %v2141_v30 = vpop.eup %2140  ;;  %v1226_v10 = vld [vmem:[#allocation14 + $0x48] sm:$0xff]  ;;  %v1227_v23 = vld [vmem:[#allocation14 + $0x50] sm:$0xff] }
 0x1f6   :  { %v1516_v18 = vmul.f32 %v4491_v57, %v4499_v40  ;;  %v1479_v42 = vsel %vm4385_vm2, %v4383_v31, %v1473_v24  ;;  %v5108_v56 = vmax.f32 %v4032_v29, 0.0  ;;  %v1521_v0 = vadd.f32 %v1505_v8, %v1217_v15  ;;  %v1228_v40 = vld [vmem:[#allocation14 + $0x58] sm:$0xff]  ;;  %v1229_v31 = vld [vmem:[#allocation14 + $0x60] sm:$0xff]  ;;  %v1230_v24 = vld [vmem:[#allocation14 + $0x68] sm:$0xff] }
 0x1f7   :  { %5107 = vst [vmem:[#allocation50_spill] sm:$0xff] %v4513_v45  ;;  %v1517_v38 = vmul.f32 %v4513_v45, %v4509_v60  ;;  %v5109_v57 = vmax.f32 %v4037_v32, 0.0  ;;  %v1522_v2 = vadd.f32 %v1506_v19, %v1218_v49  ;;  %v1523_v35 = vadd.f32 %v1507_v58, %v1219_v3  ;;  %v1231_v29 = vld [vmem:[#allocation14 + $0x70] sm:$0xff]  ;;  %v4555_v19 = vld [vmem:[#allocation17 + $0x78] sm:$0xff] }
 0x1f8   :  { %v4543_v25 = vadd.f32 %v1470_v44, %v5108_v56  ;;  %v1524_v50 = vadd.f32 %v1508_v48, %v1220_v14  ;;  %v1482_v44 = vmul.f32 0.6931472, %v2141_v30  ;;  %v1525_v60 = vadd.f32 %v1509_v22, %v1221_v53  ;;  %1537 = vst [vmem:[#allocation24] sm:$0xff] %v1521_v0 }
 0x1f9   :  { %v4549_v12 = vadd.f32 %v1479_v42, %v5109_v57  ;;  %v1526_v8 = vadd.f32 %v1510_v63, %v1222_v4  ;;  %v1527_v45 = vadd.f32 %v1511_v33, %v1223_v46  ;;  %v1528_v32 = vadd.f32 %v1512_v11, %v1224_v43  ;;  %1538 = vst [vmem:[#allocation24 + $0x8] sm:$0xff] %v1522_v2 }
 0x1fa   :  { %v1518_v56 = vmul.f32 %v4543_v25, %v4525_v62  ;;  %v1529_v57 = vadd.f32 %v1513_v59, %v1225_v21  ;;  %1539 = vst [vmem:[#allocation24 + $0x10] sm:$0xff] %v1523_v35  ;;  %1540 = vst [vmem:[#allocation24 + $0x18] sm:$0xff] %v1524_v50  ;;  %v1488_v58 = vsel %vm4440_vm3, %v4438_v28, %v1482_v44  ;;  %v5110_v63 = vmax.f32 %v4044_v9, 0.0  ;;  %v1232_v28 = vld [vmem:[#allocation14 + $0x78] sm:$0xff]  ;;  %v5111_v21 = vld [vmem:[#allocation42_spill] sm:$0xff] }
 0x1fb   :  { %v1519_v15 = vmul.f32 %v4549_v12, %v4536_v36  ;;  %v1530_v48 = vadd.f32 %v1514_v34, %v1226_v10  ;;  %v4560_v49 = vadd.f32 %v1515_v61, %v1227_v23  ;;  %v4562_v22 = vadd.f32 %v1516_v18, %v1228_v40  ;;  %1541 = vst [vmem:[#allocation24 + $0x20] sm:$0xff] %v1525_v60  ;;  %v5114_v44 = vld [vmem:[#allocation43_spill] sm:$0xff] }
 0x1fc   :  { %1542 = vst [vmem:[#allocation24 + $0x28] sm:$0xff] %v1526_v8  ;;  %v4566_v3 = vadd.f32 %v1488_v58, %v5110_v63  ;;  %v4568_v14 = vadd.f32 %v1517_v38, %v1229_v31  ;;  %v4570_v53 = vadd.f32 %v1518_v56, %v1230_v24  ;;  %1543 = vst [vmem:[#allocation24 + $0x30] sm:$0xff] %v1527_v45  ;;  %2142 = vlog2.f32 %v4400_v17  ;;  %v5112_v38 = vld [vmem:[#allocation41_spill] sm:$0xff] }
 0x1fd   :  { %v4572_v33 = vadd.f32 %v1519_v15, %v1231_v29  ;;  %1544 = vst [vmem:[#allocation24 + $0x38] sm:$0xff] %v1528_v32  ;;  %1545 = vst [vmem:[#allocation24 + $0x40] sm:$0xff] %v1529_v57  ;;  %v1553_v23 = vmul.f32 %v1521_v0, %v1521_v0  ;;  %v1569_v10 = vmul.f32 %v4402_v16, %v4402_v16  ;;  %2144 = vlog2.f32 %v4411_v27  ;;  %v5113_v24 = vld [vmem:[#allocation45_spill] sm:$0xff] }
 0x1fe   :  { %1546 = vst [vmem:[#allocation24 + $0x48] sm:$0xff] %v1530_v48  ;;  %1547 = vst [vmem:[#allocation24 + $0x50] sm:$0xff] %v4560_v49  ;;  %v1520_v9 = vmul.f32 %v4566_v3, %v4555_v19  ;;  %v1554_v40 = vmul.f32 %v1522_v2, %v1522_v2  ;;  %v1570_v11 = vmul.f32 %v4431_v54, %v4431_v54  ;;  %2146 = vlog2.f32 %v4420_v1 }
 0x1ff   :  { %1548 = vst [vmem:[#allocation24 + $0x58] sm:$0xff] %v4562_v22  ;;  %1549 = vst [vmem:[#allocation24 + $0x60] sm:$0xff] %v4568_v14  ;;  %v1555_v59 = vmul.f32 %v1523_v35, %v1523_v35  ;;  %v1571_v4 = vmul.f32 %v4433_v47, %v4433_v47  ;;  %2148 = vlog2.f32 %v4429_v41  ;;  %v1556_v46 = vmul.f32 %v1524_v50, %v1524_v50 }
 0x200   :  { %1550 = vst [vmem:[#allocation24 + $0x68] sm:$0xff] %v4570_v53  ;;  %1551 = vst [vmem:[#allocation24 + $0x70] sm:$0xff] %v4572_v33  ;;  %v4581_v5 = vadd.f32 %v1520_v9, %v1232_v28  ;;  %v1572_v17 = vmul.f32 %v4435_v37, %v4435_v37  ;;  %2150 = vlog2.f32 %v4451_v51  ;;  %v1585_v16 = vsub.f32 %v1553_v23, %v1569_v10  ;;  %v5115_v28 = vld [vmem:[#allocation44_spill] sm:$0xff] }
 0x201   :  { %2152 = vlog2.f32 %v4455_v7  ;;  %v1557_v27 = vmul.f32 %v1525_v60, %v1525_v60  ;;  %v1573_v54 = vmul.f32 %v4461_v26, %v4461_v26  ;;  %v1586_v1 = vsub.f32 %v1554_v40, %v1570_v11 }
 0x202   :  { %1552 = vst [vmem:[#allocation24 + $0x78] sm:$0xff] %v4581_v5  ;;  %2154 = vlog2.f32 %v4459_v13  ;;  %v1587_v2 = vsub.f32 %v1555_v59, %v1571_v4  ;;  %v1558_v41 = vmul.f32 %v1526_v8, %v1526_v8  ;;  %v1559_v47 = vmul.f32 %v1527_v45, %v1527_v45 }
 0x203   :  { %2156 = vlog2.f32 %v4469_v20  ;;  %v1574_v37 = vmul.f32 %v4463_v52, %v4463_v52  ;;  %v1588_v35 = vsub.f32 %v1556_v46, %v1572_v17  ;;  %v1560_v51 = vmul.f32 %v1528_v32, %v1528_v32  ;;  %v5116_v17 = vld [vmem:[#allocation46_spill] sm:$0xff] }
 0x204   :  { %v1561_v34 = vmul.f32 %v1529_v57, %v1529_v57  ;;  %v1601_v61 = vmul.f32 0.5, %v1585_v16  ;;  %2158 = vlog2.f32 %v4473_v6  ;;  %v4605_v60 = vmul.f32 %v1530_v48, %v1530_v48 }
 0x205   :  { %v1575_v13 = vmul.f32 %v4475_v39, %v4475_v39  ;;  %v1589_v26 = vsub.f32 %v1557_v27, %v1573_v54  ;;  %v1602_v18 = vmul.f32 0.5, %v1586_v1  ;;  %v1576_v45 = vmul.f32 %v4477_v55, %v4477_v55  ;;  %v5117_v54 = vld [vmem:[#allocation50_spill] sm:$0xff] }
 0x206   :  { %v2143_v7 = vpop.eup %2142  ;;  %v1603_v43 = vmul.f32 0.5, %v1587_v2  ;;  %2160 = vlog2.f32 %v5111_v21  ;;  %v1577_v6 = vmul.f32 %v5112_v38, %v5112_v38  ;;  %v1590_v0 = vsub.f32 %v1558_v41, %v1574_v37 }
 0x207   :  { %v2145_v20 = vpop.eup %2144  ;;  %v1618_v52 = vmul.f32 0.6931472, %v2143_v7  ;;  %v1604_v30 = vmul.f32 0.5, %v1588_v35  ;;  %v1578_v39 = vmul.f32 %v5113_v24, %v5113_v24  ;;  %2162 = vlog2.f32 %v5114_v44 }
 0x208   :  { %v2147_v42 = vpop.eup %2146  ;;  %v1620_v50 = vmul.f32 0.6931472, %v2145_v20  ;;  %v1591_v8 = vsub.f32 %v1559_v47, %v1575_v13  ;;  %v1605_v15 = vmul.f32 0.5, %v1589_v26  ;;  %v1592_v48 = vsub.f32 %v1560_v51, %v1576_v45  ;;  %v5118_v51 = vld [vmem:[#allocation47_spill] sm:$0xff]  ;;  %v5119_v45 = vld [vmem:[#allocation49_spill] sm:$0xff] }
 0x209   :  { %v2149_v31 = vpop.eup %2148  ;;  %v1622_v29 = vmul.f32 0.6931472, %v2147_v42  ;;  %v1649_v56 = vsub.f32 %v1601_v61, %v1618_v52  ;;  %2164 = vlog2.f32 %v5115_v28  ;;  %v1606_v10 = vmul.f32 0.5, %v1590_v0 }
 0x20a   :  { %v2151_v55 = vpop.eup %2150  ;;  %v1624_v32 = vmul.f32 0.6931472, %v2149_v31  ;;  %v1650_v57 = vsub.f32 %v1602_v18, %v1620_v50  ;;  %v1563_v46 = vmul.f32 %v4560_v49, %v4560_v49  ;;  %v1579_v16 = vmul.f32 %v5116_v17, %v5116_v17 }
 0x20b   :  { %v2153_v58 = vpop.eup %2152  ;;  %v1626_v63 = vmul.f32 0.6931472, %v2151_v55  ;;  %v1651_v9 = vsub.f32 %v1603_v43, %v1622_v29  ;;  %v1593_v27 = vsub.f32 %v1561_v34, %v1577_v6  ;;  %2166 = vlog2.f32 %v5117_v54 }
 0x20c   :  { %v2155_v23 = vpop.eup %2154  ;;  %v1628_v40 = vmul.f32 0.6931472, %v2153_v58  ;;  %v1652_v11 = vsub.f32 %v1604_v30, %v1624_v32  ;;  %v1665_v59 = vadd.f32 %v1650_v57, %v1649_v56  ;;  %v1607_v1 = vmul.f32 0.5, %v1591_v8 }
 0x20d   :  { %v2157_v4 = vpop.eup %2156  ;;  %v1630_v2 = vmul.f32 0.6931472, %v2155_v23  ;;  %v1653_v41 = vsub.f32 %v1605_v15, %v1626_v63  ;;  %v1564_v35 = vmul.f32 %v4562_v22, %v4562_v22  ;;  %v1580_v61 = vmul.f32 %v5118_v51, %v5118_v51 }
 0x20e   :  { %v1666_v47 = vadd.f32 %v1665_v59, %v1651_v9  ;;  %v2159_v37 = vpop.eup %2158  ;;  %v1594_v7 = vsub.f32 %v4605_v60, %v1578_v39  ;;  %2168 = vlog2.f32 %v4543_v25  ;;  %v1608_v49 = vmul.f32 0.5, %v1592_v48 }
 0x20f   :  { %v1632_v13 = vmul.f32 0.6931472, %v2157_v4  ;;  %v1654_v34 = vsub.f32 %v1606_v10, %v1628_v40  ;;  %v1565_v20 = vmul.f32 %v4568_v14, %v4568_v14  ;;  %v1581_v43 = vmul.f32 %v5119_v45, %v5119_v45 }
 0x210   :  { %v1667_v26 = vadd.f32 %v1666_v47, %v1652_v11  ;;  %v2161_v18 = vpop.eup %2160  ;;  %v1595_v52 = vsub.f32 %v1563_v46, %v1579_v16  ;;  %2170 = vlog2.f32 %v4549_v12  ;;  %v1609_v22 = vmul.f32 0.5, %v1593_v27 }
 0x211   :  { %v1634_v21 = vmul.f32 0.6931472, %v2159_v37  ;;  %v1655_v42 = vsub.f32 %v1607_v1, %v1630_v2  ;;  %v2163_v38 = vpop.eup %2162  ;;  %v1566_v25 = vmul.f32 %v4570_v53, %v4570_v53  ;;  %v1582_v6 = vmul.f32 %v4525_v62, %v4525_v62 }
 0x212   :  { %v1668_v60 = vadd.f32 %v1667_v26, %v1653_v41  ;;  %v1596_v0 = vsub.f32 %v1564_v35, %v1580_v61  ;;  %2172 = vlog2.f32 %v4566_v3  ;;  %v1610_v14 = vmul.f32 0.5, %v1594_v7  ;;  %v1169_v26 = vpop.xlane.xlu1 %1168 }
 0x213   :  { %v1636_v30 = vmul.f32 0.6931472, %v2161_v18  ;;  %v1656_v50 = vsub.f32 %v1608_v49, %v1632_v13  ;;  %v2165_v24 = vpop.eup %2164  ;;  %v1567_v12 = vmul.f32 %v4572_v33, %v4572_v33  ;;  %v1583_v39 = vmul.f32 %v4536_v36, %v4536_v36 }
 0x214   :  { %v1669_v31 = vadd.f32 %v1668_v60, %v1654_v34  ;;  %v1597_v29 = vsub.f32 %v1565_v20, %v1581_v43  ;;  %v1611_v44 = vmul.f32 0.5, %v1595_v52  ;;  %v1638_v53 = vmul.f32 0.6931472, %v2163_v38 }
 0x215   :  { %v1657_v56 = vsub.f32 %v1609_v22, %v1634_v21  ;;  %v2167_v62 = vpop.eup %2166  ;;  %v1568_v3 = vmul.f32 %v4581_v5, %v4581_v5  ;;  %v1584_v8 = vmul.f32 %v4555_v19, %v4555_v19  ;;  %v1598_v15 = vsub.f32 %v1566_v25, %v1582_v6 }
 0x216   :  { %v1670_v55 = vadd.f32 %v1669_v31, %v1655_v42  ;;  %v1612_v32 = vmul.f32 0.5, %v1596_v0  ;;  %v1640_v57 = vmul.f32 0.6931472, %v2165_v24  ;;  %v1658_v58 = vsub.f32 %v1610_v14, %v1636_v30 }
 0x217   :  { %v1599_v63 = vsub.f32 %v1567_v12, %v1583_v39  ;;  %v1613_v36 = vmul.f32 0.5, %v1597_v29  ;;  %v1642_v28 = vmul.f32 0.6931472, %v2167_v62  ;;  %v1659_v9 = vsub.f32 %v1611_v44, %v1638_v53 }
 0x218   :  { %v1671_v33 = vadd.f32 %v1670_v55, %v1656_v50  ;;  %v2169_v48 = vpop.eup %2168  ;;  %v1600_v40 = vsub.f32 %v1568_v3, %v1584_v8  ;;  %v1614_v11 = vmul.f32 0.5, %v1598_v15  ;;  %v1660_v4 = vsub.f32 %v1612_v32, %v1640_v57 }
 0x219   :  { %v1644_v59 = vmul.f32 0.6931472, %v2169_v48  ;;  %v1615_v17 = vmul.f32 0.5, %v1599_v63  ;;  %v1661_v16 = vsub.f32 %v1613_v36, %v1642_v28  ;;  %v1170_v45 = vrot.slane %v1169_v26, 4 }
 0x21a   :  { %v1672_v23 = vadd.f32 %v1671_v33, %v1657_v56  ;;  %v2171_v10 = vpop.eup %2170  ;;  %v1616_v54 = vmul.f32 0.5, %v1600_v40 }
 0x21b   :  { %v1646_v19 = vmul.f32 0.6931472, %v2171_v10  ;;  %v1662_v2 = vsub.f32 %v1614_v11, %v1644_v59  ;;  %v1171_v22 = vadd.f32 %v1170_v45, %v1169_v26 }
 0x21c   :  { %v1673_v5 = vadd.f32 %v1672_v23, %v1658_v58  ;;  %v2173_v46 = vpop.eup %2172 }
 0x21d   :  { %v1648_v1 = vmul.f32 0.6931472, %v2173_v46  ;;  %v1663_v47 = vsub.f32 %v1615_v17, %v1646_v19  ;;  %v1172_v42 = vrot.slane %v1171_v22, 2 }
 0x21e   :  { %v1674_v27 = vadd.f32 %v1673_v5, %v1659_v9 }
 0x21f   :  { %v1664_v35 = vsub.f32 %v1616_v54, %v1648_v1  ;;  %v1173_v30 = vadd.f32 %v1172_v42, %v1171_v22 }
 0x220   :  { %v1675_v41 = vadd.f32 %v1674_v27, %v1660_v4 }
 0x221   :  { %v1174_v12 = vrot.slane %v1173_v30, 1 }
 0x222   :  { %v1676_v37 = vadd.f32 %v1675_v41, %v1661_v16 }
 0x223   :  { %v1175_v56 = vadd.f32 %v1174_v12, %v1173_v30 }
 0x224   :  { %v1677_v51 = vadd.f32 %v1676_v37, %v1662_v2 }
 0x226   :  { %v1678_v61 = vadd.f32 %v1677_v51, %v1663_v47 }
 0x228   :  { %v1679_v7 = vadd.f32 %v1678_v61, %v1664_v35 }
 0x22a   :  { %1680 = vadd.xlane.f32.xlu0 %v1679_v7 }
 0x249   :  { %v657_v49 = vpop.xlane.xlu0 %656 }
 0x24a   :  { %v658_v13 = vrot.slane %v657_v49, 4 }
 0x24c   :  { %v659_v34 = vadd.f32 %v658_v13, %v657_v49 }
 0x24e   :  { %v660_v18 = vrot.slane %v659_v34, 2 }
 0x250   :  { %v661_v20 = vadd.f32 %v660_v18, %v659_v34 }
 0x252   :  { %v662_v43 = vrot.slane %v661_v20, 1 }
 0x254   :  { %v663_v52 = vadd.f32 %v662_v43, %v661_v20 }
 0x256   :  { %1838 = vpush %v663_v52 }
 0x25a   :  { %v1208_v21 = vpop.xlane.xlu1 %1207 }
 0x25b   :  { %v1209_v60 = vrot.slane %v1208_v21, 4  ;;  %v696_v38 = vpop.xlane.xlu0 %695 }
 0x25c   :  { %v697_v25 = vrot.slane %v696_v38, 4 }
 0x25d   :  { %v1210_v6 = vadd.f32 %v1209_v60, %v1208_v21 }
 0x25e   :  { %v698_v0 = vadd.f32 %v697_v25, %v696_v38 }
 0x25f   :  { %v1211_v14 = vrot.slane %v1210_v6, 2 }
 0x260   :  { %v699_v50 = vrot.slane %v698_v0, 2 }
 0x261   :  { %v1212_v31 = vadd.f32 %v1211_v14, %v1210_v6 }
 0x262   :  { %v700_v24 = vadd.f32 %v699_v50, %v698_v0 }
 0x263   :  { %v1213_v39 = vrot.slane %v1212_v31, 1 }
 0x264   :  { %v701_v29 = vrot.slane %v700_v24, 1 }
 0x265   :  { %v1214_v53 = vadd.f32 %v1213_v39, %v1212_v31 }
 0x266   :  { %v702_v44 = vadd.f32 %v701_v29, %v700_v24 }
 0x268   :  { %1840 = vpush %v702_v44 }
 0x269   :  { %1842 = vpush %v1175_v56 }
 0x26a   :  { %1844 = vpush %v1214_v53 }
 0x26b   :  { %2383 = shalt.err (!%p2380_p6)
}
 0x26c   :  { %s2384_s26 = scalar_lea.hbm %s4759_s19, 16 }
 0x26d   :  { %p2385_p7 = scmp.ne.s32.totalorder %s4759_s19, %s2384_s26  ;;  %p2388_p8 = scmp.lt.u32.totalorder %s2384_s26, %s4759_s19 }
 0x26f   :  { %p2390_p9 = pnand %p2388_p8, %p2385_p7 }
 0x271   :  { %2393 = shalt.err (!%p2390_p9)
}
 0x272   :  { %1753 = dma.vmem_to_hbm [thread:$0]  %s1751_s13, 16, %s4759_s19, [#allocation20]  }
 0x273   :  { %s2394_s22 = scalar_lea.vmem %s1773_s2, 16  ;;  %s2398_s23 = scalar_lea.vmem %s1773_s2, 32 }
 0x274   :  { %p2395_p10 = scmp.ne.s32.totalorder %s1773_s2, %s2394_s22  ;;  %p2399_p11 = scmp.lt.s32.totalorder %s1773_s2, %s1773_s2 }
 0x275   :  { %p2400_p12 = scmp.lt.s32.totalorder %s2398_s23, %s2394_s22 }
 0x277   :  { %p2401_p13 = por %p2400_p12, %p2399_p11 }
 0x279   :  { %p2402_p0 = pnand %p2401_p13, %p2395_p10 }
 0x27b   :  { %2405 = shalt.err (!%p2402_p0)
}
 0x27c   :  { %s2406_s25 = scalar_lea.hbm %s4761_s21, 16 }
 0x27d   :  { %p2407_p1 = scmp.ne.s32.totalorder %s4761_s21, %s2406_s25  ;;  %p2410_p2 = scmp.lt.u32.totalorder %s2406_s25, %s4761_s21 }
 0x27f   :  { %p2412_p3 = pnand %p2410_p2, %p2407_p1 }
 0x281   :  { %2415 = shalt.err (!%p2412_p3)
}
 0x282   :  { %1775 = dma.vmem_to_hbm [thread:$0]  %s1773_s2, 16, %s4761_s21, [#allocation23]  }
 0x283   :  { %s2547_s15 = smov [#allocation18]   ;;  %s2548_s12 = smov [#allocation21]  }
 0x284   :  { %s1737_s13 = sshll.u32 %s2547_s15, 4  ;;  %s1759_s14 = sshll.u32 %s2548_s12, 4  ;;  %s1738_s13 = int_to_ptr.vmem [resolvable:$true] %s1737_s13  ;;  %s1760_s14 = int_to_ptr.vmem [resolvable:$true] %s1759_s14 }
 0x285   :  { %s2416_s3 = scalar_lea.vmem %s1738_s13, 2048  ;;  %p2421_p5 = scmp.lt.s32.totalorder %s1738_s13, %s1738_s13 }
 0x286   :  { %p2417_p4 = scmp.ne.s32.totalorder %s1738_s13, %s2416_s3  ;;  %p2422_p6 = scmp.lt.s32.totalorder %s2416_s3, %s2416_s3 }
 0x288   :  { %p2423_p7 = por %p2422_p6, %p2421_p5 }
 0x28a   :  { %p2424_p8 = pnand %p2423_p7, %p2417_p4 }
 0x28c   :  { %2427 = shalt.err (!%p2424_p8)
}
 0x28d   :  { %s2428_s26 = scalar_lea.hbm %s4758_s18, 2048 }
 0x28e   :  { %p2429_p9 = scmp.ne.s32.totalorder %s4758_s18, %s2428_s26  ;;  %p2432_p10 = scmp.lt.u32.totalorder %s2428_s26, %s4758_s18 }
 0x290   :  { %p2434_p11 = pnand %p2432_p10, %p2429_p9 }
 0x292   :  { %2437 = shalt.err (!%p2434_p11)
}
 0x293   :  { %1743 = dma.vmem_to_hbm [thread:$0]  %s1738_s13, 2048, %s4758_s18, [#allocation4], %s2536_s4, %s2536_s4, %s2537_s1  }
 0x294   :  { %s2438_s11 = scalar_lea.vmem %s1760_s14, 2048  ;;  %p2443_p13 = scmp.lt.s32.totalorder %s1760_s14, %s1760_s14 }
 0x295   :  { %p2439_p12 = scmp.ne.s32.totalorder %s1760_s14, %s2438_s11  ;;  %p2444_p0 = scmp.lt.s32.totalorder %s2438_s11, %s2438_s11 }
 0x297   :  { %p2445_p1 = por %p2444_p0, %p2443_p13 }
 0x299   :  { %p2446_p2 = pnand %p2445_p1, %p2439_p12 }
 0x29b   :  { %2449 = shalt.err (!%p2446_p2)
}
 0x29c   :  { %s2450_s23 = scalar_lea.hbm %s4760_s20, 2048 }
 0x29d   :  { %p2451_p3 = scmp.ne.s32.totalorder %s4760_s20, %s2450_s23  ;;  %p2454_p4 = scmp.lt.u32.totalorder %s2450_s23, %s4760_s20 }
 0x29f   :  { %p2456_p5 = pnand %p2454_p4, %p2451_p3 }
 0x2a1   :  { %2459 = shalt.err (!%p2456_p5)
}
 0x2a2   :  { %1765 = dma.vmem_to_hbm [thread:$0]  %s1760_s14, 2048, %s4760_s20, [#allocation20], %s2536_s4, %s2536_s4, %s2537_s1  }
 0x2a3   :  { %s2549_s5 = smov [#allocation24]   ;;  %s2550_s19 = smov [#allocation25]  }
 0x2a4   :  { %s1781_s9 = sshll.u32 %s2549_s5, 4  ;;  %s1794_s7 = sshll.u32 %s2550_s19, 4  ;;  %s1782_s9 = int_to_ptr.vmem [resolvable:$true] %s1781_s9  ;;  %s1795_s7 = int_to_ptr.vmem [resolvable:$true] %s1794_s7 }
 0x2a5   :  { %s2460_s15 = scalar_lea.vmem %s1782_s9, 2048  ;;  %p2465_p7 = scmp.lt.s32.totalorder %s1782_s9, %s1782_s9 }
 0x2a6   :  { %p2461_p6 = scmp.ne.s32.totalorder %s1782_s9, %s2460_s15  ;;  %p2466_p8 = scmp.lt.s32.totalorder %s2460_s15, %s2460_s15 }
 0x2a8   :  { %p2467_p9 = por %p2466_p8, %p2465_p7 }
 0x2aa   :  { %p2468_p10 = pnand %p2467_p9, %p2461_p6 }
 0x2ac   :  { %2471 = shalt.err (!%p2468_p10)
}
 0x2ad   :  { %s5120_s3 = sld [smem:[#allocation80_spill]] }
 0x2b3   :  { %s2472_s27 = scalar_lea.hbm %s5120_s3, 2048 }
 0x2b4   :  { %p2473_p11 = scmp.ne.s32.totalorder %s5120_s3, %s2472_s27  ;;  %p2476_p12 = scmp.lt.u32.totalorder %s2472_s27, %s5120_s3 }
 0x2b6   :  { %p2478_p13 = pnand %p2476_p12, %p2473_p11 }
 0x2b8   :  { %2481 = shalt.err (!%p2478_p13)
}
 0x2b9   :  { %1787 = dma.vmem_to_hbm [thread:$0]  %s1782_s9, 2048, %s5120_s3, [#allocation23], %s2536_s4, %s2536_s4, %s2537_s1  }
 0x2ba   :  { %s2482_s21 = scalar_lea.vmem %s1795_s7, 16  ;;  %s2486_s2 = scalar_lea.vmem %s1795_s7, 32 }
 0x2bb   :  { %p2483_p0 = scmp.ne.s32.totalorder %s1795_s7, %s2482_s21  ;;  %p2487_p1 = scmp.lt.s32.totalorder %s1795_s7, %s1795_s7 }
 0x2bc   :  { %p2488_p2 = scmp.lt.s32.totalorder %s2486_s2, %s2482_s21 }
 0x2be   :  { %p2489_p3 = por %p2488_p2, %p2487_p1 }
 0x2c0   :  { %p2490_p4 = pnand %p2489_p3, %p2483_p0 }
 0x2c2   :  { %2493 = shalt.err (!%p2490_p4)
}
 0x2c3   :  { %s5121_s11 = sld [smem:[#allocation81_spill]] }
 0x2c9   :  { %s2494_s29 = scalar_lea.hbm %s5121_s11, 16 }
 0x2ca   :  { %p2495_p5 = scmp.ne.s32.totalorder %s5121_s11, %s2494_s29  ;;  %p2498_p6 = scmp.lt.u32.totalorder %s2494_s29, %s5121_s11 }
 0x2cc   :  { %p2500_p7 = pnand %p2498_p6, %p2495_p5 }
 0x2ce   :  { %2503 = shalt.err (!%p2500_p7)
}
 0x2cf   :  { %1797 = dma.vmem_to_hbm [thread:$0]  %s1795_s7, 16, %s5121_s11, [#allocation26]   ;;  %v1720_v55 = vpop.xlane.xlu1 %1719  ;;  %v1681_v15 = vpop.xlane.xlu0 %1680 }
 0x2d0   :  { %v1721_v62 = vrot.slane %v1720_v55, 4  ;;  %v1682_v32 = vrot.slane %v1681_v15, 4  ;;  %s1839_s25 = spop %1838  ;;  %s5122_s26 = sld [smem:[#allocation82_spill]] }
 0x2d1   :  { %s1841_s6 = spop %1840 }
 0x2d2   :  { %v1722_v3 = vadd.f32 %v1721_v62, %v1720_v55  ;;  %v1683_v58 = vadd.f32 %v1682_v32, %v1681_v15  ;;  %s704_s18 = sadd.f32 %s1841_s6, %s1839_s25  ;;  %s1843_s8 = spop %1842 }
 0x2d3   :  { %s1845_s9 = spop %1844 }
 0x2d4   :  { %v1723_v8 = vrot.slane %v1722_v3, 2  ;;  %v1684_v33 = vrot.slane %v1683_v58, 2  ;;  %s1177_s5 = sadd.f32 %s1843_s8, %s704_s18 }
 0x2d6   :  { %v1724_v57 = vadd.f32 %v1723_v8, %v1722_v3  ;;  %v1685_v63 = vadd.f32 %v1684_v33, %v1683_v58  ;;  %s1216_s19 = sadd.f32 %s1845_s9, %s1177_s5  ;;  %s2504_s20 = scalar_lea.hbm %s5122_s26, 16 }
 0x2d7   :  { %p2505_p8 = scmp.ne.s32.totalorder %s5122_s26, %s2504_s20  ;;  %p2508_p9 = scmp.lt.u32.totalorder %s2504_s20, %s5122_s26 }
 0x2d8   :  { %v1725_v48 = vrot.slane %v1724_v57, 1  ;;  %v1686_v36 = vrot.slane %v1685_v63, 1 }
 0x2d9   :  { %p2510_p10 = pnand %p2508_p9, %p2505_p8 }
 0x2da   :  { %v1726_v28 = vadd.f32 %v1725_v48, %v1724_v57  ;;  %v1687_v9 = vadd.f32 %v1686_v36, %v1685_v63 }
 0x2dc   :  { %1846 = vpush %v1687_v9 }
 0x2dd   :  { %1848 = vpush %v1726_v28 }
 0x30d   :  { %s1847_s7 = spop %1846 }
 0x30e   :  { %s1689_s15 = sadd.f32 %s1847_s7, %s1216_s19  ;;  %s1849_s13 = spop %1848 }
 0x310   :  { %s1728_s12 = sadd.f32 %s1849_s13, %s1689_s15 }
 0x312   :  { %s1729_s3 = smul.f32 0.25, %s1728_s12 }
 0x314   :  { %1731 = sst [smem:[#allocation27]] %s1729_s3 }
 0x315   :  { %2513 = shalt.err (!%p2510_p10)
}
 0x316   :  { %s2551_s2 = smov [#allocation27]  }
 0x317   :  { %1805 = dma.smem_to_hbm %s2551_s2, 16, %s5122_s26, [#allocation5]  }
 0x318   :  { %2524 = dma.done.wait [#allocation4], 2048  }
 0x319   :  { %2525 = vsyncadd [#allocation4], 4294965248 }
 0x31a   :  { %2526 = dma.done.wait [#allocation20], 2064  }
 0x31b   :  { %2527 = vsyncadd [#allocation20], 4294965232 }
 0x31c   :  { %2528 = dma.done.wait [#allocation23], 2064  }
 0x31d   :  { %2529 = vsyncadd [#allocation23], 4294965232 }
 0x31e   :  { %2530 = dma.done.wait [#allocation26], 16  }
 0x31f   :  { %2531 = vsyncadd [#allocation26], 4294967280 }
 0x320   :  { %2532 = dma.done.wait [#allocation5], 16  }
 0x321   :  { %2533 = vsyncadd [#allocation5], 4294967280 }
 0x322   :  { %1827 = sfence }
 0x323   :  { %1828 = vsyncpa [#allocation3], 1 }
 0x324   :  { %1829 = vsyncpa [#allocation7], 1 }
 0x325   :  { %1830 = vsyncpa [#allocation10], 1 }
 0x326   :  { %1831 = vsyncpa [#allocation13], 1 }
 0x327   :  { %1832 = vsyncpa [#allocation16], 1 }
 0x328   :  { %1833 = vsyncpa [#allocation4], 1 }
 0x329   :  { %1834 = vsyncpa [#allocation20], 1 }
 0x32a   :  { %1835 = vsyncpa [#allocation23], 1 }
 0x32b   :  { %1836 = vsyncpa [#allocation26], 1 }
 0x32c   :  { %1837 = vsyncpa [#allocation5], 1 }

</bundles_post_ra>
